<compile_context>
chip_gen: v6e
topology: v6e:2x2x1
jax: 0.10.0
libtpu: 0.0.40
codegen_flags: <defaults>
</compile_context>

<pallas_src>
import math
from functools import partial

import jax
import jax.numpy as jnp
from jax.experimental import pallas as pl
from jax.experimental.pallas import tpu as pltpu


# ---------------------------------------------------------------------------
# Kernel
# ---------------------------------------------------------------------------
def _layer_norm(x, gamma, beta, eps):
    mu = jnp.mean(x, axis=-1, keepdims=True)
    var = jnp.mean((x - mu) ** 2, axis=-1, keepdims=True)
    return (x - mu) * jax.lax.rsqrt(var + eps) * gamma + beta


def _informer_encoder_kernel(x_ref, w_in_ref, b_in_ref, pe_ref,
                             wqkv_ref, bqkv_ref, wo_ref, bo_ref,
                             ln1w_ref, ln1b_ref, w1_ref, b1_ref,
                             w2_ref, b2_ref, ln2w_ref, ln2b_ref,
                             o_ref, *, d_model, nhead, num_layers, eps, scale):
    bt, s, in_dim = x_ref.shape
    rows = bt * s
    hd = d_model // nhead
    inv_sqrt_hd = 1.0 / math.sqrt(hd)

    # ---- input projection (Wx + b) * sqrt(d_model) + positional encoding ----
    x2d = x_ref[...].reshape(rows, in_dim).astype(jnp.bfloat16)
    y = jnp.dot(x2d, w_in_ref[...], preferred_element_type=jnp.float32)
    y = (y + b_in_ref[...]) * scale
    h = (y.reshape(bt, s, d_model) + pe_ref[...][None, :, :]).reshape(rows, d_model)

    # ---- encoder layers (static unroll; dropout = identity in eval mode) ----
    for l in range(num_layers):
        # --- self attention: one big QKV matmul over all rows ---
        qkv = jnp.dot(h.astype(jnp.bfloat16), wqkv_ref[l],
                      preferred_element_type=jnp.float32) + bqkv_ref[l]
        wo = wo_ref[l]

        attn = jnp.zeros((rows, d_model), jnp.float32)
        for hh in range(nhead):
            q = qkv[:, hh * hd:(hh + 1) * hd]
            k = qkv[:, d_model + hh * hd:d_model + (hh + 1) * hd]
            v = qkv[:, 2 * d_model + hh * hd:2 * d_model + (hh + 1) * hd]
            q3 = q.reshape(bt, s, hd).astype(jnp.bfloat16)
            k3 = k.reshape(bt, s, hd).astype(jnp.bfloat16)
            v3 = v.reshape(bt, s, hd).astype(jnp.bfloat16)

            sc = jnp.einsum('bqd,bkd->bqk', q3, k3,
                            preferred_element_type=jnp.float32) * inv_sqrt_hd
            sc = sc - jnp.max(sc, axis=-1, keepdims=True)
            p = jnp.exp(sc)
            p = p * pl.reciprocal(jnp.sum(p, axis=-1, keepdims=True), approx=True)
            oh = jnp.einsum('bqk,bkd->bqd', p.astype(jnp.bfloat16), v3,
                            preferred_element_type=jnp.float32)
            # fold this head straight into the output projection (no concat)
            attn = attn + jnp.dot(oh.reshape(rows, hd).astype(jnp.bfloat16),
                                  wo[hh * hd:(hh + 1) * hd, :],
                                  preferred_element_type=jnp.float32)
        attn = attn + bo_ref[l]

        # --- residual + LayerNorm1 (post-norm) ---
        y1 = _layer_norm(h + attn, ln1w_ref[l], ln1b_ref[l], eps)

        # --- feedforward (relu) ---
        # TODO(synk): for large Bt*S tile this over rows to bound the (rows, dff) buffer.
        f = jnp.dot(y1.astype(jnp.bfloat16), w1_ref[l],
                    preferred_element_type=jnp.float32) + b1_ref[l]
        f = jnp.maximum(f, 0.0)
        f = jnp.dot(f.astype(jnp.bfloat16), w2_ref[l],
                    preferred_element_type=jnp.float32) + b2_ref[l]

        # --- residual + LayerNorm2 ---
        h = _layer_norm(y1 + f, ln2w_ref[l], ln2b_ref[l], eps)

    o_ref[...] = h.reshape(bt, s, d_model).astype(o_ref.dtype)


# ---------------------------------------------------------------------------
# pallas_call wrapper
# ---------------------------------------------------------------------------
def _const_spec(arr):
    zeros = (0,) * arr.ndim
    return pl.BlockSpec(arr.shape, lambda b, _z=zeros: _z)


def informer_encoder_forward(src_sbd, params, *, d_model, nhead, num_layers,
                             batch_tile=None):
    """src_sbd: (S, B, input_dim) PyTorch batch_first=False layout -> (S, B, d_model)."""
    S, B, input_dim = src_sbd.shape
    assert d_model % nhead == 0
    x = jnp.transpose(src_sbd, (1, 0, 2))                       # (B, S, input_dim)

    if batch_tile is None:
        batch_tile = B
    assert B % batch_tile == 0
    n_tiles = B // batch_tile

    args = (x,
            params['w_in'], params['b_in'], params['pe'],
            params['wqkv'], params['bqkv'], params['wo'], params['bo'],
            params['ln1w'], params['ln1b'], params['w1'], params['b1'],
            params['w2'], params['b2'], params['ln2w'], params['ln2b'])

    in_specs = [pl.BlockSpec((batch_tile, S, input_dim), lambda b: (b, 0, 0))]
    in_specs += [_const_spec(a) for a in args[1:]]

    out = pl.pallas_call(
        partial(_informer_encoder_kernel, d_model=d_model, nhead=nhead,
                num_layers=num_layers, eps=1e-5, scale=math.sqrt(d_model)),
        out_shape=jax.ShapeDtypeStruct((B, S, d_model), jnp.float32),
        grid=(n_tiles,),
        in_specs=in_specs,
        out_specs=pl.BlockSpec((batch_tile, S, d_model), lambda b: (b, 0, 0)),
        compiler_params=pltpu.CompilerParams(
            dimension_semantics=("parallel",),
            vmem_limit_bytes=48 * 1024 * 1024),
    )(*args)
    return jnp.transpose(out, (1, 0, 2))                        # back to (S, B, d_model)


# ---------------------------------------------------------------------------
# Parameter / PE construction (deterministic, synthetic)
# ---------------------------------------------------------------------------
def make_positional_encoding(S, d_model):
    pos = jnp.arange(S, dtype=jnp.float32)[:, None]
    div = jnp.exp(jnp.arange(0, d_model, 2, dtype=jnp.float32)
                  * (-math.log(10000.0) / d_model))
    pe = jnp.zeros((S, d_model), dtype=jnp.float32)
    pe = pe.at[:, 0::2].set(jnp.sin(pos * div))
    pe = pe.at[:, 1::2].set(jnp.cos(pos * div))
    return pe


def make_params(key, input_dim, d_model, nhead, num_layers, dff, S):
    keys = jax.random.split(key, 2 + 5 * num_layers)
    std = 0.02
    w_in = (std * jax.random.normal(keys[0], (input_dim, d_model), jnp.float32)
            ).astype(jnp.bfloat16)
    b_in = std * jax.random.normal(keys[1], (1, d_model), jnp.float32)

    wqkv, bqkv, wo, bo = [], [], [], []
    ln1w, ln1b, w1, b1, w2, b2, ln2w, ln2b = [], [], [], [], [], [], [], []
    for l in range(num_layers):
        k0, k1, k2, k3, k4 = keys[2 + 5 * l: 7 + 5 * l]
        wqkv.append((std * jax.random.normal(k0, (d_model, 3 * d_model))).astype(jnp.bfloat16))
        bqkv.append(jnp.zeros((1, 3 * d_model), jnp.float32))
        wo.append((std * jax.random.normal(k1, (d_model, d_model))).astype(jnp.bfloat16))
        bo.append(jnp.zeros((1, d_model), jnp.float32))
        ln1w.append(jnp.ones((1, d_model), jnp.float32))
        ln1b.append(jnp.zeros((1, d_model), jnp.float32))
        w1.append((std * jax.random.normal(k2, (d_model, dff))).astype(jnp.bfloat16))
        b1.append(std * jax.random.normal(k3, (1, dff), jnp.float32))
        w2.append((std * jax.random.normal(k4, (dff, d_model))).astype(jnp.bfloat16))
        b2.append(jnp.zeros((1, d_model), jnp.float32))
        ln2w.append(jnp.ones((1, d_model), jnp.float32))
        ln2b.append(jnp.zeros((1, d_model), jnp.float32))

    stack = lambda xs: jnp.stack(xs, axis=0)
    return dict(
        w_in=w_in, b_in=b_in, pe=make_positional_encoding(S, d_model),
        wqkv=stack(wqkv), bqkv=stack(bqkv), wo=stack(wo), bo=stack(bo),
        ln1w=stack(ln1w), ln1b=stack(ln1b),
        w1=stack(w1), b1=stack(b1), w2=stack(w2), b2=stack(b2),
        ln2w=stack(ln2w), ln2b=stack(ln2b))


# ---------------------------------------------------------------------------
if __name__ == "__main__":
    # TODO(synk): dropout layers are treated as identity (eval-mode forward).
    S, B, input_dim = 16, 4, 8
    d_model, nhead, num_layers, dff = 128, 4, 2, 256   # d_model multiple of 128 -> lane-dense
    batch_tile = 2                                     # grid=(2,): both v7x cores get work

    key = jax.random.PRNGKey(0)
    k_x, k_p = jax.random.split(key)
    src = jax.random.normal(k_x, (S, B, input_dim), jnp.float32)
    params = make_params(k_p, input_dim, d_model, nhead, num_layers, dff, S)

    out = informer_encoder_forward(src, params, d_model=d_model, nhead=nhead,
                                   num_layers=num_layers, batch_tile=batch_tile)
    out = jax.block_until_ready(out)
    assert out.shape == (S, B, d_model)
    print("KERNEL_OK")
</pallas_src>

<mosaic_0001>
module attributes {stable_mosaic.version = 11 : i64} {
  func.func @_informer_encoder_kernel(%arg0: i32, %arg1: memref<2x16x8xf32, #tpu.memory_space<vmem>>, %arg2: memref<8x128xbf16, #tpu.memory_space<vmem>>, %arg3: memref<1x128xf32, #tpu.memory_space<vmem>>, %arg4: memref<16x128xf32, #tpu.memory_space<vmem>>, %arg5: memref<2x128x384xbf16, #tpu.memory_space<vmem>>, %arg6: memref<2x1x384xf32, #tpu.memory_space<vmem>>, %arg7: memref<2x128x128xbf16, #tpu.memory_space<vmem>>, %arg8: memref<2x1x128xf32, #tpu.memory_space<vmem>>, %arg9: memref<2x1x128xf32, #tpu.memory_space<vmem>>, %arg10: memref<2x1x128xf32, #tpu.memory_space<vmem>>, %arg11: memref<2x128x256xbf16, #tpu.memory_space<vmem>>, %arg12: memref<2x1x256xf32, #tpu.memory_space<vmem>>, %arg13: memref<2x256x128xbf16, #tpu.memory_space<vmem>>, %arg14: memref<2x1x128xf32, #tpu.memory_space<vmem>>, %arg15: memref<2x1x128xf32, #tpu.memory_space<vmem>>, %arg16: memref<2x1x128xf32, #tpu.memory_space<vmem>>, %arg17: memref<2x16x128xf32, #tpu.memory_space<vmem>>) attributes {dimension_semantics = [#tpu.dimension_semantics<parallel>], iteration_bounds = array<i64: 2>, scalar_prefetch = 0 : i64, scratch_operands = 0 : i64, tpu.core_type = #tpu.core_type<tc>, window_params = [{transform_indices = @transform_0, window_bounds = array<i64: 2, 16, 8>}, {pipeline_mode = #tpu.pipeline_mode<synchronous>, transform_indices = @transform_1, window_bounds = array<i64: 8, 128>}, {pipeline_mode = #tpu.pipeline_mode<synchronous>, transform_indices = @transform_2, window_bounds = array<i64: 1, 128>}, {pipeline_mode = #tpu.pipeline_mode<synchronous>, transform_indices = @transform_3, window_bounds = array<i64: 16, 128>}, {pipeline_mode = #tpu.pipeline_mode<synchronous>, transform_indices = @transform_4, window_bounds = array<i64: 2, 128, 384>}, {pipeline_mode = #tpu.pipeline_mode<synchronous>, transform_indices = @transform_5, window_bounds = array<i64: 2, 1, 384>}, {pipeline_mode = #tpu.pipeline_mode<synchronous>, transform_indices = @transform_6, window_bounds = array<i64: 2, 128, 128>}, {pipeline_mode = #tpu.pipeline_mode<synchronous>, transform_indices = @transform_7, window_bounds = array<i64: 2, 1, 128>}, {pipeline_mode = #tpu.pipeline_mode<synchronous>, transform_indices = @transform_8, window_bounds = array<i64: 2, 1, 128>}, {pipeline_mode = #tpu.pipeline_mode<synchronous>, transform_indices = @transform_9, window_bounds = array<i64: 2, 1, 128>}, {pipeline_mode = #tpu.pipeline_mode<synchronous>, transform_indices = @transform_10, window_bounds = array<i64: 2, 128, 256>}, {pipeline_mode = #tpu.pipeline_mode<synchronous>, transform_indices = @transform_11, window_bounds = array<i64: 2, 1, 256>}, {pipeline_mode = #tpu.pipeline_mode<synchronous>, transform_indices = @transform_12, window_bounds = array<i64: 2, 256, 128>}, {pipeline_mode = #tpu.pipeline_mode<synchronous>, transform_indices = @transform_13, window_bounds = array<i64: 2, 1, 128>}, {pipeline_mode = #tpu.pipeline_mode<synchronous>, transform_indices = @transform_14, window_bounds = array<i64: 2, 1, 128>}, {pipeline_mode = #tpu.pipeline_mode<synchronous>, transform_indices = @transform_15, window_bounds = array<i64: 2, 1, 128>}, {transform_indices = @transform_16, window_bounds = array<i64: 2, 16, 128>}]} {
    %c0 = arith.constant 0 : index
    %c0_0 = arith.constant 0 : index
    %c0_1 = arith.constant 0 : index
    %0 = vector.load %arg1[%c0, %c0_0, %c0_1] : memref<2x16x8xf32, #tpu.memory_space<vmem>>, vector<2x16x8xf32>
    %1 = vector.shape_cast %0 : vector<2x16x8xf32> to vector<32x8xf32>
    %2 = arith.truncf %1 : vector<32x8xf32> to vector<32x8xbf16>
    %c0_2 = arith.constant 0 : index
    %c0_3 = arith.constant 0 : index
    %3 = vector.load %arg2[%c0_2, %c0_3] : memref<8x128xbf16, #tpu.memory_space<vmem>>, vector<8x128xbf16>
    %cst = arith.constant dense<0.000000e+00> : vector<32x128xf32>
    %4 = tpu.matmul %2, %3, %cst {dimension_numbers = #tpu.dot_dimension_numbers<[1], [0], [0], [1], [0, 0, 1, 1], [], []>} : vector<32x8xbf16>, vector<8x128xbf16>, vector<32x128xf32> -> vector<32x128xf32>
    %c0_4 = arith.constant 0 : index
    %c0_5 = arith.constant 0 : index
    %5 = vector.load %arg3[%c0_4, %c0_5] : memref<1x128xf32, #tpu.memory_space<vmem>>, vector<1x128xf32>
    %6 = vector.broadcast %5 : vector<1x128xf32> to vector<32x128xf32>
    %7 = arith.addf %4, %6 : vector<32x128xf32>
    %cst_6 = arith.constant 11.3137083 : f32
    %8 = vector.broadcast %cst_6 : f32 to vector<32x128xf32>
    %9 = arith.mulf %7, %8 : vector<32x128xf32>
    %10 = vector.shape_cast %9 : vector<32x128xf32> to vector<2x16x128xf32>
    %c0_7 = arith.constant 0 : index
    %c0_8 = arith.constant 0 : index
    %11 = vector.load %arg4[%c0_7, %c0_8] : memref<16x128xf32, #tpu.memory_space<vmem>>, vector<16x128xf32>
    %12 = vector.shape_cast %11 : vector<16x128xf32> to vector<1x16x128xf32>
    %13 = vector.broadcast %12 : vector<1x16x128xf32> to vector<2x16x128xf32>
    %14 = arith.addf %10, %13 : vector<2x16x128xf32>
    %15 = vector.shape_cast %14 : vector<2x16x128xf32> to vector<32x128xf32>
    %16 = arith.truncf %15 : vector<32x128xf32> to vector<32x128xbf16>
    %c0_9 = arith.constant 0 : index
    %c0_10 = arith.constant 0 : index
    %c0_11 = arith.constant 0 : index
    %17 = vector.load %arg5[%c0_9, %c0_10, %c0_11] : memref<2x128x384xbf16, #tpu.memory_space<vmem>>, vector<1x128x384xbf16>
    %18 = vector.shape_cast %17 : vector<1x128x384xbf16> to vector<128x384xbf16>
    %cst_12 = arith.constant dense<0.000000e+00> : vector<32x384xf32>
    %19 = tpu.matmul %16, %18, %cst_12 {dimension_numbers = #tpu.dot_dimension_numbers<[1], [0], [0], [1], [0, 0, 1, 1], [], []>} : vector<32x128xbf16>, vector<128x384xbf16>, vector<32x384xf32> -> vector<32x384xf32>
    %c0_13 = arith.constant 0 : index
    %c0_14 = arith.constant 0 : index
    %c0_15 = arith.constant 0 : index
    %20 = vector.load %arg6[%c0_13, %c0_14, %c0_15] : memref<2x1x384xf32, #tpu.memory_space<vmem>>, vector<1x1x384xf32>
    %21 = vector.shape_cast %20 : vector<1x1x384xf32> to vector<1x384xf32>
    %22 = vector.broadcast %21 : vector<1x384xf32> to vector<32x384xf32>
    %23 = arith.addf %19, %22 : vector<32x384xf32>
    %c0_16 = arith.constant 0 : index
    %c0_17 = arith.constant 0 : index
    %c0_18 = arith.constant 0 : index
    %24 = vector.load %arg7[%c0_16, %c0_17, %c0_18] : memref<2x128x128xbf16, #tpu.memory_space<vmem>>, vector<1x128x128xbf16>
    %25 = vector.shape_cast %24 : vector<1x128x128xbf16> to vector<128x128xbf16>
    %cst_19 = arith.constant 0.000000e+00 : f32
    %26 = vector.broadcast %cst_19 : f32 to vector<32x128xf32>
    %27 = vector.extract_strided_slice %23 {offsets = [0, 0], sizes = [32, 32], strides = [1, 1]} : vector<32x384xf32> to vector<32x32xf32>
    %28 = vector.extract_strided_slice %23 {offsets = [0, 128], sizes = [32, 32], strides = [1, 1]} : vector<32x384xf32> to vector<32x32xf32>
    %29 = vector.extract_strided_slice %23 {offsets = [0, 256], sizes = [32, 32], strides = [1, 1]} : vector<32x384xf32> to vector<32x32xf32>
    %30 = vector.shape_cast %27 : vector<32x32xf32> to vector<2x16x32xf32>
    %31 = arith.truncf %30 : vector<2x16x32xf32> to vector<2x16x32xbf16>
    %32 = vector.shape_cast %28 : vector<32x32xf32> to vector<2x16x32xf32>
    %33 = arith.truncf %32 : vector<2x16x32xf32> to vector<2x16x32xbf16>
    %34 = vector.shape_cast %29 : vector<32x32xf32> to vector<2x16x32xf32>
    %35 = arith.truncf %34 : vector<2x16x32xf32> to vector<2x16x32xbf16>
    "tpu.trace_start"() <{level = 10 : i32, message = "bqd,bkd->bqk"}> : () -> ()
    %cst_20 = arith.constant dense<0.000000e+00> : vector<2x16x16xf32>
    %36 = tpu.matmul %31, %33, %cst_20 {dimension_numbers = #tpu.dot_dimension_numbers<[2], [2], [1], [1], [0, 0, 0, 1, 1, 1], [0], [0]>} : vector<2x16x32xbf16>, vector<2x16x32xbf16>, vector<2x16x16xf32> -> vector<2x16x16xf32>
    "tpu.trace_stop"() : () -> ()
    %cst_21 = arith.constant 0.176776692 : f32
    %37 = vector.broadcast %cst_21 : f32 to vector<2x16x16xf32>
    %38 = arith.mulf %36, %37 : vector<2x16x16xf32>
    %cst_22 = arith.constant dense<0xFF800000> : vector<2x16xf32>
    %39 = vector.multi_reduction <maximumf>, %38, %cst_22 [2] : vector<2x16x16xf32> to vector<2x16xf32>
    %40 = vector.shape_cast %39 : vector<2x16xf32> to vector<2x16x1xf32>
    %41 = vector.broadcast %40 : vector<2x16x1xf32> to vector<2x16x16xf32>
    %42 = arith.subf %38, %41 : vector<2x16x16xf32>
    %43 = math.exp %42 : vector<2x16x16xf32>
    %cst_23 = arith.constant dense<0.000000e+00> : vector<2x16xf32>
    %44 = vector.multi_reduction <add>, %43, %cst_23 [2] : vector<2x16x16xf32> to vector<2x16xf32>
    %45 = vector.shape_cast %44 : vector<2x16xf32> to vector<2x16x1xf32>
    %46 = tpu.reciprocal %45 {approx = true} : vector<2x16x1xf32> -> vector<2x16x1xf32>
    %47 = vector.broadcast %46 : vector<2x16x1xf32> to vector<2x16x16xf32>
    %48 = arith.mulf %43, %47 : vector<2x16x16xf32>
    %49 = arith.truncf %48 : vector<2x16x16xf32> to vector<2x16x16xbf16>
    "tpu.trace_start"() <{level = 10 : i32, message = "bqk,bkd->bqd"}> : () -> ()
    %cst_24 = arith.constant dense<0.000000e+00> : vector<2x16x32xf32>
    %50 = tpu.matmul %49, %35, %cst_24 {dimension_numbers = #tpu.dot_dimension_numbers<[2], [1], [1], [2], [0, 0, 0, 1, 1, 2], [0], [0]>} : vector<2x16x16xbf16>, vector<2x16x32xbf16>, vector<2x16x32xf32> -> vector<2x16x32xf32>
    "tpu.trace_stop"() : () -> ()
    %51 = vector.shape_cast %50 : vector<2x16x32xf32> to vector<32x32xf32>
    %52 = arith.truncf %51 : vector<32x32xf32> to vector<32x32xbf16>
    %53 = vector.extract_strided_slice %25 {offsets = [0, 0], sizes = [32, 128], strides = [1, 1]} : vector<128x128xbf16> to vector<32x128xbf16>
    %cst_25 = arith.constant dense<0.000000e+00> : vector<32x128xf32>
    %54 = tpu.matmul %52, %53, %cst_25 {dimension_numbers = #tpu.dot_dimension_numbers<[1], [0], [0], [1], [0, 0, 1, 1], [], []>} : vector<32x32xbf16>, vector<32x128xbf16>, vector<32x128xf32> -> vector<32x128xf32>
    %55 = arith.addf %26, %54 : vector<32x128xf32>
    %56 = vector.extract_strided_slice %23 {offsets = [0, 32], sizes = [32, 32], strides = [1, 1]} : vector<32x384xf32> to vector<32x32xf32>
    %57 = vector.extract_strided_slice %23 {offsets = [0, 160], sizes = [32, 32], strides = [1, 1]} : vector<32x384xf32> to vector<32x32xf32>
    %58 = vector.extract_strided_slice %23 {offsets = [0, 288], sizes = [32, 32], strides = [1, 1]} : vector<32x384xf32> to vector<32x32xf32>
    %59 = vector.shape_cast %56 : vector<32x32xf32> to vector<2x16x32xf32>
    %60 = arith.truncf %59 : vector<2x16x32xf32> to vector<2x16x32xbf16>
    %61 = vector.shape_cast %57 : vector<32x32xf32> to vector<2x16x32xf32>
    %62 = arith.truncf %61 : vector<2x16x32xf32> to vector<2x16x32xbf16>
    %63 = vector.shape_cast %58 : vector<32x32xf32> to vector<2x16x32xf32>
    %64 = arith.truncf %63 : vector<2x16x32xf32> to vector<2x16x32xbf16>
    "tpu.trace_start"() <{level = 10 : i32, message = "bqd,bkd->bqk"}> : () -> ()
    %cst_26 = arith.constant dense<0.000000e+00> : vector<2x16x16xf32>
    %65 = tpu.matmul %60, %62, %cst_26 {dimension_numbers = #tpu.dot_dimension_numbers<[2], [2], [1], [1], [0, 0, 0, 1, 1, 1], [0], [0]>} : vector<2x16x32xbf16>, vector<2x16x32xbf16>, vector<2x16x16xf32> -> vector<2x16x16xf32>
    "tpu.trace_stop"() : () -> ()
    %cst_27 = arith.constant 0.176776692 : f32
    %66 = vector.broadcast %cst_27 : f32 to vector<2x16x16xf32>
    %67 = arith.mulf %65, %66 : vector<2x16x16xf32>
    %cst_28 = arith.constant dense<0xFF800000> : vector<2x16xf32>
    %68 = vector.multi_reduction <maximumf>, %67, %cst_28 [2] : vector<2x16x16xf32> to vector<2x16xf32>
    %69 = vector.shape_cast %68 : vector<2x16xf32> to vector<2x16x1xf32>
    %70 = vector.broadcast %69 : vector<2x16x1xf32> to vector<2x16x16xf32>
    %71 = arith.subf %67, %70 : vector<2x16x16xf32>
    %72 = math.exp %71 : vector<2x16x16xf32>
    %cst_29 = arith.constant dense<0.000000e+00> : vector<2x16xf32>
    %73 = vector.multi_reduction <add>, %72, %cst_29 [2] : vector<2x16x16xf32> to vector<2x16xf32>
    %74 = vector.shape_cast %73 : vector<2x16xf32> to vector<2x16x1xf32>
    %75 = tpu.reciprocal %74 {approx = true} : vector<2x16x1xf32> -> vector<2x16x1xf32>
    %76 = vector.broadcast %75 : vector<2x16x1xf32> to vector<2x16x16xf32>
    %77 = arith.mulf %72, %76 : vector<2x16x16xf32>
    %78 = arith.truncf %77 : vector<2x16x16xf32> to vector<2x16x16xbf16>
    "tpu.trace_start"() <{level = 10 : i32, message = "bqk,bkd->bqd"}> : () -> ()
    %cst_30 = arith.constant dense<0.000000e+00> : vector<2x16x32xf32>
    %79 = tpu.matmul %78, %64, %cst_30 {dimension_numbers = #tpu.dot_dimension_numbers<[2], [1], [1], [2], [0, 0, 0, 1, 1, 2], [0], [0]>} : vector<2x16x16xbf16>, vector<2x16x32xbf16>, vector<2x16x32xf32> -> vector<2x16x32xf32>
    "tpu.trace_stop"() : () -> ()
    %80 = vector.shape_cast %79 : vector<2x16x32xf32> to vector<32x32xf32>
    %81 = arith.truncf %80 : vector<32x32xf32> to vector<32x32xbf16>
    %82 = vector.extract_strided_slice %25 {offsets = [32, 0], sizes = [32, 128], strides = [1, 1]} : vector<128x128xbf16> to vector<32x128xbf16>
    %cst_31 = arith.constant dense<0.000000e+00> : vector<32x128xf32>
    %83 = tpu.matmul %81, %82, %cst_31 {dimension_numbers = #tpu.dot_dimension_numbers<[1], [0], [0], [1], [0, 0, 1, 1], [], []>} : vector<32x32xbf16>, vector<32x128xbf16>, vector<32x128xf32> -> vector<32x128xf32>
    %84 = arith.addf %55, %83 : vector<32x128xf32>
    %85 = vector.extract_strided_slice %23 {offsets = [0, 64], sizes = [32, 32], strides = [1, 1]} : vector<32x384xf32> to vector<32x32xf32>
    %86 = vector.extract_strided_slice %23 {offsets = [0, 192], sizes = [32, 32], strides = [1, 1]} : vector<32x384xf32> to vector<32x32xf32>
    %87 = vector.extract_strided_slice %23 {offsets = [0, 320], sizes = [32, 32], strides = [1, 1]} : vector<32x384xf32> to vector<32x32xf32>
    %88 = vector.shape_cast %85 : vector<32x32xf32> to vector<2x16x32xf32>
    %89 = arith.truncf %88 : vector<2x16x32xf32> to vector<2x16x32xbf16>
    %90 = vector.shape_cast %86 : vector<32x32xf32> to vector<2x16x32xf32>
    %91 = arith.truncf %90 : vector<2x16x32xf32> to vector<2x16x32xbf16>
    %92 = vector.shape_cast %87 : vector<32x32xf32> to vector<2x16x32xf32>
    %93 = arith.truncf %92 : vector<2x16x32xf32> to vector<2x16x32xbf16>
    "tpu.trace_start"() <{level = 10 : i32, message = "bqd,bkd->bqk"}> : () -> ()
    %cst_32 = arith.constant dense<0.000000e+00> : vector<2x16x16xf32>
    %94 = tpu.matmul %89, %91, %cst_32 {dimension_numbers = #tpu.dot_dimension_numbers<[2], [2], [1], [1], [0, 0, 0, 1, 1, 1], [0], [0]>} : vector<2x16x32xbf16>, vector<2x16x32xbf16>, vector<2x16x16xf32> -> vector<2x16x16xf32>
    "tpu.trace_stop"() : () -> ()
    %cst_33 = arith.constant 0.176776692 : f32
    %95 = vector.broadcast %cst_33 : f32 to vector<2x16x16xf32>
    %96 = arith.mulf %94, %95 : vector<2x16x16xf32>
    %cst_34 = arith.constant dense<0xFF800000> : vector<2x16xf32>
    %97 = vector.multi_reduction <maximumf>, %96, %cst_34 [2] : vector<2x16x16xf32> to vector<2x16xf32>
    %98 = vector.shape_cast %97 : vector<2x16xf32> to vector<2x16x1xf32>
    %99 = vector.broadcast %98 : vector<2x16x1xf32> to vector<2x16x16xf32>
    %100 = arith.subf %96, %99 : vector<2x16x16xf32>
    %101 = math.exp %100 : vector<2x16x16xf32>
    %cst_35 = arith.constant dense<0.000000e+00> : vector<2x16xf32>
    %102 = vector.multi_reduction <add>, %101, %cst_35 [2] : vector<2x16x16xf32> to vector<2x16xf32>
    %103 = vector.shape_cast %102 : vector<2x16xf32> to vector<2x16x1xf32>
    %104 = tpu.reciprocal %103 {approx = true} : vector<2x16x1xf32> -> vector<2x16x1xf32>
    %105 = vector.broadcast %104 : vector<2x16x1xf32> to vector<2x16x16xf32>
    %106 = arith.mulf %101, %105 : vector<2x16x16xf32>
    %107 = arith.truncf %106 : vector<2x16x16xf32> to vector<2x16x16xbf16>
    "tpu.trace_start"() <{level = 10 : i32, message = "bqk,bkd->bqd"}> : () -> ()
    %cst_36 = arith.constant dense<0.000000e+00> : vector<2x16x32xf32>
    %108 = tpu.matmul %107, %93, %cst_36 {dimension_numbers = #tpu.dot_dimension_numbers<[2], [1], [1], [2], [0, 0, 0, 1, 1, 2], [0], [0]>} : vector<2x16x16xbf16>, vector<2x16x32xbf16>, vector<2x16x32xf32> -> vector<2x16x32xf32>
    "tpu.trace_stop"() : () -> ()
    %109 = vector.shape_cast %108 : vector<2x16x32xf32> to vector<32x32xf32>
    %110 = arith.truncf %109 : vector<32x32xf32> to vector<32x32xbf16>
    %111 = vector.extract_strided_slice %25 {offsets = [64, 0], sizes = [32, 128], strides = [1, 1]} : vector<128x128xbf16> to vector<32x128xbf16>
    %cst_37 = arith.constant dense<0.000000e+00> : vector<32x128xf32>
    %112 = tpu.matmul %110, %111, %cst_37 {dimension_numbers = #tpu.dot_dimension_numbers<[1], [0], [0], [1], [0, 0, 1, 1], [], []>} : vector<32x32xbf16>, vector<32x128xbf16>, vector<32x128xf32> -> vector<32x128xf32>
    %113 = arith.addf %84, %112 : vector<32x128xf32>
    %114 = vector.extract_strided_slice %23 {offsets = [0, 96], sizes = [32, 32], strides = [1, 1]} : vector<32x384xf32> to vector<32x32xf32>
    %115 = vector.extract_strided_slice %23 {offsets = [0, 224], sizes = [32, 32], strides = [1, 1]} : vector<32x384xf32> to vector<32x32xf32>
    %116 = vector.extract_strided_slice %23 {offsets = [0, 352], sizes = [32, 32], strides = [1, 1]} : vector<32x384xf32> to vector<32x32xf32>
    %117 = vector.shape_cast %114 : vector<32x32xf32> to vector<2x16x32xf32>
    %118 = arith.truncf %117 : vector<2x16x32xf32> to vector<2x16x32xbf16>
    %119 = vector.shape_cast %115 : vector<32x32xf32> to vector<2x16x32xf32>
    %120 = arith.truncf %119 : vector<2x16x32xf32> to vector<2x16x32xbf16>
    %121 = vector.shape_cast %116 : vector<32x32xf32> to vector<2x16x32xf32>
    %122 = arith.truncf %121 : vector<2x16x32xf32> to vector<2x16x32xbf16>
    "tpu.trace_start"() <{level = 10 : i32, message = "bqd,bkd->bqk"}> : () -> ()
    %cst_38 = arith.constant dense<0.000000e+00> : vector<2x16x16xf32>
    %123 = tpu.matmul %118, %120, %cst_38 {dimension_numbers = #tpu.dot_dimension_numbers<[2], [2], [1], [1], [0, 0, 0, 1, 1, 1], [0], [0]>} : vector<2x16x32xbf16>, vector<2x16x32xbf16>, vector<2x16x16xf32> -> vector<2x16x16xf32>
    "tpu.trace_stop"() : () -> ()
    %cst_39 = arith.constant 0.176776692 : f32
    %124 = vector.broadcast %cst_39 : f32 to vector<2x16x16xf32>
    %125 = arith.mulf %123, %124 : vector<2x16x16xf32>
    %cst_40 = arith.constant dense<0xFF800000> : vector<2x16xf32>
    %126 = vector.multi_reduction <maximumf>, %125, %cst_40 [2] : vector<2x16x16xf32> to vector<2x16xf32>
    %127 = vector.shape_cast %126 : vector<2x16xf32> to vector<2x16x1xf32>
    %128 = vector.broadcast %127 : vector<2x16x1xf32> to vector<2x16x16xf32>
    %129 = arith.subf %125, %128 : vector<2x16x16xf32>
    %130 = math.exp %129 : vector<2x16x16xf32>
    %cst_41 = arith.constant dense<0.000000e+00> : vector<2x16xf32>
    %131 = vector.multi_reduction <add>, %130, %cst_41 [2] : vector<2x16x16xf32> to vector<2x16xf32>
    %132 = vector.shape_cast %131 : vector<2x16xf32> to vector<2x16x1xf32>
    %133 = tpu.reciprocal %132 {approx = true} : vector<2x16x1xf32> -> vector<2x16x1xf32>
    %134 = vector.broadcast %133 : vector<2x16x1xf32> to vector<2x16x16xf32>
    %135 = arith.mulf %130, %134 : vector<2x16x16xf32>
    %136 = arith.truncf %135 : vector<2x16x16xf32> to vector<2x16x16xbf16>
    "tpu.trace_start"() <{level = 10 : i32, message = "bqk,bkd->bqd"}> : () -> ()
    %cst_42 = arith.constant dense<0.000000e+00> : vector<2x16x32xf32>
    %137 = tpu.matmul %136, %122, %cst_42 {dimension_numbers = #tpu.dot_dimension_numbers<[2], [1], [1], [2], [0, 0, 0, 1, 1, 2], [0], [0]>} : vector<2x16x16xbf16>, vector<2x16x32xbf16>, vector<2x16x32xf32> -> vector<2x16x32xf32>
    "tpu.trace_stop"() : () -> ()
    %138 = vector.shape_cast %137 : vector<2x16x32xf32> to vector<32x32xf32>
    %139 = arith.truncf %138 : vector<32x32xf32> to vector<32x32xbf16>
    %140 = vector.extract_strided_slice %25 {offsets = [96, 0], sizes = [32, 128], strides = [1, 1]} : vector<128x128xbf16> to vector<32x128xbf16>
    %cst_43 = arith.constant dense<0.000000e+00> : vector<32x128xf32>
    %141 = tpu.matmul %139, %140, %cst_43 {dimension_numbers = #tpu.dot_dimension_numbers<[1], [0], [0], [1], [0, 0, 1, 1], [], []>} : vector<32x32xbf16>, vector<32x128xbf16>, vector<32x128xf32> -> vector<32x128xf32>
    %142 = arith.addf %113, %141 : vector<32x128xf32>
    %c0_44 = arith.constant 0 : index
    %c0_45 = arith.constant 0 : index
    %c0_46 = arith.constant 0 : index
    %143 = vector.load %arg8[%c0_44, %c0_45, %c0_46] : memref<2x1x128xf32, #tpu.memory_space<vmem>>, vector<1x1x128xf32>
    %144 = vector.shape_cast %143 : vector<1x1x128xf32> to vector<1x128xf32>
    %145 = vector.broadcast %144 : vector<1x128xf32> to vector<32x128xf32>
    %146 = arith.addf %142, %145 : vector<32x128xf32>
    %147 = arith.addf %15, %146 : vector<32x128xf32>
    %c0_47 = arith.constant 0 : index
    %c0_48 = arith.constant 0 : index
    %c0_49 = arith.constant 0 : index
    %148 = vector.load %arg9[%c0_47, %c0_48, %c0_49] : memref<2x1x128xf32, #tpu.memory_space<vmem>>, vector<1x1x128xf32>
    %149 = vector.shape_cast %148 : vector<1x1x128xf32> to vector<1x128xf32>
    %c0_50 = arith.constant 0 : index
    %c0_51 = arith.constant 0 : index
    %c0_52 = arith.constant 0 : index
    %150 = vector.load %arg10[%c0_50, %c0_51, %c0_52] : memref<2x1x128xf32, #tpu.memory_space<vmem>>, vector<1x1x128xf32>
    %151 = vector.shape_cast %150 : vector<1x1x128xf32> to vector<1x128xf32>
    %cst_53 = arith.constant dense<0.000000e+00> : vector<32xf32>
    %152 = vector.multi_reduction <add>, %147, %cst_53 [1] : vector<32x128xf32> to vector<32xf32>
    %153 = vector.shape_cast %152 : vector<32xf32> to vector<32x1xf32>
    %cst_54 = arith.constant 1.280000e+02 : f32
    %154 = vector.broadcast %cst_54 : f32 to vector<32x1xf32>
    %155 = arith.divf %153, %154 : vector<32x1xf32>
    %156 = vector.broadcast %155 : vector<32x1xf32> to vector<32x128xf32>
    %157 = arith.subf %147, %156 : vector<32x128xf32>
    %158 = arith.mulf %157, %157 : vector<32x128xf32>
    %cst_55 = arith.constant dense<0.000000e+00> : vector<32xf32>
    %159 = vector.multi_reduction <add>, %158, %cst_55 [1] : vector<32x128xf32> to vector<32xf32>
    %160 = vector.shape_cast %159 : vector<32xf32> to vector<32x1xf32>
    %cst_56 = arith.constant 1.280000e+02 : f32
    %161 = vector.broadcast %cst_56 : f32 to vector<32x1xf32>
    %162 = arith.divf %160, %161 : vector<32x1xf32>
    %163 = vector.broadcast %155 : vector<32x1xf32> to vector<32x128xf32>
    %164 = arith.subf %147, %163 : vector<32x128xf32>
    %cst_57 = arith.constant 9.99999974E-6 : f32
    %165 = vector.broadcast %cst_57 : f32 to vector<32x1xf32>
    %166 = arith.addf %162, %165 : vector<32x1xf32>
    %167 = math.rsqrt %166 : vector<32x1xf32>
    %168 = vector.broadcast %167 : vector<32x1xf32> to vector<32x128xf32>
    %169 = arith.mulf %164, %168 : vector<32x128xf32>
    %170 = vector.broadcast %149 : vector<1x128xf32> to vector<32x128xf32>
    %171 = arith.mulf %169, %170 : vector<32x128xf32>
    %172 = vector.broadcast %151 : vector<1x128xf32> to vector<32x128xf32>
    %173 = arith.addf %171, %172 : vector<32x128xf32>
    %174 = arith.truncf %173 : vector<32x128xf32> to vector<32x128xbf16>
    %c0_58 = arith.constant 0 : index
    %c0_59 = arith.constant 0 : index
    %c0_60 = arith.constant 0 : index
    %175 = vector.load %arg11[%c0_58, %c0_59, %c0_60] : memref<2x128x256xbf16, #tpu.memory_space<vmem>>, vector<1x128x256xbf16>
    %176 = vector.shape_cast %175 : vector<1x128x256xbf16> to vector<128x256xbf16>
    %cst_61 = arith.constant dense<0.000000e+00> : vector<32x256xf32>
    %177 = tpu.matmul %174, %176, %cst_61 {dimension_numbers = #tpu.dot_dimension_numbers<[1], [0], [0], [1], [0, 0, 1, 1], [], []>} : vector<32x128xbf16>, vector<128x256xbf16>, vector<32x256xf32> -> vector<32x256xf32>
    %c0_62 = arith.constant 0 : index
    %c0_63 = arith.constant 0 : index
    %c0_64 = arith.constant 0 : index
    %178 = vector.load %arg12[%c0_62, %c0_63, %c0_64] : memref<2x1x256xf32, #tpu.memory_space<vmem>>, vector<1x1x256xf32>
    %179 = vector.shape_cast %178 : vector<1x1x256xf32> to vector<1x256xf32>
    %180 = vector.broadcast %179 : vector<1x256xf32> to vector<32x256xf32>
    %181 = arith.addf %177, %180 : vector<32x256xf32>
    %cst_65 = arith.constant 0.000000e+00 : f32
    %182 = vector.broadcast %cst_65 : f32 to vector<32x256xf32>
    %183 = arith.maximumf %181, %182 : vector<32x256xf32>
    %184 = arith.truncf %183 : vector<32x256xf32> to vector<32x256xbf16>
    %c0_66 = arith.constant 0 : index
    %c0_67 = arith.constant 0 : index
    %c0_68 = arith.constant 0 : index
    %185 = vector.load %arg13[%c0_66, %c0_67, %c0_68] : memref<2x256x128xbf16, #tpu.memory_space<vmem>>, vector<1x256x128xbf16>
    %186 = vector.shape_cast %185 : vector<1x256x128xbf16> to vector<256x128xbf16>
    %cst_69 = arith.constant dense<0.000000e+00> : vector<32x128xf32>
    %187 = tpu.matmul %184, %186, %cst_69 {dimension_numbers = #tpu.dot_dimension_numbers<[1], [0], [0], [1], [0, 0, 1, 1], [], []>} : vector<32x256xbf16>, vector<256x128xbf16>, vector<32x128xf32> -> vector<32x128xf32>
    %c0_70 = arith.constant 0 : index
    %c0_71 = arith.constant 0 : index
    %c0_72 = arith.constant 0 : index
    %188 = vector.load %arg14[%c0_70, %c0_71, %c0_72] : memref<2x1x128xf32, #tpu.memory_space<vmem>>, vector<1x1x128xf32>
    %189 = vector.shape_cast %188 : vector<1x1x128xf32> to vector<1x128xf32>
    %190 = vector.broadcast %189 : vector<1x128xf32> to vector<32x128xf32>
    %191 = arith.addf %187, %190 : vector<32x128xf32>
    %192 = arith.addf %173, %191 : vector<32x128xf32>
    %c0_73 = arith.constant 0 : index
    %c0_74 = arith.constant 0 : index
    %c0_75 = arith.constant 0 : index
    %193 = vector.load %arg15[%c0_73, %c0_74, %c0_75] : memref<2x1x128xf32, #tpu.memory_space<vmem>>, vector<1x1x128xf32>
    %194 = vector.shape_cast %193 : vector<1x1x128xf32> to vector<1x128xf32>
    %c0_76 = arith.constant 0 : index
    %c0_77 = arith.constant 0 : index
    %c0_78 = arith.constant 0 : index
    %195 = vector.load %arg16[%c0_76, %c0_77, %c0_78] : memref<2x1x128xf32, #tpu.memory_space<vmem>>, vector<1x1x128xf32>
    %196 = vector.shape_cast %195 : vector<1x1x128xf32> to vector<1x128xf32>
    %cst_79 = arith.constant dense<0.000000e+00> : vector<32xf32>
    %197 = vector.multi_reduction <add>, %192, %cst_79 [1] : vector<32x128xf32> to vector<32xf32>
    %198 = vector.shape_cast %197 : vector<32xf32> to vector<32x1xf32>
    %cst_80 = arith.constant 1.280000e+02 : f32
    %199 = vector.broadcast %cst_80 : f32 to vector<32x1xf32>
    %200 = arith.divf %198, %199 : vector<32x1xf32>
    %201 = vector.broadcast %200 : vector<32x1xf32> to vector<32x128xf32>
    %202 = arith.subf %192, %201 : vector<32x128xf32>
    %203 = arith.mulf %202, %202 : vector<32x128xf32>
    %cst_81 = arith.constant dense<0.000000e+00> : vector<32xf32>
    %204 = vector.multi_reduction <add>, %203, %cst_81 [1] : vector<32x128xf32> to vector<32xf32>
    %205 = vector.shape_cast %204 : vector<32xf32> to vector<32x1xf32>
    %cst_82 = arith.constant 1.280000e+02 : f32
    %206 = vector.broadcast %cst_82 : f32 to vector<32x1xf32>
    %207 = arith.divf %205, %206 : vector<32x1xf32>
    %208 = vector.broadcast %200 : vector<32x1xf32> to vector<32x128xf32>
    %209 = arith.subf %192, %208 : vector<32x128xf32>
    %cst_83 = arith.constant 9.99999974E-6 : f32
    %210 = vector.broadcast %cst_83 : f32 to vector<32x1xf32>
    %211 = arith.addf %207, %210 : vector<32x1xf32>
    %212 = math.rsqrt %211 : vector<32x1xf32>
    %213 = vector.broadcast %212 : vector<32x1xf32> to vector<32x128xf32>
    %214 = arith.mulf %209, %213 : vector<32x128xf32>
    %215 = vector.broadcast %194 : vector<1x128xf32> to vector<32x128xf32>
    %216 = arith.mulf %214, %215 : vector<32x128xf32>
    %217 = vector.broadcast %196 : vector<1x128xf32> to vector<32x128xf32>
    %218 = arith.addf %216, %217 : vector<32x128xf32>
    %219 = arith.truncf %218 : vector<32x128xf32> to vector<32x128xbf16>
    %c1 = arith.constant 1 : index
    %c0_84 = arith.constant 0 : index
    %c0_85 = arith.constant 0 : index
    %220 = vector.load %arg5[%c1, %c0_84, %c0_85] : memref<2x128x384xbf16, #tpu.memory_space<vmem>>, vector<1x128x384xbf16>
    %221 = vector.shape_cast %220 : vector<1x128x384xbf16> to vector<128x384xbf16>
    %cst_86 = arith.constant dense<0.000000e+00> : vector<32x384xf32>
    %222 = tpu.matmul %219, %221, %cst_86 {dimension_numbers = #tpu.dot_dimension_numbers<[1], [0], [0], [1], [0, 0, 1, 1], [], []>} : vector<32x128xbf16>, vector<128x384xbf16>, vector<32x384xf32> -> vector<32x384xf32>
    %c1_87 = arith.constant 1 : index
    %c0_88 = arith.constant 0 : index
    %c0_89 = arith.constant 0 : index
    %223 = vector.load %arg6[%c1_87, %c0_88, %c0_89] : memref<2x1x384xf32, #tpu.memory_space<vmem>>, vector<1x1x384xf32>
    %224 = vector.shape_cast %223 : vector<1x1x384xf32> to vector<1x384xf32>
    %225 = vector.broadcast %224 : vector<1x384xf32> to vector<32x384xf32>
    %226 = arith.addf %222, %225 : vector<32x384xf32>
    %c1_90 = arith.constant 1 : index
    %c0_91 = arith.constant 0 : index
    %c0_92 = arith.constant 0 : index
    %227 = vector.load %arg7[%c1_90, %c0_91, %c0_92] : memref<2x128x128xbf16, #tpu.memory_space<vmem>>, vector<1x128x128xbf16>
    %228 = vector.shape_cast %227 : vector<1x128x128xbf16> to vector<128x128xbf16>
    %cst_93 = arith.constant 0.000000e+00 : f32
    %229 = vector.broadcast %cst_93 : f32 to vector<32x128xf32>
    %230 = vector.extract_strided_slice %226 {offsets = [0, 0], sizes = [32, 32], strides = [1, 1]} : vector<32x384xf32> to vector<32x32xf32>
    %231 = vector.extract_strided_slice %226 {offsets = [0, 128], sizes = [32, 32], strides = [1, 1]} : vector<32x384xf32> to vector<32x32xf32>
    %232 = vector.extract_strided_slice %226 {offsets = [0, 256], sizes = [32, 32], strides = [1, 1]} : vector<32x384xf32> to vector<32x32xf32>
    %233 = vector.shape_cast %230 : vector<32x32xf32> to vector<2x16x32xf32>
    %234 = arith.truncf %233 : vector<2x16x32xf32> to vector<2x16x32xbf16>
    %235 = vector.shape_cast %231 : vector<32x32xf32> to vector<2x16x32xf32>
    %236 = arith.truncf %235 : vector<2x16x32xf32> to vector<2x16x32xbf16>
    %237 = vector.shape_cast %232 : vector<32x32xf32> to vector<2x16x32xf32>
    %238 = arith.truncf %237 : vector<2x16x32xf32> to vector<2x16x32xbf16>
    "tpu.trace_start"() <{level = 10 : i32, message = "bqd,bkd->bqk"}> : () -> ()
    %cst_94 = arith.constant dense<0.000000e+00> : vector<2x16x16xf32>
    %239 = tpu.matmul %234, %236, %cst_94 {dimension_numbers = #tpu.dot_dimension_numbers<[2], [2], [1], [1], [0, 0, 0, 1, 1, 1], [0], [0]>} : vector<2x16x32xbf16>, vector<2x16x32xbf16>, vector<2x16x16xf32> -> vector<2x16x16xf32>
    "tpu.trace_stop"() : () -> ()
    %cst_95 = arith.constant 0.176776692 : f32
    %240 = vector.broadcast %cst_95 : f32 to vector<2x16x16xf32>
    %241 = arith.mulf %239, %240 : vector<2x16x16xf32>
    %cst_96 = arith.constant dense<0xFF800000> : vector<2x16xf32>
    %242 = vector.multi_reduction <maximumf>, %241, %cst_96 [2] : vector<2x16x16xf32> to vector<2x16xf32>
    %243 = vector.shape_cast %242 : vector<2x16xf32> to vector<2x16x1xf32>
    %244 = vector.broadcast %243 : vector<2x16x1xf32> to vector<2x16x16xf32>
    %245 = arith.subf %241, %244 : vector<2x16x16xf32>
    %246 = math.exp %245 : vector<2x16x16xf32>
    %cst_97 = arith.constant dense<0.000000e+00> : vector<2x16xf32>
    %247 = vector.multi_reduction <add>, %246, %cst_97 [2] : vector<2x16x16xf32> to vector<2x16xf32>
    %248 = vector.shape_cast %247 : vector<2x16xf32> to vector<2x16x1xf32>
    %249 = tpu.reciprocal %248 {approx = true} : vector<2x16x1xf32> -> vector<2x16x1xf32>
    %250 = vector.broadcast %249 : vector<2x16x1xf32> to vector<2x16x16xf32>
    %251 = arith.mulf %246, %250 : vector<2x16x16xf32>
    %252 = arith.truncf %251 : vector<2x16x16xf32> to vector<2x16x16xbf16>
    "tpu.trace_start"() <{level = 10 : i32, message = "bqk,bkd->bqd"}> : () -> ()
    %cst_98 = arith.constant dense<0.000000e+00> : vector<2x16x32xf32>
    %253 = tpu.matmul %252, %238, %cst_98 {dimension_numbers = #tpu.dot_dimension_numbers<[2], [1], [1], [2], [0, 0, 0, 1, 1, 2], [0], [0]>} : vector<2x16x16xbf16>, vector<2x16x32xbf16>, vector<2x16x32xf32> -> vector<2x16x32xf32>
    "tpu.trace_stop"() : () -> ()
    %254 = vector.shape_cast %253 : vector<2x16x32xf32> to vector<32x32xf32>
    %255 = arith.truncf %254 : vector<32x32xf32> to vector<32x32xbf16>
    %256 = vector.extract_strided_slice %228 {offsets = [0, 0], sizes = [32, 128], strides = [1, 1]} : vector<128x128xbf16> to vector<32x128xbf16>
    %cst_99 = arith.constant dense<0.000000e+00> : vector<32x128xf32>
    %257 = tpu.matmul %255, %256, %cst_99 {dimension_numbers = #tpu.dot_dimension_numbers<[1], [0], [0], [1], [0, 0, 1, 1], [], []>} : vector<32x32xbf16>, vector<32x128xbf16>, vector<32x128xf32> -> vector<32x128xf32>
    %258 = arith.addf %229, %257 : vector<32x128xf32>
    %259 = vector.extract_strided_slice %226 {offsets = [0, 32], sizes = [32, 32], strides = [1, 1]} : vector<32x384xf32> to vector<32x32xf32>
    %260 = vector.extract_strided_slice %226 {offsets = [0, 160], sizes = [32, 32], strides = [1, 1]} : vector<32x384xf32> to vector<32x32xf32>
    %261 = vector.extract_strided_slice %226 {offsets = [0, 288], sizes = [32, 32], strides = [1, 1]} : vector<32x384xf32> to vector<32x32xf32>
    %262 = vector.shape_cast %259 : vector<32x32xf32> to vector<2x16x32xf32>
    %263 = arith.truncf %262 : vector<2x16x32xf32> to vector<2x16x32xbf16>
    %264 = vector.shape_cast %260 : vector<32x32xf32> to vector<2x16x32xf32>
    %265 = arith.truncf %264 : vector<2x16x32xf32> to vector<2x16x32xbf16>
    %266 = vector.shape_cast %261 : vector<32x32xf32> to vector<2x16x32xf32>
    %267 = arith.truncf %266 : vector<2x16x32xf32> to vector<2x16x32xbf16>
    "tpu.trace_start"() <{level = 10 : i32, message = "bqd,bkd->bqk"}> : () -> ()
    %cst_100 = arith.constant dense<0.000000e+00> : vector<2x16x16xf32>
    %268 = tpu.matmul %263, %265, %cst_100 {dimension_numbers = #tpu.dot_dimension_numbers<[2], [2], [1], [1], [0, 0, 0, 1, 1, 1], [0], [0]>} : vector<2x16x32xbf16>, vector<2x16x32xbf16>, vector<2x16x16xf32> -> vector<2x16x16xf32>
    "tpu.trace_stop"() : () -> ()
    %cst_101 = arith.constant 0.176776692 : f32
    %269 = vector.broadcast %cst_101 : f32 to vector<2x16x16xf32>
    %270 = arith.mulf %268, %269 : vector<2x16x16xf32>
    %cst_102 = arith.constant dense<0xFF800000> : vector<2x16xf32>
    %271 = vector.multi_reduction <maximumf>, %270, %cst_102 [2] : vector<2x16x16xf32> to vector<2x16xf32>
    %272 = vector.shape_cast %271 : vector<2x16xf32> to vector<2x16x1xf32>
    %273 = vector.broadcast %272 : vector<2x16x1xf32> to vector<2x16x16xf32>
    %274 = arith.subf %270, %273 : vector<2x16x16xf32>
    %275 = math.exp %274 : vector<2x16x16xf32>
    %cst_103 = arith.constant dense<0.000000e+00> : vector<2x16xf32>
    %276 = vector.multi_reduction <add>, %275, %cst_103 [2] : vector<2x16x16xf32> to vector<2x16xf32>
    %277 = vector.shape_cast %276 : vector<2x16xf32> to vector<2x16x1xf32>
    %278 = tpu.reciprocal %277 {approx = true} : vector<2x16x1xf32> -> vector<2x16x1xf32>
    %279 = vector.broadcast %278 : vector<2x16x1xf32> to vector<2x16x16xf32>
    %280 = arith.mulf %275, %279 : vector<2x16x16xf32>
    %281 = arith.truncf %280 : vector<2x16x16xf32> to vector<2x16x16xbf16>
    "tpu.trace_start"() <{level = 10 : i32, message = "bqk,bkd->bqd"}> : () -> ()
    %cst_104 = arith.constant dense<0.000000e+00> : vector<2x16x32xf32>
    %282 = tpu.matmul %281, %267, %cst_104 {dimension_numbers = #tpu.dot_dimension_numbers<[2], [1], [1], [2], [0, 0, 0, 1, 1, 2], [0], [0]>} : vector<2x16x16xbf16>, vector<2x16x32xbf16>, vector<2x16x32xf32> -> vector<2x16x32xf32>
    "tpu.trace_stop"() : () -> ()
    %283 = vector.shape_cast %282 : vector<2x16x32xf32> to vector<32x32xf32>
    %284 = arith.truncf %283 : vector<32x32xf32> to vector<32x32xbf16>
    %285 = vector.extract_strided_slice %228 {offsets = [32, 0], sizes = [32, 128], strides = [1, 1]} : vector<128x128xbf16> to vector<32x128xbf16>
    %cst_105 = arith.constant dense<0.000000e+00> : vector<32x128xf32>
    %286 = tpu.matmul %284, %285, %cst_105 {dimension_numbers = #tpu.dot_dimension_numbers<[1], [0], [0], [1], [0, 0, 1, 1], [], []>} : vector<32x32xbf16>, vector<32x128xbf16>, vector<32x128xf32> -> vector<32x128xf32>
    %287 = arith.addf %258, %286 : vector<32x128xf32>
    %288 = vector.extract_strided_slice %226 {offsets = [0, 64], sizes = [32, 32], strides = [1, 1]} : vector<32x384xf32> to vector<32x32xf32>
    %289 = vector.extract_strided_slice %226 {offsets = [0, 192], sizes = [32, 32], strides = [1, 1]} : vector<32x384xf32> to vector<32x32xf32>
    %290 = vector.extract_strided_slice %226 {offsets = [0, 320], sizes = [32, 32], strides = [1, 1]} : vector<32x384xf32> to vector<32x32xf32>
    %291 = vector.shape_cast %288 : vector<32x32xf32> to vector<2x16x32xf32>
    %292 = arith.truncf %291 : vector<2x16x32xf32> to vector<2x16x32xbf16>
    %293 = vector.shape_cast %289 : vector<32x32xf32> to vector<2x16x32xf32>
    %294 = arith.truncf %293 : vector<2x16x32xf32> to vector<2x16x32xbf16>
    %295 = vector.shape_cast %290 : vector<32x32xf32> to vector<2x16x32xf32>
    %296 = arith.truncf %295 : vector<2x16x32xf32> to vector<2x16x32xbf16>
    "tpu.trace_start"() <{level = 10 : i32, message = "bqd,bkd->bqk"}> : () -> ()
    %cst_106 = arith.constant dense<0.000000e+00> : vector<2x16x16xf32>
    %297 = tpu.matmul %292, %294, %cst_106 {dimension_numbers = #tpu.dot_dimension_numbers<[2], [2], [1], [1], [0, 0, 0, 1, 1, 1], [0], [0]>} : vector<2x16x32xbf16>, vector<2x16x32xbf16>, vector<2x16x16xf32> -> vector<2x16x16xf32>
    "tpu.trace_stop"() : () -> ()
    %cst_107 = arith.constant 0.176776692 : f32
    %298 = vector.broadcast %cst_107 : f32 to vector<2x16x16xf32>
    %299 = arith.mulf %297, %298 : vector<2x16x16xf32>
    %cst_108 = arith.constant dense<0xFF800000> : vector<2x16xf32>
    %300 = vector.multi_reduction <maximumf>, %299, %cst_108 [2] : vector<2x16x16xf32> to vector<2x16xf32>
    %301 = vector.shape_cast %300 : vector<2x16xf32> to vector<2x16x1xf32>
    %302 = vector.broadcast %301 : vector<2x16x1xf32> to vector<2x16x16xf32>
    %303 = arith.subf %299, %302 : vector<2x16x16xf32>
    %304 = math.exp %303 : vector<2x16x16xf32>
    %cst_109 = arith.constant dense<0.000000e+00> : vector<2x16xf32>
    %305 = vector.multi_reduction <add>, %304, %cst_109 [2] : vector<2x16x16xf32> to vector<2x16xf32>
    %306 = vector.shape_cast %305 : vector<2x16xf32> to vector<2x16x1xf32>
    %307 = tpu.reciprocal %306 {approx = true} : vector<2x16x1xf32> -> vector<2x16x1xf32>
    %308 = vector.broadcast %307 : vector<2x16x1xf32> to vector<2x16x16xf32>
    %309 = arith.mulf %304, %308 : vector<2x16x16xf32>
    %310 = arith.truncf %309 : vector<2x16x16xf32> to vector<2x16x16xbf16>
    "tpu.trace_start"() <{level = 10 : i32, message = "bqk,bkd->bqd"}> : () -> ()
    %cst_110 = arith.constant dense<0.000000e+00> : vector<2x16x32xf32>
    %311 = tpu.matmul %310, %296, %cst_110 {dimension_numbers = #tpu.dot_dimension_numbers<[2], [1], [1], [2], [0, 0, 0, 1, 1, 2], [0], [0]>} : vector<2x16x16xbf16>, vector<2x16x32xbf16>, vector<2x16x32xf32> -> vector<2x16x32xf32>
    "tpu.trace_stop"() : () -> ()
    %312 = vector.shape_cast %311 : vector<2x16x32xf32> to vector<32x32xf32>
    %313 = arith.truncf %312 : vector<32x32xf32> to vector<32x32xbf16>
    %314 = vector.extract_strided_slice %228 {offsets = [64, 0], sizes = [32, 128], strides = [1, 1]} : vector<128x128xbf16> to vector<32x128xbf16>
    %cst_111 = arith.constant dense<0.000000e+00> : vector<32x128xf32>
    %315 = tpu.matmul %313, %314, %cst_111 {dimension_numbers = #tpu.dot_dimension_numbers<[1], [0], [0], [1], [0, 0, 1, 1], [], []>} : vector<32x32xbf16>, vector<32x128xbf16>, vector<32x128xf32> -> vector<32x128xf32>
    %316 = arith.addf %287, %315 : vector<32x128xf32>
    %317 = vector.extract_strided_slice %226 {offsets = [0, 96], sizes = [32, 32], strides = [1, 1]} : vector<32x384xf32> to vector<32x32xf32>
    %318 = vector.extract_strided_slice %226 {offsets = [0, 224], sizes = [32, 32], strides = [1, 1]} : vector<32x384xf32> to vector<32x32xf32>
    %319 = vector.extract_strided_slice %226 {offsets = [0, 352], sizes = [32, 32], strides = [1, 1]} : vector<32x384xf32> to vector<32x32xf32>
    %320 = vector.shape_cast %317 : vector<32x32xf32> to vector<2x16x32xf32>
    %321 = arith.truncf %320 : vector<2x16x32xf32> to vector<2x16x32xbf16>
    %322 = vector.shape_cast %318 : vector<32x32xf32> to vector<2x16x32xf32>
    %323 = arith.truncf %322 : vector<2x16x32xf32> to vector<2x16x32xbf16>
    %324 = vector.shape_cast %319 : vector<32x32xf32> to vector<2x16x32xf32>
    %325 = arith.truncf %324 : vector<2x16x32xf32> to vector<2x16x32xbf16>
    "tpu.trace_start"() <{level = 10 : i32, message = "bqd,bkd->bqk"}> : () -> ()
    %cst_112 = arith.constant dense<0.000000e+00> : vector<2x16x16xf32>
    %326 = tpu.matmul %321, %323, %cst_112 {dimension_numbers = #tpu.dot_dimension_numbers<[2], [2], [1], [1], [0, 0, 0, 1, 1, 1], [0], [0]>} : vector<2x16x32xbf16>, vector<2x16x32xbf16>, vector<2x16x16xf32> -> vector<2x16x16xf32>
    "tpu.trace_stop"() : () -> ()
    %cst_113 = arith.constant 0.176776692 : f32
    %327 = vector.broadcast %cst_113 : f32 to vector<2x16x16xf32>
    %328 = arith.mulf %326, %327 : vector<2x16x16xf32>
    %cst_114 = arith.constant dense<0xFF800000> : vector<2x16xf32>
    %329 = vector.multi_reduction <maximumf>, %328, %cst_114 [2] : vector<2x16x16xf32> to vector<2x16xf32>
    %330 = vector.shape_cast %329 : vector<2x16xf32> to vector<2x16x1xf32>
    %331 = vector.broadcast %330 : vector<2x16x1xf32> to vector<2x16x16xf32>
    %332 = arith.subf %328, %331 : vector<2x16x16xf32>
    %333 = math.exp %332 : vector<2x16x16xf32>
    %cst_115 = arith.constant dense<0.000000e+00> : vector<2x16xf32>
    %334 = vector.multi_reduction <add>, %333, %cst_115 [2] : vector<2x16x16xf32> to vector<2x16xf32>
    %335 = vector.shape_cast %334 : vector<2x16xf32> to vector<2x16x1xf32>
    %336 = tpu.reciprocal %335 {approx = true} : vector<2x16x1xf32> -> vector<2x16x1xf32>
    %337 = vector.broadcast %336 : vector<2x16x1xf32> to vector<2x16x16xf32>
    %338 = arith.mulf %333, %337 : vector<2x16x16xf32>
    %339 = arith.truncf %338 : vector<2x16x16xf32> to vector<2x16x16xbf16>
    "tpu.trace_start"() <{level = 10 : i32, message = "bqk,bkd->bqd"}> : () -> ()
    %cst_116 = arith.constant dense<0.000000e+00> : vector<2x16x32xf32>
    %340 = tpu.matmul %339, %325, %cst_116 {dimension_numbers = #tpu.dot_dimension_numbers<[2], [1], [1], [2], [0, 0, 0, 1, 1, 2], [0], [0]>} : vector<2x16x16xbf16>, vector<2x16x32xbf16>, vector<2x16x32xf32> -> vector<2x16x32xf32>
    "tpu.trace_stop"() : () -> ()
    %341 = vector.shape_cast %340 : vector<2x16x32xf32> to vector<32x32xf32>
    %342 = arith.truncf %341 : vector<32x32xf32> to vector<32x32xbf16>
    %343 = vector.extract_strided_slice %228 {offsets = [96, 0], sizes = [32, 128], strides = [1, 1]} : vector<128x128xbf16> to vector<32x128xbf16>
    %cst_117 = arith.constant dense<0.000000e+00> : vector<32x128xf32>
    %344 = tpu.matmul %342, %343, %cst_117 {dimension_numbers = #tpu.dot_dimension_numbers<[1], [0], [0], [1], [0, 0, 1, 1], [], []>} : vector<32x32xbf16>, vector<32x128xbf16>, vector<32x128xf32> -> vector<32x128xf32>
    %345 = arith.addf %316, %344 : vector<32x128xf32>
    %c1_118 = arith.constant 1 : index
    %c0_119 = arith.constant 0 : index
    %c0_120 = arith.constant 0 : index
    %346 = vector.load %arg8[%c1_118, %c0_119, %c0_120] : memref<2x1x128xf32, #tpu.memory_space<vmem>>, vector<1x1x128xf32>
    %347 = vector.shape_cast %346 : vector<1x1x128xf32> to vector<1x128xf32>
    %348 = vector.broadcast %347 : vector<1x128xf32> to vector<32x128xf32>
    %349 = arith.addf %345, %348 : vector<32x128xf32>
    %350 = arith.addf %218, %349 : vector<32x128xf32>
    %c1_121 = arith.constant 1 : index
    %c0_122 = arith.constant 0 : index
    %c0_123 = arith.constant 0 : index
    %351 = vector.load %arg9[%c1_121, %c0_122, %c0_123] : memref<2x1x128xf32, #tpu.memory_space<vmem>>, vector<1x1x128xf32>
    %352 = vector.shape_cast %351 : vector<1x1x128xf32> to vector<1x128xf32>
    %c1_124 = arith.constant 1 : index
    %c0_125 = arith.constant 0 : index
    %c0_126 = arith.constant 0 : index
    %353 = vector.load %arg10[%c1_124, %c0_125, %c0_126] : memref<2x1x128xf32, #tpu.memory_space<vmem>>, vector<1x1x128xf32>
    %354 = vector.shape_cast %353 : vector<1x1x128xf32> to vector<1x128xf32>
    %cst_127 = arith.constant dense<0.000000e+00> : vector<32xf32>
    %355 = vector.multi_reduction <add>, %350, %cst_127 [1] : vector<32x128xf32> to vector<32xf32>
    %356 = vector.shape_cast %355 : vector<32xf32> to vector<32x1xf32>
    %cst_128 = arith.constant 1.280000e+02 : f32
    %357 = vector.broadcast %cst_128 : f32 to vector<32x1xf32>
    %358 = arith.divf %356, %357 : vector<32x1xf32>
    %359 = vector.broadcast %358 : vector<32x1xf32> to vector<32x128xf32>
    %360 = arith.subf %350, %359 : vector<32x128xf32>
    %361 = arith.mulf %360, %360 : vector<32x128xf32>
    %cst_129 = arith.constant dense<0.000000e+00> : vector<32xf32>
    %362 = vector.multi_reduction <add>, %361, %cst_129 [1] : vector<32x128xf32> to vector<32xf32>
    %363 = vector.shape_cast %362 : vector<32xf32> to vector<32x1xf32>
    %cst_130 = arith.constant 1.280000e+02 : f32
    %364 = vector.broadcast %cst_130 : f32 to vector<32x1xf32>
    %365 = arith.divf %363, %364 : vector<32x1xf32>
    %366 = vector.broadcast %358 : vector<32x1xf32> to vector<32x128xf32>
    %367 = arith.subf %350, %366 : vector<32x128xf32>
    %cst_131 = arith.constant 9.99999974E-6 : f32
    %368 = vector.broadcast %cst_131 : f32 to vector<32x1xf32>
    %369 = arith.addf %365, %368 : vector<32x1xf32>
    %370 = math.rsqrt %369 : vector<32x1xf32>
    %371 = vector.broadcast %370 : vector<32x1xf32> to vector<32x128xf32>
    %372 = arith.mulf %367, %371 : vector<32x128xf32>
    %373 = vector.broadcast %352 : vector<1x128xf32> to vector<32x128xf32>
    %374 = arith.mulf %372, %373 : vector<32x128xf32>
    %375 = vector.broadcast %354 : vector<1x128xf32> to vector<32x128xf32>
    %376 = arith.addf %374, %375 : vector<32x128xf32>
    %377 = arith.truncf %376 : vector<32x128xf32> to vector<32x128xbf16>
    %c1_132 = arith.constant 1 : index
    %c0_133 = arith.constant 0 : index
    %c0_134 = arith.constant 0 : index
    %378 = vector.load %arg11[%c1_132, %c0_133, %c0_134] : memref<2x128x256xbf16, #tpu.memory_space<vmem>>, vector<1x128x256xbf16>
    %379 = vector.shape_cast %378 : vector<1x128x256xbf16> to vector<128x256xbf16>
    %cst_135 = arith.constant dense<0.000000e+00> : vector<32x256xf32>
    %380 = tpu.matmul %377, %379, %cst_135 {dimension_numbers = #tpu.dot_dimension_numbers<[1], [0], [0], [1], [0, 0, 1, 1], [], []>} : vector<32x128xbf16>, vector<128x256xbf16>, vector<32x256xf32> -> vector<32x256xf32>
    %c1_136 = arith.constant 1 : index
    %c0_137 = arith.constant 0 : index
    %c0_138 = arith.constant 0 : index
    %381 = vector.load %arg12[%c1_136, %c0_137, %c0_138] : memref<2x1x256xf32, #tpu.memory_space<vmem>>, vector<1x1x256xf32>
    %382 = vector.shape_cast %381 : vector<1x1x256xf32> to vector<1x256xf32>
    %383 = vector.broadcast %382 : vector<1x256xf32> to vector<32x256xf32>
    %384 = arith.addf %380, %383 : vector<32x256xf32>
    %cst_139 = arith.constant 0.000000e+00 : f32
    %385 = vector.broadcast %cst_139 : f32 to vector<32x256xf32>
    %386 = arith.maximumf %384, %385 : vector<32x256xf32>
    %387 = arith.truncf %386 : vector<32x256xf32> to vector<32x256xbf16>
    %c1_140 = arith.constant 1 : index
    %c0_141 = arith.constant 0 : index
    %c0_142 = arith.constant 0 : index
    %388 = vector.load %arg13[%c1_140, %c0_141, %c0_142] : memref<2x256x128xbf16, #tpu.memory_space<vmem>>, vector<1x256x128xbf16>
    %389 = vector.shape_cast %388 : vector<1x256x128xbf16> to vector<256x128xbf16>
    %cst_143 = arith.constant dense<0.000000e+00> : vector<32x128xf32>
    %390 = tpu.matmul %387, %389, %cst_143 {dimension_numbers = #tpu.dot_dimension_numbers<[1], [0], [0], [1], [0, 0, 1, 1], [], []>} : vector<32x256xbf16>, vector<256x128xbf16>, vector<32x128xf32> -> vector<32x128xf32>
    %c1_144 = arith.constant 1 : index
    %c0_145 = arith.constant 0 : index
    %c0_146 = arith.constant 0 : index
    %391 = vector.load %arg14[%c1_144, %c0_145, %c0_146] : memref<2x1x128xf32, #tpu.memory_space<vmem>>, vector<1x1x128xf32>
    %392 = vector.shape_cast %391 : vector<1x1x128xf32> to vector<1x128xf32>
    %393 = vector.broadcast %392 : vector<1x128xf32> to vector<32x128xf32>
    %394 = arith.addf %390, %393 : vector<32x128xf32>
    %395 = arith.addf %376, %394 : vector<32x128xf32>
    %c1_147 = arith.constant 1 : index
    %c0_148 = arith.constant 0 : index
    %c0_149 = arith.constant 0 : index
    %396 = vector.load %arg15[%c1_147, %c0_148, %c0_149] : memref<2x1x128xf32, #tpu.memory_space<vmem>>, vector<1x1x128xf32>
    %397 = vector.shape_cast %396 : vector<1x1x128xf32> to vector<1x128xf32>
    %c1_150 = arith.constant 1 : index
    %c0_151 = arith.constant 0 : index
    %c0_152 = arith.constant 0 : index
    %398 = vector.load %arg16[%c1_150, %c0_151, %c0_152] : memref<2x1x128xf32, #tpu.memory_space<vmem>>, vector<1x1x128xf32>
    %399 = vector.shape_cast %398 : vector<1x1x128xf32> to vector<1x128xf32>
    %cst_153 = arith.constant dense<0.000000e+00> : vector<32xf32>
    %400 = vector.multi_reduction <add>, %395, %cst_153 [1] : vector<32x128xf32> to vector<32xf32>
    %401 = vector.shape_cast %400 : vector<32xf32> to vector<32x1xf32>
    %cst_154 = arith.constant 1.280000e+02 : f32
    %402 = vector.broadcast %cst_154 : f32 to vector<32x1xf32>
    %403 = arith.divf %401, %402 : vector<32x1xf32>
    %404 = vector.broadcast %403 : vector<32x1xf32> to vector<32x128xf32>
    %405 = arith.subf %395, %404 : vector<32x128xf32>
    %406 = arith.mulf %405, %405 : vector<32x128xf32>
    %cst_155 = arith.constant dense<0.000000e+00> : vector<32xf32>
    %407 = vector.multi_reduction <add>, %406, %cst_155 [1] : vector<32x128xf32> to vector<32xf32>
    %408 = vector.shape_cast %407 : vector<32xf32> to vector<32x1xf32>
    %cst_156 = arith.constant 1.280000e+02 : f32
    %409 = vector.broadcast %cst_156 : f32 to vector<32x1xf32>
    %410 = arith.divf %408, %409 : vector<32x1xf32>
    %411 = vector.broadcast %403 : vector<32x1xf32> to vector<32x128xf32>
    %412 = arith.subf %395, %411 : vector<32x128xf32>
    %cst_157 = arith.constant 9.99999974E-6 : f32
    %413 = vector.broadcast %cst_157 : f32 to vector<32x1xf32>
    %414 = arith.addf %410, %413 : vector<32x1xf32>
    %415 = math.rsqrt %414 : vector<32x1xf32>
    %416 = vector.broadcast %415 : vector<32x1xf32> to vector<32x128xf32>
    %417 = arith.mulf %412, %416 : vector<32x128xf32>
    %418 = vector.broadcast %397 : vector<1x128xf32> to vector<32x128xf32>
    %419 = arith.mulf %417, %418 : vector<32x128xf32>
    %420 = vector.broadcast %399 : vector<1x128xf32> to vector<32x128xf32>
    %421 = arith.addf %419, %420 : vector<32x128xf32>
    %422 = vector.shape_cast %421 : vector<32x128xf32> to vector<2x16x128xf32>
    %c0_158 = arith.constant 0 : index
    %c0_159 = arith.constant 0 : index
    %c0_160 = arith.constant 0 : index
    %423 = vector.load %arg17[%c0_158, %c0_159, %c0_160] : memref<2x16x128xf32, #tpu.memory_space<vmem>>, vector<2x16x128xf32>
    tpu.vector_store %arg17[%c0_158, %c0_159, %c0_160], %422 {strides = array<i32>} : memref<2x16x128xf32, #tpu.memory_space<vmem>>, vector<2x16x128xf32>,
    return
  }
  func.func @transform_0(%arg0: i32) -> (i32, i32, i32) {
    %c0_i32 = arith.constant 0 : i32
    %c0_i32_0 = arith.constant 0 : i32
    %c0_i32_1 = arith.constant 0 : i32
    return %arg0, %c0_i32, %c0_i32_0 : i32, i32, i32
  }
  func.func @transform_1(%arg0: i32) -> (i32, i32) {
    %c0_i32 = arith.constant 0 : i32
    %c0_i32_0 = arith.constant 0 : i32
    %c0_i32_1 = arith.constant 0 : i32
    return %c0_i32, %c0_i32_0 : i32, i32
  }
  func.func @transform_2(%arg0: i32) -> (i32, i32) {
    %c0_i32 = arith.constant 0 : i32
    %c0_i32_0 = arith.constant 0 : i32
    %c0_i32_1 = arith.constant 0 : i32
    return %c0_i32, %c0_i32_0 : i32, i32
  }
  func.func @transform_3(%arg0: i32) -> (i32, i32) {
    %c0_i32 = arith.constant 0 : i32
    %c0_i32_0 = arith.constant 0 : i32
    %c0_i32_1 = arith.constant 0 : i32
    return %c0_i32, %c0_i32_0 : i32, i32
  }
  func.func @transform_4(%arg0: i32) -> (i32, i32, i32) {
    %c0_i32 = arith.constant 0 : i32
    %c0_i32_0 = arith.constant 0 : i32
    %c0_i32_1 = arith.constant 0 : i32
    %c0_i32_2 = arith.constant 0 : i32
    return %c0_i32, %c0_i32_0, %c0_i32_1 : i32, i32, i32
  }
  func.func @transform_5(%arg0: i32) -> (i32, i32, i32) {
    %c0_i32 = arith.constant 0 : i32
    %c0_i32_0 = arith.constant 0 : i32
    %c0_i32_1 = arith.constant 0 : i32
    %c0_i32_2 = arith.constant 0 : i32
    return %c0_i32, %c0_i32_0, %c0_i32_1 : i32, i32, i32
  }
  func.func @transform_6(%arg0: i32) -> (i32, i32, i32) {
    %c0_i32 = arith.constant 0 : i32
    %c0_i32_0 = arith.constant 0 : i32
    %c0_i32_1 = arith.constant 0 : i32
    %c0_i32_2 = arith.constant 0 : i32
    return %c0_i32, %c0_i32_0, %c0_i32_1 : i32, i32, i32
  }
  func.func @transform_7(%arg0: i32) -> (i32, i32, i32) {
    %c0_i32 = arith.constant 0 : i32
    %c0_i32_0 = arith.constant 0 : i32
    %c0_i32_1 = arith.constant 0 : i32
    %c0_i32_2 = arith.constant 0 : i32
    return %c0_i32, %c0_i32_0, %c0_i32_1 : i32, i32, i32
  }
  func.func @transform_8(%arg0: i32) -> (i32, i32, i32) {
    %c0_i32 = arith.constant 0 : i32
    %c0_i32_0 = arith.constant 0 : i32
    %c0_i32_1 = arith.constant 0 : i32
    %c0_i32_2 = arith.constant 0 : i32
    return %c0_i32, %c0_i32_0, %c0_i32_1 : i32, i32, i32
  }
  func.func @transform_9(%arg0: i32) -> (i32, i32, i32) {
    %c0_i32 = arith.constant 0 : i32
    %c0_i32_0 = arith.constant 0 : i32
    %c0_i32_1 = arith.constant 0 : i32
    %c0_i32_2 = arith.constant 0 : i32
    return %c0_i32, %c0_i32_0, %c0_i32_1 : i32, i32, i32
  }
  func.func @transform_10(%arg0: i32) -> (i32, i32, i32) {
    %c0_i32 = arith.constant 0 : i32
    %c0_i32_0 = arith.constant 0 : i32
    %c0_i32_1 = arith.constant 0 : i32
    %c0_i32_2 = arith.constant 0 : i32
    return %c0_i32, %c0_i32_0, %c0_i32_1 : i32, i32, i32
  }
  func.func @transform_11(%arg0: i32) -> (i32, i32, i32) {
    %c0_i32 = arith.constant 0 : i32
    %c0_i32_0 = arith.constant 0 : i32
    %c0_i32_1 = arith.constant 0 : i32
    %c0_i32_2 = arith.constant 0 : i32
    return %c0_i32, %c0_i32_0, %c0_i32_1 : i32, i32, i32
  }
  func.func @transform_12(%arg0: i32) -> (i32, i32, i32) {
    %c0_i32 = arith.constant 0 : i32
    %c0_i32_0 = arith.constant 0 : i32
    %c0_i32_1 = arith.constant 0 : i32
    %c0_i32_2 = arith.constant 0 : i32
    return %c0_i32, %c0_i32_0, %c0_i32_1 : i32, i32, i32
  }
  func.func @transform_13(%arg0: i32) -> (i32, i32, i32) {
    %c0_i32 = arith.constant 0 : i32
    %c0_i32_0 = arith.constant 0 : i32
    %c0_i32_1 = arith.constant 0 : i32
    %c0_i32_2 = arith.constant 0 : i32
    return %c0_i32, %c0_i32_0, %c0_i32_1 : i32, i32, i32
  }
  func.func @transform_14(%arg0: i32) -> (i32, i32, i32) {
    %c0_i32 = arith.constant 0 : i32
    %c0_i32_0 = arith.constant 0 : i32
    %c0_i32_1 = arith.constant 0 : i32
    %c0_i32_2 = arith.constant 0 : i32
    return %c0_i32, %c0_i32_0, %c0_i32_1 : i32, i32, i32
  }
  func.func @transform_15(%arg0: i32) -> (i32, i32, i32) {
    %c0_i32 = arith.constant 0 : i32
    %c0_i32_0 = arith.constant 0 : i32
    %c0_i32_1 = arith.constant 0 : i32
    %c0_i32_2 = arith.constant 0 : i32
    return %c0_i32, %c0_i32_0, %c0_i32_1 : i32, i32, i32
  }
  func.func @transform_16(%arg0: i32) -> (i32, i32, i32) {
    %c0_i32 = arith.constant 0 : i32
    %c0_i32_0 = arith.constant 0 : i32
    %c0_i32_1 = arith.constant 0 : i32
    return %arg0, %c0_i32, %c0_i32_0 : i32, i32, i32
  }
}

</mosaic_0001>

<bundles_post_ra>
// kernel: tpu_custom_call.1
= control target key start
LH: loop header
LB: loop body
LE: loop exit
PB: predicated region body
PF: predicated region fallthrough
CT: control target
= control target key end

     0   :  { %s7176_s0 = inlined_call_operand.vmem [shape: f32[4,16,8], index: 0, kind: input, shape index: {}]   ;;  %s7177_s1 = inlined_call_operand.vmem [shape: bf16[8,128], index: 1, kind: input, shape index: {}]   ;;  %s7178_s2 = inlined_call_operand.vmem [shape: f32[1,128], index: 2, kind: input, shape index: {}]   ;;  %s7179_s3 = inlined_call_operand.vmem [shape: f32[16,128], index: 3, kind: input, shape index: {}]   ;;  %s7180_s4 = inlined_call_operand.hbm [shape: bf16[2,128,384], index: 4, kind: input, shape index: {}]   ;;  %s7181_s5 = inlined_call_operand.vmem [shape: f32[2,1,384], index: 5, kind: input, shape index: {}]   ;;  %s7182_s6 = inlined_call_operand.hbm [shape: bf16[2,128,128], index: 6, kind: input, shape index: {}]   ;;  %s7183_s7 = inlined_call_operand.vmem [shape: f32[2,1,128], index: 7, kind: input, shape index: {}]   ;;  %s7184_s8 = inlined_call_operand.vmem [shape: f32[2,1,128], index: 8, kind: input, shape index: {}]   ;;  %s7185_s9 = inlined_call_operand.vmem [shape: f32[2,1,128], index: 9, kind: input, shape index: {}]   ;;  %s7186_s10 = inlined_call_operand.hbm [shape: bf16[2,128,256], index: 10, kind: input, shape index: {}]   ;;  %s7187_s11 = inlined_call_operand.vmem [shape: f32[2,1,256], index: 11, kind: input, shape index: {}]   ;;  %s7188_s12 = inlined_call_operand.hbm [shape: bf16[2,256,128], index: 12, kind: input, shape index: {}]   ;;  %s7189_s13 = inlined_call_operand.vmem [shape: f32[2,1,128], index: 13, kind: input, shape index: {}]   ;;  %s7190_s14 = inlined_call_operand.vmem [shape: f32[2,1,128], index: 14, kind: input, shape index: {}]   ;;  %s7191_s15 = inlined_call_operand.vmem [shape: f32[2,1,128], index: 15, kind: input, shape index: {}]   ;;  %s7192_s16 = inlined_call_operand.hbm [shape: f32[4,16,128], index: 16, kind: output, shape index: {}]  }
   0x1   :  { %7201 = sst [smem:[#allocation21_spill]] %s7176_s0 }
   0x2   :  { %7202 = sst [smem:[#allocation22_spill]] %s7192_s16 }
   0x3   :  { %21 = vsyncpa [#allocation3], 0 }
   0x4   :  { %22 = vsyncpa [#allocation6], 0 }
   0x5   :  { %23 = vsyncpa [#allocation9], 0 }
   0x6   :  { %24 = vsyncpa [#allocation4], 0 }
   0x7   :  { %26 = vsyncpa [#allocation4 + $0x1], 0  ;;  %s6351_s21 = smov 0   ;;  %s6353_s22 = smov 0  }
   0x8   :  { %s6355_s23 = smov 0   ;;  %s6357_s24 = smov 0  }
   0x9 LB: > { %7203 = sst [smem:[#allocation15_spill]] %s6233_s21  ;;  %s6372_s25 = sadd.s32 4294967295, %s6245_s24   ;;  %s6245_s24 = sphi %s6357_s24, %s7220_s24   ;;  %s6241_s23 = sphi %s6355_s23, %s7222_s23   ;;  %s6237_s22 = sphi %s6353_s22, %s7224_s22   ;;  %s6233_s21 = sphi %s6351_s21, %s7223_s21  }
   0xa   : > { %7204 = sst [smem:[#allocation16_spill]] %s6241_s23  ;;  %s4953_s26 = sadd.s32 4294967294, %s6245_s24  }
   0xb   : > { %7205 = sst [smem:[#allocation17_spill]] %s6245_s24  ;;  %s6376_s27 = sadd.s32 1, %s6245_s24  }
   0xc   : > { %7206 = sst [smem:[#allocation18_spill]] %s6376_s27  ;;  %s380_s28 = sadd.s32 1, %s6241_s23 }
   0xd   : > { %s377_s29 = ssub.s32 %s6245_s24, %s6376_s27  ;;  %p390_p0 = scmp.ne.s32.totalorder %s6241_s23, %s6237_s22 }
   0xe   : > { %p378_p1 = scmp.eq.s32.totalorder %s377_s29, 0  ;;  %p391_p2 = scmp.eq.s32.totalorder %s6372_s25, 1 }
   0xf   : > { %p396_p3 = scmp.ne.s32.totalorder %s6237_s22, %s6233_s21  ;;  %p397_p4 = scmp.eq.s32.totalorder %s4953_s26, 1 }
  0x10   : > { %s6387_s30 = scalar_select %p378_p1, %s6241_s23, %s380_s28  }
  0x11   : > { %p6389_p5 = por %p391_p2, %p390_p0  ;;  %p6393_p6 = por %p397_p4, %p396_p3 }
  0x12   : > { %7207 = sst [smem:[#allocation19_spill]] %s6387_s30  ;;  %p4954_p7 = scmp.ge.s32.totalorder %s6245_s24, 1 }
  0x13   : > { %s7209_s17 = scalar_select %p6393_p6, 1, 0 }
  0x14   : > { %p404_p8 = scmp.lt.s32.totalorder %s6245_s24, 3  ;;  %p5690_p9 = scmp.eq.s32.totalorder %s6372_s25, 0 }
  0x15   : > { %7210 = sst [smem:[#allocation20_spill]] %s7209_s17  ;;  %s6247_s19 = smov [#allocation5]  }
  0x16   : > { %p6400_p10 = pnand %p4954_p7, %p404_p8  ;;  %s441_s20 = sshll.u32 %s6247_s19, 4  ;;  %s442_s20 = int_to_ptr.vmem [resolvable:$true] %s441_s20 }
  0x17   : > { %s6248_s28 = smov [#allocation2]   ;;  %s6080_s30 = scalar_lea.vmem %s442_s20, 2048 }
  0x18   : > { %p5673_p11 = pneg %p6400_p10  ;;  %s425_s29 = sshll.u32 %s6248_s28, 4  ;;  %s426_s29 = int_to_ptr.vmem [resolvable:$true] %s425_s29 }
  0x19   : > { %p6081_p0 = scmp.ne.s32.totalorder %s442_s20, %s6080_s30  ;;  %p6088_p3 = scmp.lt.s32.totalorder %s442_s20, %s442_s20 }
  0x1a   : > { %p6408_p12 = pnand %p5690_p9, %p5673_p11  ;;  %p6089_p4 = scmp.lt.s32.totalorder %s6080_s30, %s6080_s30 }
  0x1c   : > { %p6071_p13 = pneg %p6408_p12  ;;  %p6090_p7 = por %p6089_p4, %p6088_p3 }
  0x1e   : > { %p6083_p1 = pnand %p6081_p0, %p6071_p13 }
  0x20   : > { %p6084_p2 = pneg %p6083_p1 }
  0x22   : > { %p6091_p8 = pnand %p6090_p7, %p6084_p2 }
  0x24   : > { %6094 = shalt.err (!%p6091_p8)
}
  0x25   : > { %s7200_s19 = smov 64   ;;  %s6250_s23 = smov 4  }
  0x26   : > { %5679 = dma.hbm_to_vmem [thread:$0]  (!%p6408_p12), %s7182_s6, 2048, %s442_s20, [#allocation6], %s7200_s19, %s7200_s19, %s6250_s23  }
  0x27   : > { %s6106_s17 = scalar_lea.vmem %s426_s29, 6144  ;;  %p6114_p2 = scmp.lt.s32.totalorder %s426_s29, %s426_s29 }
  0x28   : > { %p6107_p11 = scmp.ne.s32.totalorder %s426_s29, %s6106_s17  ;;  %p6115_p3 = scmp.lt.s32.totalorder %s6106_s17, %s6106_s17 }
  0x2a   : > { %p6109_p0 = pnand %p6107_p11, %p6071_p13  ;;  %p6116_p4 = por %p6115_p3, %p6114_p2 }
  0x2c   : > { %p6110_p1 = pneg %p6109_p0 }
  0x2e   : > { %p6117_p7 = pnand %p6116_p4, %p6110_p1 }
  0x30   : > { %6120 = shalt.err (!%p6117_p7)
}
  0x31   : > { %s6251_s30 = smov 192   ;;  %s6252_s21 = smov 12  }
  0x32   : > { %5676 = dma.hbm_to_vmem [thread:$0]  (!%p6408_p12), %s7180_s4, 6144, %s426_s29, [#allocation3], %s6251_s30, %s6251_s30, %s6252_s21  }
  0x33   : > { %s6253_s27 = smov [#allocation7]  }
  0x34   : > { %s463_s20 = sshll.u32 %s6253_s27, 4  ;;  %s464_s20 = int_to_ptr.vmem [resolvable:$true] %s463_s20 }
  0x35   : > { %s6132_s28 = scalar_lea.vmem %s464_s20, 4096  ;;  %p6140_p1 = scmp.lt.s32.totalorder %s464_s20, %s464_s20 }
  0x36   : > { %p6133_p8 = scmp.ne.s32.totalorder %s464_s20, %s6132_s28  ;;  %p6141_p2 = scmp.lt.s32.totalorder %s6132_s28, %s6132_s28 }
  0x38   : > { %p6135_p11 = pnand %p6133_p8, %p6071_p13  ;;  %p6142_p3 = por %p6141_p2, %p6140_p1 }
  0x3a   : > { %p6136_p0 = pneg %p6135_p11 }
  0x3c   : > { %p6143_p4 = pnand %p6142_p3, %p6136_p0 }
  0x3e   : > { %6146 = shalt.err (!%p6143_p4)
}
  0x3f   : > { %s6254_s17 = smov 128   ;;  %s6255_s19 = smov 8  }
  0x40   : > { %5682 = dma.hbm_to_vmem [thread:$0]  (!%p6408_p12), %s7186_s10, 4096, %s464_s20, [#allocation6], %s6254_s17, %s6254_s17, %s6255_s19  }
  0x41   : > { %s6256_s24 = smov [#allocation8]  }
  0x42   : > { %s479_s29 = sshll.u32 %s6256_s24, 4  ;;  %s480_s29 = int_to_ptr.vmem [resolvable:$true] %s479_s29 }
  0x43   : > { %s6158_s30 = scalar_lea.vmem %s480_s29, 4096  ;;  %p6166_p0 = scmp.lt.s32.totalorder %s480_s29, %s480_s29 }
  0x44   : > { %p6159_p7 = scmp.ne.s32.totalorder %s480_s29, %s6158_s30  ;;  %p6167_p1 = scmp.lt.s32.totalorder %s6158_s30, %s6158_s30 }
  0x46   : > { %p6161_p8 = pnand %p6159_p7, %p6071_p13  ;;  %p6168_p2 = por %p6167_p1, %p6166_p0 }
  0x48   : > { %p6162_p11 = pneg %p6161_p8 }
  0x4a   : > { %p6169_p3 = pnand %p6168_p2, %p6162_p11 }
  0x4c   : > { %6172 = shalt.err (!%p6169_p3)
}
  0x4d   : > { %s7213_s27 = smov 64   ;;  %514 = sbr.rel (%p6400_p10) target bundleno = 8681 (0x21e9), region = 84 }
  0x4e   : > { %5685 = dma.hbm_to_vmem [thread:$0]  (!%p6408_p12), %s7188_s12, 4096, %s480_s29, [#allocation9], %s7213_s27, %s7213_s27, %s6250_s23  }
  0x52   : > { %6216 = dma.done.wait (%p5690_p9), [#allocation3], 6144  }
  0x53   : > { %6218 = vsyncadd (%p5690_p9), [#allocation3], 4294961152 }
  0x54   : > { %6220 = dma.done.wait (%p5690_p9), [#allocation6], 6144  }
  0x55   : > { %6222 = vsyncadd (%p5690_p9), [#allocation6], 4294961152 }
  0x56   : > { %6224 = dma.done.wait (%p5690_p9), [#allocation9], 4096  }
  0x57   : > { %6226 = vsyncadd (%p5690_p9), [#allocation9], 4294963200  ;;  %s4966_s23 = sshll.u32 %s6372_s25, 1  ;;  %vm607_vm0 = vcmask 1043456   ;;  %s7214_s17 = sld [smem:[#allocation21_spill]]  ;;  %vm600_vm1 = vcmask 64512   ;;  %v706_v55 = vlaneseq }
  0x58   : > { %p578_p10 = scmp.lt.s32.totalorder %s4966_s23, 3  ;;  %v592_v0 = vld [vmem:[%s7177_s1] sm:$0xf]  ;;  %v5749_v8 = vld [vmem:[#allocation2 + $0xac] ss:$12 sps:$4 sm:$0xff]   ;;  %v6257_v32 = vmov 0  }
  0x59   : > { %5654 = vmatprep.subr.msk.bf16.mxu0 %vm607_vm0, %v592_v0  ;;  %v609_v3 = vsel %vm607_vm0, %v592_v0, 0  ;;  %v5751_v9 = vld [vmem:[#allocation2 + $0xa8] ss:$12 sps:$4 sm:$0xff]   ;;  %v5752_v10 = vld [vmem:[#allocation2 + $0xb0] ss:$12 sps:$4 sm:$0xff]   ;;  %849 = vmatprep.subr.bf16.mxu1 %v5749_v8  ;;  %v664_v46 = vld [vmem:[%s7179_s3] sm:$0xff] }
  0x5a   : > { %s7226_s23 = smov (!%p578_p10, %s4966_s23), 3  ;;  %5353 = vmatpush3.bf16.msra.mxu0 %v609_v3  ;;  %v5753_v11 = vld [vmem:[#allocation2 + $0x94] ss:$12 sps:$4 sm:$0xff]   ;;  %850 = vmatpush1.bf16.msra.mxu1 %v5751_v9  ;;  %v5755_v12 = vld [vmem:[#allocation2 + $0x90] ss:$12 sps:$4 sm:$0xff]   ;;  %v665_v43 = vld [vmem:[%s7179_s3 + $0x8] sm:$0xff] }
  0x5b   : > { %s5174_s18 = sshll.u32 %s7226_s23, 4  ;;  %5358 = vmatprep.subr.bf16.mxu0 %v5752_v10  ;;  %851 = vmatprep.subr.bf16.mxu1 %v5753_v11  ;;  %v5756_v13 = vld [vmem:[#allocation2 + $0x98] ss:$12 sps:$4 sm:$0xff]   ;;  %v5757_v14 = vld [vmem:[#allocation2 + $0x7c] ss:$12 sps:$4 sm:$0xff]   ;;  %v6258_v54 = vmov 0.0  }
  0x5c   : > { %v5760_v15 = vld [vmem:[#allocation2 + $0x80] ss:$12 sps:$4 sm:$0xff]   ;;  %v5759_v16 = vld [vmem:[#allocation2 + $0x78] ss:$12 sps:$4 sm:$0xff]   ;;  %v5764_v19 = vld [vmem:[#allocation2 + $0x68] ss:$12 sps:$4 sm:$0xff]   ;;  %881 = vmatprep.mubr.bf16.mxu1 %v6257_v32 }
  0x5d   : > { %s582_s16 = scalar_lea.vmem %s7214_s17, %s5174_s18  ;;  %v5761_v17 = vld [vmem:[#allocation2 + $0x64] ss:$12 sps:$4 sm:$0xff]   ;;  %v5763_v18 = vld [vmem:[#allocation2 + $0x60] ss:$12 sps:$4 sm:$0xff]   ;;  %v5767_v21 = vld [vmem:[#allocation2 + $0x48] ss:$12 sps:$4 sm:$0xff]  }
  0x5e   : > { %v586_v1 = vld [vmem:[%s582_s16] sm:$0xff]  ;;  %v587_v2 = vld [vmem:[%s582_s16 + $0x8] sm:$0xff]  ;;  %v588_v5 = vld [vmem:[%s582_s16 + $0x10] sm:$0xff]  ;;  %852 = vmatpush1.bf16.msra.mxu1 %v5755_v12  ;;  %vm6259_vm2 = vmmov 0   ;;  %v6502_v56 = vshrl.u32 %v706_v55, 7  ;;  %vm973_vm3 = vcmask 261120  }
  0x5f   : > { %v590_v4 = vpack.c.bf16 %v587_v2, %v586_v1  ;;  %v589_v6 = vld [vmem:[%s582_s16 + $0x18] sm:$0xff]  ;;  %853 = vmatprep.subr.bf16.mxu1 %v5757_v14  ;;  %v5769_v23 = vld [vmem:[#allocation2 + $0x34] ss:$12 sps:$4 sm:$0xff]   ;;  %v5777_v29 = vld [vmem:[#allocation2 + $0x4] ss:$12 sps:$4 sm:$0xff]   ;;  %vm1072_vm4 = vcmask 130048  }
  0x60   : > { %v591_v7 = vpack.c.bf16 %v589_v6, %v588_v5  ;;  %v5765_v20 = vld [vmem:[#allocation2 + $0x4c] ss:$12 sps:$4 sm:$0xff]   ;;  %v5768_v22 = vld [vmem:[#allocation2 + $0x50] ss:$12 sps:$4 sm:$0xff]   ;;  %v5780_v31 = vld [vmem:[#allocation2 + $0x8] ss:$12 sps:$4 sm:$0xff]  }
  0x61   : > { %5354 = vmatprep.mubr.msk.bf16.mxu0 %vm600_vm1, %v590_v4  ;;  %v5771_v24 = vld [vmem:[#allocation2 + $0x30] ss:$12 sps:$4 sm:$0xff]   ;;  %v5772_v25 = vld [vmem:[#allocation2 + $0x38] ss:$12 sps:$4 sm:$0xff]   ;;  %v5776_v28 = vld [vmem:[#allocation2 + $0x20] ss:$12 sps:$4 sm:$0xff]  }
  0x62   : > { %5355 = vmatmul.mubr.msk.bf16.vlgmr.msra.gmra.mxu0 %vm600_vm1, %v591_v7  ;;  %854 = vmatpush1.bf16.msra.mxu1 %v5759_v16  ;;  %v5773_v26 = vld [vmem:[#allocation2 + $0x1c] ss:$12 sps:$4 sm:$0xff]   ;;  %v5775_v27 = vld [vmem:[#allocation2 + $0x18] ss:$12 sps:$4 sm:$0xff]   ;;  %v5779_v30 = vld [vmem:[#allocation2] ss:$12 sps:$4 sm:$0xff]  }
  0x63   : > { %5359 = vmatpush3.bf16.msra.mxu0 %v5752_v10  ;;  %855 = vmatprep.subr.bf16.mxu1 %v5761_v17  ;;  %v4969_v34 = vld [vmem:[%s7178_s2] ss:$0 sm:$0xff]  ;;  %v6505_v57 = vsub.s32 1, %v6502_v56  ;;  %v6512_v2 = vsub.s32 0, %v6502_v56  ;;  %v716_v6 = vsub.s32 2, %v6502_v56  ;;  %s6260_s28 = smov 96  }
  0x64   : > { %5360 = vmatprep.subr.bf16.mxu0 %v5756_v13  ;;  %v704_v60 = vld [vmem:[%s7181_s5] sm:$0x7]  ;;  %s6261_s17 = smov 64   ;;  %s6262_s16 = smov 32  }
  0x65   : > { %v713_v62 = vrot.slane %v704_v60, %v6505_v57  ;;  %v709_v10 = vrot.slane %v704_v60, %v6512_v2  ;;  %s574_s30 = sand.u32 1, %s6237_s22   ;;  %s5176_s23 = sshll.u32 %s6372_s25, 9 }
  0x66   : > { %856 = vmatpush1.bf16.msra.mxu1 %v5763_v18  ;;  %s7215_s24 = sld [smem:[#allocation22_spill]]  ;;  %s7136_s19 = scalar_lea.sflag [#allocation4], %s574_s30 }
  0x67   : > { %5361 = vmatpush3.bf16.msra.mxu0 %v5756_v13  ;;  %857 = vmatprep.subr.bf16.mxu1 %v5765_v20  ;;  %v717_v13 = vrot.slane %v704_v60, %v716_v6  ;;  %s6263_s25 = smov [#allocation10]  }
  0x68   : > { %5362 = vmatprep.subr.bf16.mxu0 %v5760_v15 }
  0x6a   : > { %858 = vmatpush1.bf16.msra.mxu1 %v5767_v21 }
  0x6b   : > { %5363 = vmatpush3.bf16.msra.mxu0 %v5760_v15  ;;  %859 = vmatprep.subr.bf16.mxu1 %v5769_v23 }
  0x6c   : > { %5364 = vmatprep.subr.bf16.mxu0 %v5764_v19  ;;  %s7216_s29 = smov %s7215_s24  ;;  %s7130_s27 = scalar_lea.hbm %s7215_s24, %s5176_s23 }
  0x6e   : > { %860 = vmatpush1.bf16.msra.mxu1 %v5771_v24 }
  0x6f   : > { %5365 = vmatpush3.bf16.msra.mxu0 %v5764_v19  ;;  %861 = vmatprep.subr.bf16.mxu1 %v5773_v26 }
  0x70   : > { %5366 = vmatprep.subr.bf16.mxu0 %v5768_v22 }
  0x72   : > { %862 = vmatpush1.bf16.msra.mxu1 %v5775_v27 }
  0x73   : > { %5367 = vmatpush3.bf16.msra.mxu0 %v5768_v22  ;;  %863 = vmatprep.subr.bf16.mxu1 %v5777_v29 }
  0x74   : > { %5368 = vmatprep.subr.bf16.mxu0 %v5772_v25 }
  0x76   : > { %864 = vmatpush1.bf16.msra.mxu1 %v5779_v30 }
  0x77   : > { %5369 = vmatpush3.bf16.msra.mxu0 %v5772_v25  ;;  %5384 = vmatprep.subr.bf16.mxu1 %v6258_v54 }
  0x78   : > { %5370 = vmatprep.subr.bf16.mxu0 %v5776_v28 }
  0x7b   : > { %5371 = vmatpush3.bf16.msra.mxu0 %v5776_v28 }
  0x7c   : > { %5372 = vmatprep.subr.bf16.mxu0 %v5780_v31 }
  0x7f   : > { %5373 = vmatpush3.bf16.msra.mxu0 %v5780_v31 }
  0x80   : > { %5378 = vmatprep.subr.bf16.mxu0 %v6258_v54 }
 0x122   : > { %v5356_v33 = vpop.f32.mrf.mxu0 }
 0x123   : > { %v654_v37 = vadd.f32 %v5356_v33, %v4969_v34 }
 0x124   : > { %v645_v35 = vpop.f32.mrf.mxu0 }
 0x125   : > { %v646_v36 = vadd.f32 %v4969_v34, %v645_v35  ;;  %v662_v45 = vmul.f32 11.313708, %v654_v37 }
 0x126   : > { %v5357_v38 = vpop.f32.mrf.mxu0 }
 0x127   : > { %v657_v39 = vadd.f32 %v5357_v38, %v4969_v34  ;;  %v660_v41 = vmul.f32 11.313708, %v646_v36  ;;  %v6489_v51 = vadd.f32 %v664_v46, %v662_v45 }
 0x128   : > { %v648_v40 = vpop.f32.mrf.mxu0 }
 0x129   : > { %v663_v42 = vmul.f32 11.313708, %v657_v39  ;;  %v649_v44 = vadd.f32 %v4969_v34, %v648_v40  ;;  %v6485_v49 = vadd.f32 %v664_v46, %v660_v41 }
 0x12b   : > { %v661_v47 = vmul.f32 11.313708, %v649_v44  ;;  %v6483_v48 = vadd.f32 %v665_v43, %v663_v42 }
 0x12d   : > { %v6487_v50 = vadd.f32 %v665_v43, %v661_v47  ;;  %v671_v53 = vpack.c.bf16 %v6483_v48, %v6489_v51 }
 0x12f   : > { %v670_v52 = vpack.c.bf16 %v6487_v50, %v6485_v49 }
 0x131   : > { %882 = vmatmul.mubr.bf16.vlgmr.msra.gmra.mxu1 %v670_v52  ;;  %5374 = vmatprep.mubr.bf16.mxu0 %v670_v52 }
 0x132   : > { %5375 = vmatmul.mubr.bf16.vlgmr.msra.gmra.mxu0 %v671_v53  ;;  %891 = vmatprep.mubr.bf16.mxu1 %v6257_v32 }
 0x133   : > { %5380 = vmatprep.mubr.msk.bf16.mxu0 %vm6259_vm2, %v6258_v54 }
 0x139   : > { %892 = vmatmul.mubr.bf16.gmra.mxu1 %v671_v53 }
 0x13a   : > { %5386 = vmatprep.mubr.msk.bf16.mxu1 %vm6259_vm2, %v6258_v54 }
 0x1f1   : > { %v883_v58 = vpop.f32.mrf.mxu1 }
 0x1f2   : > { %v5376_v59 = vpop.f32.mrf.mxu0  ;;  %v884_v18 = vadd.f32 %v883_v58, %v709_v10 }
 0x1f3   : > { %v885_v61 = vpop.f32.mrf.mxu1  ;;  %v945_v29 = vadd.f32 %v5376_v59, %v717_v13 }
 0x1f4   : > { %v936_v63 = vpop.f32.mrf.mxu0  ;;  %v886_v3 = vadd.f32 %v885_v61, %v713_v62 }
 0x1f5   : > { %v887_v0 = vpop.f32.mrf.mxu1  ;;  %v937_v21 = vadd.f32 %v936_v63, %v717_v13 }
 0x1f6   : > { %v5377_v4 = vpop.f32.mrf.mxu0  ;;  %v888_v15 = vadd.f32 %v887_v0, %v709_v10 }
 0x1f7   : > { %v889_v1 = vpop.f32.mrf.mxu1  ;;  %v948_v27 = vadd.f32 %v5377_v4, %v717_v13 }
 0x1f8   : > { %v890_v5 = vadd.f32 %v889_v1, %v713_v62  ;;  %v939_v11 = vpop.f32.mrf.mxu0  ;;  %v6523_v22 = vpack.c.bf16 %v888_v15, %v884_v18 }
 0x1f9   : > { %v893_v7 = vpop.f32.mrf.mxu1  ;;  %v940_v16 = vadd.f32 %v939_v11, %v717_v13  ;;  %v6540_v31 = vpack.c.bf16 %v948_v27, %v945_v29 }
 0x1fa   : > { %v6515_v8 = vpack.c.bf16 %v890_v5, %v886_v3  ;;  %v894_v28 = vadd.f32 %v893_v7, %v709_v10 }
 0x1fb   : > { %v895_v9 = vpop.f32.mrf.mxu1  ;;  %v6527_v24 = vpack.c.bf16 %v940_v16, %v937_v21 }
 0x1fc   : > { %v978_v12 = vsel %vm973_vm3, %v6515_v8, 0  ;;  %v896_v19 = vadd.f32 %v895_v9, %v713_v62 }
 0x1fd   : > { %v897_v14 = vpop.f32.mrf.mxu1  ;;  %5379 = vmatpush3.bf16.xpose.msra.mxu0 %v978_v12 }
 0x1fe   : > { %5390 = vmatprep.subr.bf16.mxu0 %v6258_v54  ;;  %v898_v26 = vadd.f32 %v897_v14, %v709_v10 }
 0x1ff   : > { %v899_v17 = vpop.f32.mrf.mxu1 }
 0x200   : > { %v900_v20 = vadd.f32 %v899_v17, %v713_v62  ;;  %v6538_v30 = vpack.c.bf16 %v898_v26, %v894_v28 }
 0x202   : > { %v6525_v23 = vpack.c.bf16 %v900_v20, %v896_v19 }
 0x204   : > { %5381 = vmatmul.mubr.msk.bf16.vlgmr.msra.gmra.mxu0 %vm973_vm3, %v6523_v22  ;;  %v1025_v25 = vsel %vm973_vm3, %v6525_v23, 0 }
 0x205   : > { %5385 = vmatpush3.bf16.xpose.msra.mxu1 %v1025_v25  ;;  %5391 = vmatpush3.bf16.msra.mxu0 %v6527_v24 }
 0x206   : > { %5396 = vmatprep.subr.bf16.mxu1 %v6258_v54  ;;  %5392 = vmatprep.mubr.msk.bf16.mxu0 %vm6259_vm2, %v6258_v54 }
 0x207   : > { %5402 = vmatprep.subr.bf16.mxu0 %v6258_v54 }
 0x20c   : > { %5387 = vmatmul.mubr.msk.bf16.vlgmr.msra.gmra.mxu1 %vm973_vm3, %v6538_v30 }
 0x20d   : > { %5397 = vmatpush3.bf16.msra.mxu1 %v6540_v31  ;;  %5398 = vmatprep.mubr.msk.bf16.mxu1 %vm6259_vm2, %v6258_v54 }
 0x20e   : > { %5408 = vmatprep.subr.bf16.mxu1 %v6258_v54 }
 0x2c4   : > { %v1014_v33 = vpop.f32.mrf.mxu0 }
 0x2c5   : > { %v1068_v34 = vmul.f32 0.17677669, %v1014_v33 }
 0x2c6   : > { %v5382_v35 = vpop.f32.mrf.mxu0 }
 0x2c7   : > { %v1073_v36 = vsel %vm1072_vm4, %v1068_v34, -inf }
 0x2c8   : > { %1074 = vmax.xlane.f32.xlu0 %v1073_v36  ;;  %v1017_v37 = vpop.f32.mrf.mxu0 }
 0x2c9   : > { %v1069_v38 = vmul.f32 0.17677669, %v1017_v37 }
 0x2ca   : > { %v5383_v39 = vpop.f32.mrf.mxu0 }
 0x2cb   : > { %v1076_v40 = vsel %vm1072_vm4, %v1069_v38, -inf }
 0x2cc   : > { %v1061_v41 = vpop.f32.mrf.mxu1  ;;  %1077 = vmax.xlane.f32.xlu0 %v1076_v40 }
 0x2cd   : > { %v1070_v42 = vmul.f32 0.17677669, %v1061_v41 }
 0x2ce   : > { %v5388_v43 = vpop.f32.mrf.mxu1 }
 0x2cf   : > { %v1079_v44 = vsel %vm1072_vm4, %v1070_v42, -inf }
 0x2d0   : > { %1080 = vmax.xlane.f32.xlu1 %v1079_v44  ;;  %v1064_v45 = vpop.f32.mrf.mxu1 }
 0x2d1   : > { %v1071_v46 = vmul.f32 0.17677669, %v1064_v45 }
 0x2d2   : > { %v5389_v47 = vpop.f32.mrf.mxu1 }
 0x2d3   : > { %v1082_v52 = vsel %vm1072_vm4, %v1071_v46, -inf }
 0x2d4   : > { %1083 = vmax.xlane.f32.xlu1 %v1082_v52 }
 0x351   : > { %v1075_v53 = vpop.xlane.xlu0 %1074 }
 0x352   : > { %v1085_v55 = vsub.f32 %v1068_v34, %v1075_v53 }
 0x354   : > { %v1089_v58 = vmul.f32 1.442695, %v1085_v55 }
 0x355   : > { %v1078_v59 = vpop.xlane.xlu0 %1077 }
 0x356   : > { %5909 = vpow2.f32 %v1089_v58  ;;  %v1086_v60 = vsub.f32 %v1069_v38, %v1078_v59 }
 0x358   : > { %v1091_v61 = vmul.f32 1.442695, %v1086_v60 }
 0x359   : > { %v1081_v62 = vpop.xlane.xlu1 %1080 }
 0x35a   : > { %5911 = vpow2.f32 %v1091_v61  ;;  %v1087_v63 = vsub.f32 %v1070_v42, %v1081_v62 }
 0x35c   : > { %v1093_v0 = vmul.f32 1.442695, %v1087_v63 }
 0x35d   : > { %v1084_v10 = vpop.xlane.xlu1 %1083 }
 0x35e   : > { %5913 = vpow2.f32 %v1093_v0  ;;  %v1088_v11 = vsub.f32 %v1071_v46, %v1084_v10 }
 0x360   : > { %v1095_v12 = vmul.f32 1.442695, %v1088_v11 }
 0x362   : > { %5915 = vpow2.f32 %v1095_v12 }
 0x363   : > { %v5910_v1 = vpop.eup %5909 }
 0x364   : > { %v1097_v3 = vsel %vm1072_vm4, %v5910_v1, 0.0 }
 0x365   : > { %1098 = vadd.xlane.f32.xlu0 %v1097_v3 }
 0x367   : > { %v5912_v4 = vpop.eup %5911 }
 0x368   : > { %v1100_v5 = vsel %vm1072_vm4, %v5912_v4, 0.0 }
 0x369   : > { %1101 = vadd.xlane.f32.xlu1 %v1100_v5 }
 0x36b   : > { %v5914_v7 = vpop.eup %5913 }
 0x36c   : > { %v1103_v9 = vsel %vm1072_vm4, %v5914_v7, 0.0 }
 0x36d   : > { %1104 = vadd.xlane.f32.xlu0 %v1103_v9 }
 0x36f   : > { %v5916_v13 = vpop.eup %5915 }
 0x370   : > { %v1106_v14 = vsel %vm1072_vm4, %v5916_v13, 0.0 }
 0x37a   : > { %1266 = vrot.lane.b32.xlu1 %v6525_v23, %s6260_s28 }
 0x383   : > { %1213 = vrot.lane.b32.xlu0 %v6515_v8, %s6260_s28 }
 0x39e   : > { %1107 = vadd.xlane.f32.xlu1 %v1106_v14 }
 0x3af   : > { %1210 = vrot.lane.b32.xlu1 %v6523_v22, %s6260_s28 }
 0x3b3   : > { %1263 = vrot.lane.b32.xlu1 %v6538_v30, %s6260_s28 }
 0x3ee   : > { %v1099_v15 = vpop.xlane.xlu0 %1098 }
 0x3ef   : > { %5917 = vrcp.f32 %v1099_v15 }
 0x3f2   : > { %v1102_v16 = vpop.xlane.xlu1 %1101 }
 0x3f3   : > { %5919 = vrcp.f32 %v1102_v16 }
 0x3f6   : > { %v1105_v17 = vpop.xlane.xlu0 %1104  ;;  %v1267_v28 = vpop.permute.xlu1 %1266 }
 0x3f7   : > { %5921 = vrcp.f32 %v1105_v17  ;;  %v1272_v39 = vsel %vm973_vm3, %v1267_v28, 0 }
 0x3fa   : > { %v1214_v25 = vpop.permute.xlu0 %1213 }
 0x3fb   : > { %v1219_v27 = vsel %vm973_vm3, %v1214_v25, 0 }
 0x3fc   : > { %v5918_v18 = vpop.eup %5917 }
 0x3fd   : > { %v1113_v20 = vmul.f32 %v5918_v18, %v5910_v1 }
 0x400   : > { %v5920_v19 = vpop.eup %5919 }
 0x401   : > { %v1114_v21 = vmul.f32 %v5920_v19, %v5912_v4 }
 0x403   : > { %v1117_v26 = vpack.c.bf16 %v1114_v21, %v1113_v20 }
 0x404   : > { %v5922_v34 = vpop.eup %5921 }
 0x405   : > { %5393 = vmatmul.mubr.msk.bf16.vlgmr.msra.gmra.mxu0 %vm1072_vm4, %v1117_v26  ;;  %v1115_v36 = vmul.f32 %v5922_v34, %v5914_v7 }
 0x406   : > { %5403 = vmatpush3.bf16.xpose.msra.mxu0 %v1219_v27  ;;  %5404 = vmatprep.mubr.msk.bf16.mxu0 %vm6259_vm2, %v6258_v54 }
 0x407   : > { %5414 = vmatprep.subr.bf16.mxu0 %v6258_v54 }
 0x427   : > { %v1108_v29 = vpop.xlane.xlu1 %1107 }
 0x428   : > { %5923 = vrcp.f32 %v1108_v29 }
 0x42b   : > { %v1211_v33 = vpop.permute.xlu1 %1210 }
 0x42c   : > { %5405 = vmatmul.mubr.msk.bf16.vlgmr.msra.gmra.mxu0 %vm973_vm3, %v1211_v33 }
 0x42d   : > { %5416 = vmatprep.mubr.msk.bf16.mxu0 %vm6259_vm2, %v6258_v54 }
 0x42f   : > { %v1264_v40 = vpop.permute.xlu1 %1263 }
 0x435   : > { %v5924_v35 = vpop.eup %5923 }
 0x436   : > { %v1116_v37 = vmul.f32 %v5924_v35, %v5916_v13 }
 0x438   : > { %v1118_v38 = vpack.c.bf16 %v1116_v37, %v1115_v36 }
 0x43a   : > { %5399 = vmatmul.mubr.msk.bf16.vlgmr.msra.gmra.mxu1 %vm1072_vm4, %v1118_v38 }
 0x43b   : > { %5409 = vmatpush3.bf16.xpose.msra.mxu1 %v1272_v39  ;;  %5410 = vmatprep.mubr.msk.bf16.mxu1 %vm6259_vm2, %v6258_v54 }
 0x43c   : > { %5420 = vmatprep.subr.bf16.mxu1 %v6258_v54 }
 0x442   : > { %5411 = vmatmul.mubr.msk.bf16.vlgmr.msra.gmra.mxu1 %vm973_vm3, %v1264_v40 }
 0x443   : > { %5422 = vmatprep.mubr.msk.bf16.mxu1 %vm6259_vm2, %v6258_v54 }
 0x4c5   : > { %v6580_v41 = vpop.f32.mrf.mxu0 }
 0x4c7   : > { %v5394_v42 = vpop.f32.mrf.mxu0 }
 0x4c9   : > { %v6582_v43 = vpop.f32.mrf.mxu0 }
 0x4ca   : > { %v1207_v44 = vpack.c.bf16 %v6582_v43, %v6580_v41  ;;  %v5783_v43 = vld [vmem:[#allocation5 + $0x18] sm:$0xff]  }
 0x4cb   : > { %v5395_v45 = vpop.f32.mrf.mxu0 }
 0x4ec   : > { %v1255_v46 = vpop.f32.mrf.mxu0 }
 0x4ed   : > { %v1315_v47 = vmul.f32 0.17677669, %v1255_v46 }
 0x4ee   : > { %v5406_v52 = vpop.f32.mrf.mxu0 }
 0x4ef   : > { %v1319_v53 = vsel %vm1072_vm4, %v1315_v47, -inf }
 0x4f0   : > { %1320 = vmax.xlane.f32.xlu0 %v1319_v53  ;;  %v1258_v55 = vpop.f32.mrf.mxu0 }
 0x4f1   : > { %v1316_v58 = vmul.f32 0.17677669, %v1258_v55 }
 0x4f2   : > { %v5407_v59 = vpop.f32.mrf.mxu0 }
 0x4f3   : > { %v1322_v60 = vsel %vm1072_vm4, %v1316_v58, -inf  ;;  %v5781_v59 = vld [vmem:[#allocation5 + $0x8] sm:$0xff]  }
 0x4f4   : > { %1323 = vmax.xlane.f32.xlu1 %v1322_v60 }
 0x4fa   : > { %v6588_v61 = vpop.f32.mrf.mxu1 }
 0x4fc   : > { %v5400_v62 = vpop.f32.mrf.mxu1 }
 0x4fe   : > { %v6590_v63 = vpop.f32.mrf.mxu1 }
 0x4ff   : > { %v1208_v0 = vpack.c.bf16 %v6590_v63, %v6588_v61 }
 0x500   : > { %v5401_v1 = vpop.f32.mrf.mxu1 }
 0x502   : > { %v1308_v3 = vpop.f32.mrf.mxu1 }
 0x503   : > { %v1317_v4 = vmul.f32 0.17677669, %v1308_v3 }
 0x504   : > { %v5412_v5 = vpop.f32.mrf.mxu1 }
 0x505   : > { %v1325_v7 = vsel %vm1072_vm4, %v1317_v4, -inf }
 0x506   : > { %v1311_v9 = vpop.f32.mrf.mxu1  ;;  %1326 = vmax.xlane.f32.xlu0 %v1325_v7  ;;  %v5782_v7 = vld [vmem:[#allocation5] sm:$0xff]  }
 0x507   : > { %v1318_v10 = vmul.f32 0.17677669, %v1311_v9 }
 0x508   : > { %v5413_v11 = vpop.f32.mrf.mxu1 }
 0x509   : > { %v1328_v12 = vsel %vm1072_vm4, %v1318_v10, -inf }
 0x50a   : > { %1329 = vmax.xlane.f32.xlu0 %v1328_v12 }
 0x579   : > { %v1321_v13 = vpop.xlane.xlu0 %1320 }
 0x57a   : > { %v1331_v14 = vsub.f32 %v1315_v47, %v1321_v13 }
 0x57c   : > { %v1335_v15 = vmul.f32 1.442695, %v1331_v14 }
 0x57d   : > { %v1324_v16 = vpop.xlane.xlu1 %1323 }
 0x57e   : > { %5925 = vpow2.f32 %v1335_v15  ;;  %v1332_v17 = vsub.f32 %v1316_v58, %v1324_v16 }
 0x580   : > { %v1337_v18 = vmul.f32 1.442695, %v1332_v17 }
 0x582   : > { %5927 = vpow2.f32 %v1337_v18 }
 0x58b   : > { %v5926_v19 = vpop.eup %5925 }
 0x58c   : > { %v1343_v20 = vsel %vm1072_vm4, %v5926_v19, 0.0 }
 0x58d   : > { %1344 = vadd.xlane.f32.xlu0 %v1343_v20 }
 0x58f   : > { %v5928_v21 = vpop.eup %5927  ;;  %v1327_v25 = vpop.xlane.xlu0 %1326 }
 0x590   : > { %v1333_v26 = vsub.f32 %v1317_v4, %v1327_v25  ;;  %v1346_v27 = vsel %vm1072_vm4, %v5928_v21, 0.0 }
 0x591   : > { %1347 = vadd.xlane.f32.xlu1 %v1346_v27 }
 0x592   : > { %v1339_v28 = vmul.f32 1.442695, %v1333_v26 }
 0x593   : > { %v1330_v29 = vpop.xlane.xlu0 %1329 }
 0x594   : > { %5929 = vpow2.f32 %v1339_v28  ;;  %v1334_v33 = vsub.f32 %v1318_v10, %v1330_v29 }
 0x596   : > { %v1341_v34 = vmul.f32 1.442695, %v1334_v33 }
 0x598   : > { %5931 = vpow2.f32 %v1341_v34 }
 0x5a1   : > { %v5930_v35 = vpop.eup %5929 }
 0x5a2   : > { %v1349_v36 = vsel %vm1072_vm4, %v5930_v35, 0.0 }
 0x5a3   : > { %1350 = vadd.xlane.f32.xlu0 %v1349_v36 }
 0x5a5   : > { %v5932_v37 = vpop.eup %5931 }
 0x5a6   : > { %v1352_v38 = vsel %vm1072_vm4, %v5932_v37, 0.0 }
 0x5a7   : > { %1353 = vadd.xlane.f32.xlu1 %v1352_v38 }
 0x5b8   : > { %1414 = vrot.lane.b32.xlu1 %v6540_v31, %s6260_s28 }
 0x5b9   : > { %1366 = vrot.lane.b32.xlu0 %v6527_v24, %s6260_s28 }
 0x5bc   : > { %1599 = vrot.lane.b32.xlu1 %v6515_v8, %s6261_s17 }
 0x5bd   : > { %1597 = vrot.lane.b32.xlu0 %v6523_v22, %s6261_s17 }
 0x5c0   : > { %1650 = vrot.lane.b32.xlu1 %v6525_v23, %s6261_s17 }
 0x5c4   : > { %1648 = vrot.lane.b32.xlu1 %v6538_v30, %s6261_s17 }
 0x616   : > { %v1345_v40 = vpop.xlane.xlu0 %1344 }
 0x61a   : > { %v1348_v39 = vpop.xlane.xlu1 %1347 }
 0x61b   : > { %5933 = vrcp.f32 %v1348_v39 }
 0x61c   : > { %5935 = vrcp.f32 %v1345_v40 }
 0x628   : > { %v5934_v42 = vpop.eup %5933 }
 0x629   : > { %v5936_v46 = vpop.eup %5935  ;;  %v1360_v47 = vmul.f32 %v5934_v42, %v5928_v21 }
 0x62a   : > { %v1359_v55 = vmul.f32 %v5936_v46, %v5926_v19 }
 0x62c   : > { %v1351_v45 = vpop.xlane.xlu0 %1350  ;;  %v1363_v58 = vpack.c.bf16 %v1360_v47, %v1359_v55 }
 0x62d   : > { %5937 = vrcp.f32 %v1351_v45 }
 0x630   : > { %v1367_v52 = vpop.permute.xlu0 %1366  ;;  %v1354_v53 = vpop.xlane.xlu1 %1353 }
 0x631   : > { %5939 = vrcp.f32 %v1354_v53  ;;  %5415 = vmatpush3.bf16.msra.mxu0 %v1367_v52 }
 0x632   : > { %5426 = vmatprep.subr.bf16.mxu0 %v5783_v43 }
 0x634   : > { %5417 = vmatmul.mubr.msk.bf16.vlgmr.msra.gmra.mxu0 %vm1072_vm4, %v1363_v58  ;;  %v1415_v60 = vpop.permute.xlu1 %1414  ;;  %v1598_v26 = vpop.permute.xlu0 %1597 }
 0x635   : > { %5421 = vmatpush3.bf16.msra.mxu1 %v1415_v60  ;;  %5427 = vmatpush3.bf16.msra.mxu0 %v5783_v43 }
 0x636   : > { %5434 = vmatprep.subr.bf16.mxu1 %v5781_v59 }
 0x638   : > { %v1600_v9 = vpop.permute.xlu1 %1599 }
 0x639   : > { %v1605_v19 = vsel %vm973_vm3, %v1600_v9, 0 }
 0x63a   : > { %v5938_v62 = vpop.eup %5937 }
 0x63b   : > { %v1361_v3 = vmul.f32 %v5938_v62, %v5930_v35 }
 0x63c   : > { %v1651_v10 = vpop.permute.xlu1 %1650 }
 0x63d   : > { %v1656_v11 = vsel %vm973_vm3, %v1651_v10, 0 }
 0x63e   : > { %v5940_v1 = vpop.eup %5939 }
 0x63f   : > { %v1362_v4 = vmul.f32 %v5940_v1, %v5932_v37 }
 0x640   : > { %v1649_v41 = vpop.permute.xlu1 %1648 }
 0x641   : > { %v1364_v5 = vpack.c.bf16 %v1362_v4, %v1361_v3 }
 0x643   : > { %5423 = vmatmul.mubr.msk.bf16.vlgmr.msra.gmra.mxu1 %vm1072_vm4, %v1364_v5 }
 0x644   : > { %5435 = vmatpush3.bf16.msra.mxu1 %v5781_v59  ;;  %5438 = vmatprep.mubr.msk.bf16.mxu1 %vm973_vm3, %v1207_v44  ;;  %v5784_v44 = vld [vmem:[#allocation5 + $0x10] sm:$0xff]  }
 0x645   : > { %5436 = vmatprep.subr.bf16.mxu1 %v5782_v7  ;;  %5428 = vmatprep.subr.bf16.mxu0 %v5784_v44 }
 0x646   : > { %5429 = vmatpush3.bf16.msra.mxu0 %v5784_v44 }
 0x647   : > { %5442 = vmatprep.subr.bf16.mxu0 %v6258_v54 }
 0x648   : > { %5437 = vmatpush3.bf16.msra.mxu1 %v5782_v7 }
 0x649   : > { %5448 = vmatprep.subr.bf16.mxu1 %v6258_v54 }
 0x64b   : > { %5439 = vmatmul.mubr.msk.bf16.vlgmr.msra.gmra.mxu1 %vm973_vm3, %v1208_v0 }
 0x64c   : > { %5449 = vmatpush3.bf16.xpose.msra.mxu1 %v1656_v11  ;;  %5450 = vmatprep.mubr.msk.bf16.mxu1 %vm6259_vm2, %v6258_v54 }
 0x64d   : > { %5460 = vmatprep.subr.bf16.mxu1 %v6258_v54 }
 0x653   : > { %5451 = vmatmul.mubr.msk.bf16.vlgmr.msra.gmra.mxu1 %vm973_vm3, %v1649_v41 }
 0x654   : > { %5462 = vmatprep.mubr.msk.bf16.mxu1 %vm6259_vm2, %v6258_v54 }
 0x6f4   : > { %v1406_v61 = vpop.f32.mrf.mxu0 }
 0x6f6   : > { %v5418_v63 = vpop.f32.mrf.mxu0 }
 0x6f8   : > { %v1409_v0 = vpop.f32.mrf.mxu0 }
 0x6f9   : > { %v1461_v12 = vpack.c.bf16 %v1409_v0, %v1406_v61 }
 0x6fa   : > { %v5419_v13 = vpop.f32.mrf.mxu0 }
 0x6fb   : > { %5430 = vmatprep.mubr.msk.bf16.mxu0 %vm973_vm3, %v1461_v12 }
 0x703   : > { %v1454_v14 = vpop.f32.mrf.mxu1 }
 0x705   : > { %v5424_v15 = vpop.f32.mrf.mxu1 }
 0x707   : > { %v1457_v16 = vpop.f32.mrf.mxu1 }
 0x708   : > { %v1462_v17 = vpack.c.bf16 %v1457_v16, %v1454_v14 }
 0x709   : > { %v5425_v18 = vpop.f32.mrf.mxu1 }
 0x70a   : > { %5431 = vmatmul.mubr.msk.bf16.vlgmr.msra.gmra.mxu0 %vm973_vm3, %v1462_v17 }
 0x70b   : > { %5443 = vmatpush3.bf16.xpose.msra.mxu0 %v1605_v19  ;;  %v6634_v20 = vpop.f32.mrf.mxu1  ;;  %5444 = vmatprep.mubr.msk.bf16.mxu0 %vm6259_vm2, %v6258_v54 }
 0x70c   : > { %5454 = vmatprep.subr.bf16.mxu0 %v6258_v54 }
 0x70d   : > { %v6639_v21 = vpop.f32.mrf.mxu1 }
 0x70f   : > { %v6641_v25 = vpop.f32.mrf.mxu1 }
 0x711   : > { %v6643_v27 = vpop.f32.mrf.mxu1 }
 0x712   : > { %5445 = vmatmul.mubr.msk.bf16.vlgmr.msra.gmra.mxu0 %vm973_vm3, %v1598_v26 }
 0x713   : > { %v1692_v28 = vpop.f32.mrf.mxu1  ;;  %5456 = vmatprep.mubr.msk.bf16.mxu0 %vm6259_vm2, %v6258_v54 }
 0x714   : > { %v1701_v45 = vmul.f32 0.17677669, %v1692_v28 }
 0x715   : > { %v5452_v29 = vpop.f32.mrf.mxu1 }
 0x716   : > { %v1709_v58 = vsel %vm1072_vm4, %v1701_v45, -inf }
 0x717   : > { %v1695_v33 = vpop.f32.mrf.mxu1 }
 0x718   : > { %v1702_v55 = vmul.f32 0.17677669, %v1695_v33 }
 0x719   : > { %v5453_v34 = vpop.f32.mrf.mxu1 }
 0x71a   : > { %v1712_v60 = vsel %vm1072_vm4, %v1702_v55, -inf }
 0x7ca   : > { %v6648_v35 = vpop.f32.mrf.mxu0 }
 0x7cc   : > { %v6650_v36 = vpop.f32.mrf.mxu0 }
 0x7ce   : > { %v6652_v37 = vpop.f32.mrf.mxu0 }
 0x7d0   : > { %v6654_v38 = vpop.f32.mrf.mxu0 }
 0x7d2   : > { %v1641_v39 = vpop.f32.mrf.mxu0 }
 0x7d3   : > { %v1699_v40 = vmul.f32 0.17677669, %v1641_v39 }
 0x7d4   : > { %v5446_v42 = vpop.f32.mrf.mxu0 }
 0x7d5   : > { %v1703_v46 = vsel %vm1072_vm4, %v1699_v40, -inf }
 0x7d6   : > { %1704 = vmax.xlane.f32.xlu0 %v1703_v46  ;;  %v1644_v47 = vpop.f32.mrf.mxu0 }
 0x7d7   : > { %v1700_v52 = vmul.f32 0.17677669, %v1644_v47 }
 0x7d8   : > { %v5447_v53 = vpop.f32.mrf.mxu0 }
 0x7d9   : > { %v1706_v59 = vsel %vm1072_vm4, %v1700_v52, -inf  ;;  %v5785_v53 = vld [vmem:[#allocation5 + $0x28] sm:$0xff]  }
 0x7da   : > { %1710 = vmax.xlane.f32.xlu0 %v1709_v58  ;;  %1707 = vmax.xlane.f32.xlu1 %v1706_v59 }
 0x7de   : > { %1713 = vmax.xlane.f32.xlu0 %v1712_v60 }
 0x85f   : > { %v1705_v62 = vpop.xlane.xlu0 %1704 }
 0x860   : > { %v1715_v1 = vsub.f32 %v1699_v40, %v1705_v62 }
 0x862   : > { %v1719_v7 = vmul.f32 1.442695, %v1715_v1 }
 0x863   : > { %v1711_v3 = vpop.xlane.xlu0 %1710  ;;  %v1708_v4 = vpop.xlane.xlu1 %1707 }
 0x864   : > { %v1717_v5 = vsub.f32 %v1701_v45, %v1711_v3  ;;  %v1716_v10 = vsub.f32 %v1700_v52, %v1708_v4 }
 0x866   : > { %v1723_v9 = vmul.f32 1.442695, %v1717_v5  ;;  %v1721_v43 = vmul.f32 1.442695, %v1716_v10 }
 0x867   : > { %v1714_v11 = vpop.xlane.xlu0 %1713 }
 0x868   : > { %5941 = vpow2.f32 %v1723_v9  ;;  %v1718_v41 = vsub.f32 %v1702_v55, %v1714_v11  ;;  %v5786_v55 = vld [vmem:[#allocation5 + $0x20] sm:$0xff]  }
 0x869   : > { %5943 = vpow2.f32 %v1719_v7 }
 0x86a   : > { %v1725_v44 = vmul.f32 1.442695, %v1718_v41 }
 0x86c   : > { %5945 = vpow2.f32 %v1725_v44 }
 0x86d   : > { %5947 = vpow2.f32 %v1721_v43 }
 0x875   : > { %v5942_v61 = vpop.eup %5941 }
 0x876   : > { %v1733_v63 = vsel %vm1072_vm4, %v5942_v61, 0.0  ;;  %v5944_v0 = vpop.eup %5943 }
 0x877   : > { %1734 = vadd.xlane.f32.xlu0 %v1733_v63  ;;  %v1727_v13 = vsel %vm1072_vm4, %v5944_v0, 0.0 }
 0x879   : > { %v5946_v12 = vpop.eup %5945 }
 0x87a   : > { %v1736_v14 = vsel %vm1072_vm4, %v5946_v12, 0.0  ;;  %v5948_v15 = vpop.eup %5947 }
 0x87b   : > { %1728 = vadd.xlane.f32.xlu0 %v1727_v13  ;;  %1737 = vadd.xlane.f32.xlu1 %v1736_v14  ;;  %v1730_v16 = vsel %vm1072_vm4, %v5948_v15, 0.0 }
 0x87f   : > { %1731 = vadd.xlane.f32.xlu1 %v1730_v16 }
 0x890   : > { %1796 = vrot.lane.b32.xlu1 %v6540_v31, %s6261_s17 }
 0x891   : > { %1749 = vrot.lane.b32.xlu0 %v6527_v24, %s6261_s17 }
 0x894   : > { %1918 = vrot.lane.b32.xlu1 %v6515_v8, %s6262_s16 }
 0x895   : > { %1916 = vrot.lane.b32.xlu0 %v6523_v22, %s6262_s16 }
 0x898   : > { %1969 = vrot.lane.b32.xlu1 %v6525_v23, %s6262_s16 }
 0x89c   : > { %1967 = vrot.lane.b32.xlu1 %v6538_v30, %s6262_s16 }
 0x900   : > { %v1735_v17 = vpop.xlane.xlu0 %1734 }
 0x901   : > { %5949 = vrcp.f32 %v1735_v17 }
 0x904   : > { %v1729_v18 = vpop.xlane.xlu0 %1728  ;;  %v1738_v19 = vpop.xlane.xlu1 %1737 }
 0x905   : > { %5951 = vrcp.f32 %v1738_v19 }
 0x906   : > { %5953 = vrcp.f32 %v1729_v18 }
 0x908   : > { %v1750_v26 = vpop.permute.xlu0 %1749  ;;  %v1732_v28 = vpop.xlane.xlu1 %1731 }
 0x909   : > { %5955 = vrcp.f32 %v1732_v28  ;;  %5455 = vmatpush3.bf16.msra.mxu0 %v1750_v26 }
 0x90a   : > { %5466 = vmatprep.subr.bf16.mxu0 %v5785_v53 }
 0x90c   : > { %v1797_v8 = vpop.permute.xlu1 %1796  ;;  %v1917_v52 = vpop.permute.xlu0 %1916 }
 0x90d   : > { %5461 = vmatpush3.bf16.msra.mxu1 %v1797_v8  ;;  %v1591_v8 = vadd.f32 %v6634_v20, %v6648_v35 }
 0x90e   : > { %5474 = vmatprep.subr.bf16.mxu1 %v6258_v54  ;;  %v5950_v22 = vpop.eup %5949 }
 0x90f   : > { %v1745_v33 = vmul.f32 %v5950_v22, %v5942_v61 }
 0x910   : > { %v1919_v30 = vpop.permute.xlu1 %1918 }
 0x911   : > { %v1924_v46 = vsel %vm973_vm3, %v1919_v30, 0  ;;  %v1594_v30 = vadd.f32 %v6641_v25, %v6652_v37 }
 0x912   : > { %v5952_v29 = vpop.eup %5951 }
 0x913   : > { %v5954_v23 = vpop.eup %5953  ;;  %v1746_v34 = vmul.f32 %v5952_v29, %v5946_v12 }
 0x914   : > { %v1743_v42 = vmul.f32 %v5954_v23, %v5944_v0  ;;  %v1970_v5 = vpop.permute.xlu1 %1969  ;;  %v1583_v23 = vadd.f32 %v6639_v21, %v6650_v36 }
 0x915   : > { %v1748_v40 = vpack.c.bf16 %v1746_v34, %v1745_v33  ;;  %v1975_v44 = vsel %vm973_vm3, %v1970_v5, 0 }
 0x916   : > { %v5956_v39 = vpop.eup %5955 }
 0x917   : > { %v1744_v45 = vmul.f32 %v5956_v39, %v5948_v15  ;;  %5463 = vmatmul.mubr.msk.bf16.vlgmr.msra.gmra.mxu1 %vm1072_vm4, %v1748_v40 }
 0x918   : > { %5475 = vmatpush3.bf16.xpose.msra.mxu1 %v1924_v46  ;;  %5476 = vmatprep.mubr.msk.bf16.mxu1 %vm6259_vm2, %v6258_v54  ;;  %v1968_v14 = vpop.permute.xlu1 %1967 }
 0x919   : > { %v1747_v47 = vpack.c.bf16 %v1744_v45, %v1743_v42  ;;  %5486 = vmatprep.subr.bf16.mxu1 %v6258_v54  ;;  %v1586_v42 = vadd.f32 %v6643_v27, %v6654_v38 }
 0x91b   : > { %5457 = vmatmul.mubr.msk.bf16.vlgmr.msra.gmra.mxu0 %vm1072_vm4, %v1747_v47 }
 0x91c   : > { %5467 = vmatpush3.bf16.msra.mxu0 %v5785_v53 }
 0x91d   : > { %5468 = vmatprep.subr.bf16.mxu0 %v5786_v55 }
 0x91f   : > { %5477 = vmatmul.mubr.msk.bf16.vlgmr.msra.gmra.mxu1 %vm973_vm3, %v1917_v52 }
 0x920   : > { %5488 = vmatprep.mubr.msk.bf16.mxu1 %vm6259_vm2, %v6258_v54  ;;  %5469 = vmatpush3.bf16.msra.mxu0 %v5786_v55 }
 0x921   : > { %5480 = vmatprep.subr.bf16.mxu0 %v6258_v54 }
 0x9d7   : > { %v1836_v58 = vpop.f32.mrf.mxu1 }
 0x9d9   : > { %v5464_v59 = vpop.f32.mrf.mxu1 }
 0x9db   : > { %v1789_v60 = vpop.f32.mrf.mxu0  ;;  %v1839_v62 = vpop.f32.mrf.mxu1 }
 0x9dc   : > { %v1844_v10 = vpack.c.bf16 %v1839_v62, %v1836_v58 }
 0x9dd   : > { %v5458_v1 = vpop.f32.mrf.mxu0  ;;  %v5465_v3 = vpop.f32.mrf.mxu1 }
 0x9df   : > { %v1792_v4 = vpop.f32.mrf.mxu0  ;;  %v1960_v9 = vpop.f32.mrf.mxu1 }
 0x9e0   : > { %v1843_v7 = vpack.c.bf16 %v1792_v4, %v1789_v60  ;;  %v2018_v11 = vmul.f32 0.17677669, %v1960_v9 }
 0x9e1   : > { %v5459_v41 = vpop.f32.mrf.mxu0  ;;  %v5478_v43 = vpop.f32.mrf.mxu1 }
 0x9e2   : > { %5470 = vmatprep.mubr.msk.bf16.mxu0 %vm973_vm3, %v1843_v7  ;;  %v2022_v61 = vsel %vm1072_vm4, %v2018_v11, -inf }
 0x9e3   : > { %5471 = vmatmul.mubr.msk.bf16.vlgmr.msra.gmra.mxu0 %vm973_vm3, %v1844_v10  ;;  %2023 = vmax.xlane.f32.xlu0 %v2022_v61  ;;  %v1963_v63 = vpop.f32.mrf.mxu1 }
 0x9e4   : > { %5481 = vmatpush3.bf16.xpose.msra.mxu0 %v1975_v44  ;;  %v2019_v0 = vmul.f32 0.17677669, %v1963_v63  ;;  %5482 = vmatprep.mubr.msk.bf16.mxu0 %vm6259_vm2, %v6258_v54 }
 0x9e5   : > { %5492 = vmatprep.subr.bf16.mxu0 %v6258_v54  ;;  %v5479_v12 = vpop.f32.mrf.mxu1 }
 0x9e6   : > { %v2025_v13 = vsel %vm1072_vm4, %v2019_v0, -inf }
 0x9e7   : > { %2026 = vmax.xlane.f32.xlu1 %v2025_v13 }
 0x9eb   : > { %5483 = vmatmul.mubr.msk.bf16.vlgmr.msra.gmra.mxu0 %vm973_vm3, %v1968_v14 }
 0x9ec   : > { %5494 = vmatprep.mubr.msk.bf16.mxu0 %vm6259_vm2, %v6258_v54 }
 0xa6c   : > { %v2024_v26 = vpop.xlane.xlu0 %2023 }
 0xa6d   : > { %v2034_v28 = vsub.f32 %v2018_v11, %v2024_v26 }
 0xa6f   : > { %v2038_v22 = vmul.f32 1.442695, %v2034_v28 }
 0xa70   : > { %v2027_v15 = vpop.xlane.xlu1 %2026 }
 0xa71   : > { %v2035_v16 = vsub.f32 %v2019_v0, %v2027_v15 }
 0xa73   : > { %v2040_v17 = vmul.f32 1.442695, %v2035_v16 }
 0xa75   : > { %5957 = vpow2.f32 %v2040_v17  ;;  %v5787_v17 = vld [vmem:[#allocation5 + $0x38] sm:$0xff]  }
 0xa76   : > { %5959 = vpow2.f32 %v2038_v22 }
 0xa82   : > { %v5958_v18 = vpop.eup %5957 }
 0xa83   : > { %v2049_v19 = vsel %vm1072_vm4, %v5958_v18, 0.0  ;;  %v5960_v55 = vpop.eup %5959 }
 0xa84   : > { %2050 = vadd.xlane.f32.xlu1 %v2049_v19  ;;  %v2046_v27 = vsel %vm1072_vm4, %v5960_v55, 0.0 }
 0xaa3   : > { %v5472_v29 = vpop.f32.mrf.mxu0 }
 0xaa4   : > { %v6703_v33 = vadd.f32 %v5472_v29, %v1591_v8 }
 0xaa5   : > { %v1897_v34 = vpop.f32.mrf.mxu0 }
 0xaa6   : > { %v6707_v39 = vadd.f32 %v1897_v34, %v1583_v23 }
 0xaa7   : > { %v5473_v40 = vpop.f32.mrf.mxu0 }
 0xaa8   : > { %v6711_v45 = vadd.f32 %v5473_v40, %v1594_v30 }
 0xaa9   : > { %v1900_v20 = vpop.f32.mrf.mxu0 }
 0xaaa   : > { %v6713_v35 = vadd.f32 %v1900_v20, %v1586_v42 }
 0xaab   : > { %v2011_v46 = vpop.f32.mrf.mxu0 }
 0xaac   : > { %v2020_v21 = vmul.f32 0.17677669, %v2011_v46 }
 0xaad   : > { %v5484_v36 = vpop.f32.mrf.mxu0 }
 0xaae   : > { %v2028_v47 = vsel %vm1072_vm4, %v2020_v21, -inf }
 0xaaf   : > { %2029 = vmax.xlane.f32.xlu0 %v2028_v47  ;;  %v2014_v52 = vpop.f32.mrf.mxu0 }
 0xab0   : > { %v2021_v25 = vmul.f32 0.17677669, %v2014_v52 }
 0xab1   : > { %v5485_v37 = vpop.f32.mrf.mxu0 }
 0xab2   : > { %v2031_v53 = vsel %vm1072_vm4, %v2021_v25, -inf }
 0xab3   : > { %2032 = vmax.xlane.f32.xlu0 %v2031_v53 }
 0xab7   : > { %2047 = vadd.xlane.f32.xlu0 %v2046_v27 }
 0xb0d   : > { %v2051_v10 = vpop.xlane.xlu1 %2050 }
 0xb38   : > { %v2030_v38 = vpop.xlane.xlu0 %2029 }
 0xb39   : > { %v2036_v58 = vsub.f32 %v2020_v21, %v2030_v38  ;;  %v5028_v21 = vld [vmem:[%s7183_s7] ss:$0 sm:$0xff] }
 0xb3b   : > { %v2042_v59 = vmul.f32 1.442695, %v2036_v58 }
 0xb3c   : > { %v2033_v60 = vpop.xlane.xlu0 %2032 }
 0xb3d   : > { %5961 = vpow2.f32 %v2042_v59  ;;  %v2037_v62 = vsub.f32 %v2021_v25, %v2033_v60 }
 0xb3f   : > { %v2044_v1 = vmul.f32 1.442695, %v2037_v62  ;;  %v5791_v62 = vld [vmem:[#allocation7 + $0x74] ss:$8 sps:$4 sm:$0xff]  }
 0xb40   : > { %v2048_v9 = vpop.xlane.xlu0 %2047 }
 0xb41   : > { %5963 = vpow2.f32 %v2044_v1 }
 0xb42   : > { %5965 = vrcp.f32 %v2048_v9 }
 0xb43   : > { %5967 = vrcp.f32 %v2051_v10 }
 0xb4a   : > { %v5962_v3 = vpop.eup %5961 }
 0xb4b   : > { %v2052_v4 = vsel %vm1072_vm4, %v5962_v3, 0.0 }
 0xb4c   : > { %2053 = vadd.xlane.f32.xlu0 %v2052_v4 }
 0xb4e   : > { %v5964_v5 = vpop.eup %5963 }
 0xb4f   : > { %v2055_v7 = vsel %vm1072_vm4, %v5964_v5, 0.0  ;;  %v5966_v11 = vpop.eup %5965 }
 0xb50   : > { %2056 = vadd.xlane.f32.xlu1 %v2055_v7  ;;  %v5968_v43 = vpop.eup %5967  ;;  %v2062_v44 = vmul.f32 %v5966_v11, %v5960_v55 }
 0xb51   : > { %v2063_v0 = vmul.f32 %v5968_v43, %v5958_v18  ;;  %v5788_v18 = vld [vmem:[#allocation5 + $0x30] sm:$0xff]  }
 0xb53   : > { %v2066_v12 = vpack.c.bf16 %v2063_v0, %v2062_v44  ;;  %v5794_v44 = vld [vmem:[#allocation7 + $0x64] ss:$8 sps:$4 sm:$0xff]   ;;  %v5795_v0 = vld [vmem:[#allocation7 + $0x50] ss:$8 sps:$4 sm:$0xff]  }
 0xb61   : > { %2115 = vrot.lane.b32.xlu1 %v6540_v31, %s6262_s16 }
 0xb62   : > { %2068 = vrot.lane.b32.xlu0 %v6527_v24, %s6262_s16 }
 0xbd5   : > { %v2054_v41 = vpop.xlane.xlu0 %2053 }
 0xbd6   : > { %5969 = vrcp.f32 %v2054_v41 }
 0xbd9   : > { %v2057_v61 = vpop.xlane.xlu1 %2056  ;;  %v2069_v63 = vpop.permute.xlu0 %2068 }
 0xbda   : > { %5971 = vrcp.f32 %v2057_v61  ;;  %5487 = vmatpush3.bf16.msra.mxu1 %v2069_v63  ;;  %v5792_v61 = vld [vmem:[#allocation7 + $0x60] ss:$8 sps:$4 sm:$0xff]   ;;  %v5797_v63 = vld [vmem:[#allocation7 + $0x54] ss:$8 sps:$4 sm:$0xff]  }
 0xbdb   : > { %5498 = vmatprep.subr.bf16.mxu1 %v5787_v17 }
 0xbdd   : > { %v2116_v13 = vpop.permute.xlu1 %2115  ;;  %5489 = vmatmul.mubr.msk.bf16.vlgmr.msra.gmra.mxu1 %vm1072_vm4, %v2066_v12  ;;  %v5800_v12 = vld [vmem:[#allocation7 + $0x44] ss:$8 sps:$4 sm:$0xff]  }
 0xbde   : > { %5493 = vmatpush3.bf16.msra.mxu0 %v2116_v13  ;;  %5499 = vmatpush3.bf16.msra.mxu1 %v5787_v17  ;;  %v5798_v13 = vld [vmem:[#allocation7 + $0x40] ss:$8 sps:$4 sm:$0xff]   ;;  %v5807_v17 = vld [vmem:[#allocation7 + $0x10] ss:$8 sps:$4 sm:$0xff]  }
 0xbdf   : > { %5500 = vmatprep.subr.bf16.mxu1 %v5788_v18  ;;  %2427 = vmatprep.subr.bf16.mxu0 %v5791_v62 }
 0xbe2   : > { %5501 = vmatpush3.bf16.msra.mxu1 %v5788_v18  ;;  %v5812_v18 = vld [vmem:[#allocation7 + $0x4] ss:$8 sps:$4 sm:$0xff]  }
 0xbe3   : > { %v5970_v24 = vpop.eup %5969 }
 0xbe4   : > { %v2064_v14 = vmul.f32 %v5970_v24, %v5962_v3  ;;  %v5801_v24 = vld [vmem:[#allocation7 + $0x30] ss:$8 sps:$4 sm:$0xff]  }
 0xbe7   : > { %v5972_v31 = vpop.eup %5971 }
 0xbe8   : > { %v2065_v15 = vmul.f32 %v5972_v31, %v5964_v5  ;;  %v5803_v31 = vld [vmem:[#allocation7 + $0x34] ss:$8 sps:$4 sm:$0xff]  }
 0xbea   : > { %v2067_v16 = vpack.c.bf16 %v2065_v15, %v2064_v14  ;;  %v5806_v14 = vld [vmem:[#allocation7 + $0x24] ss:$8 sps:$4 sm:$0xff]   ;;  %v5804_v15 = vld [vmem:[#allocation7 + $0x20] ss:$8 sps:$4 sm:$0xff]  }
 0xbec   : > { %5495 = vmatmul.mubr.msk.bf16.vlgmr.msra.gmra.mxu0 %vm1072_vm4, %v2067_v16  ;;  %v5809_v16 = vld [vmem:[#allocation7 + $0x14] ss:$8 sps:$4 sm:$0xff]  }
 0xbed   : > { %2459 = vmatprep.mubr.bf16.mxu0 %v6257_v32 }
 0xc9d   : > { %v2108_v19 = vpop.f32.mrf.mxu1 }
 0xc9f   : > { %v5490_v26 = vpop.f32.mrf.mxu1 }
 0xca0   : > { %v5813_v26 = vld [vmem:[#allocation8 + $0x78] sm:$0xff]  }
 0xca1   : > { %v2111_v28 = vpop.f32.mrf.mxu1  ;;  %5238 = vmatprep.subr.bf16.mxu1 %v5813_v26 }
 0xca2   : > { %v2162_v8 = vpack.c.bf16 %v2111_v28, %v2108_v19  ;;  %v5810_v19 = vld [vmem:[#allocation7] ss:$8 sps:$4 sm:$0xff]   ;;  %v5814_v28 = vld [vmem:[#allocation8 + $0x38] sm:$0xff]  }
 0xca3   : > { %v5491_v22 = vpop.f32.mrf.mxu1 }
 0xca4   : > { %5502 = vmatprep.mubr.msk.bf16.mxu1 %vm973_vm3, %v2162_v8  ;;  %v5815_v8 = vld [vmem:[#allocation8 + $0x70] sm:$0xff]  }
 0xca5   : > { %v5816_v22 = vld [vmem:[#allocation8 + $0x30] sm:$0xff]  }
 0xcac   : > { %v2155_v29 = vpop.f32.mrf.mxu0 }
 0xcae   : > { %v5496_v23 = vpop.f32.mrf.mxu0 }
 0xcaf   : > { %v5818_v23 = vld [vmem:[#allocation8 + $0x28] sm:$0xff]  }
 0xcb0   : > { %v2158_v34 = vpop.f32.mrf.mxu0 }
 0xcb1   : > { %v2163_v30 = vpack.c.bf16 %v2158_v34, %v2155_v29  ;;  %v5817_v29 = vld [vmem:[#allocation8 + $0x68] sm:$0xff]   ;;  %v5819_v34 = vld [vmem:[#allocation8 + $0x60] sm:$0xff]  }
 0xcb2   : > { %v5497_v40 = vpop.f32.mrf.mxu0 }
 0xcb3   : > { %5503 = vmatmul.mubr.msk.bf16.vlgmr.msra.gmra.mxu1 %vm973_vm3, %v2163_v30  ;;  %v5820_v30 = vld [vmem:[#allocation8 + $0x20] sm:$0xff]   ;;  %v5821_v40 = vld [vmem:[#allocation8 + $0x58] sm:$0xff]  }
 0xcb4   : > { %5239 = vmatpush3.bf16.msra.mxu1 %v5814_v28 }
 0xcb5   : > { %5240 = vmatprep.subr.bf16.mxu1 %v5815_v8 }
 0xcb8   : > { %5241 = vmatpush3.bf16.msra.mxu1 %v5816_v22 }
 0xcb9   : > { %5242 = vmatprep.subr.bf16.mxu1 %v5817_v29 }
 0xcbc   : > { %5243 = vmatpush3.bf16.msra.mxu1 %v5818_v23 }
 0xcbd   : > { %5244 = vmatprep.subr.bf16.mxu1 %v5819_v34 }
 0xcc0   : > { %5245 = vmatpush3.bf16.msra.mxu1 %v5820_v30 }
 0xcc1   : > { %5246 = vmatprep.subr.bf16.mxu1 %v5821_v40 }
 0xd73   : > { %v5504_v42 = vpop.f32.mrf.mxu1 }
 0xd74   : > { %v2233_v37 = vadd.f32 %v5504_v42, %v6703_v33  ;;  %v5822_v42 = vld [vmem:[#allocation8 + $0x18] sm:$0xff]  }
 0xd75   : > { %v2216_v20 = vpop.f32.mrf.mxu1  ;;  %5247 = vmatpush3.bf16.msra.mxu1 %v5822_v42 }
 0xd76   : > { %v2231_v46 = vadd.f32 %v2216_v20, %v6707_v39  ;;  %v2244_v58 = vadd.f32 %v5028_v21, %v2233_v37 }
 0xd77   : > { %v5505_v36 = vpop.f32.mrf.mxu1 }
 0xd78   : > { %v2242_v47 = vadd.f32 %v5028_v21, %v2231_v46  ;;  %v2234_v52 = vadd.f32 %v5505_v36, %v6711_v45  ;;  %v2248_v60 = vadd.f32 %v2244_v58, %v6489_v51  ;;  %v5789_v45 = vld [vmem:[#allocation7 + $0x70] ss:$8 sps:$4 sm:$0xff]  }
 0xd79   : > { %v2219_v25 = vpop.f32.mrf.mxu1  ;;  %2428 = vmatpush1.bf16.msra.mxu0 %v5789_v45 }
 0xd7a   : > { %v2245_v53 = vadd.f32 %v5028_v21, %v2234_v52  ;;  %v2232_v55 = vadd.f32 %v2219_v25, %v6713_v35  ;;  %v2246_v27 = vadd.f32 %v2242_v47, %v6485_v49  ;;  %2429 = vmatprep.subr.bf16.mxu0 %v5794_v44  ;;  %v5825_v44 = vld [vmem:[#allocation8 + $0x48] sm:$0xff]  }
 0xd7c   : > { %v2243_v38 = vadd.f32 %v5028_v21, %v2232_v55  ;;  %2252 = vadd.xlane.f32.xlu1 %v2246_v27  ;;  %v2249_v39 = vadd.f32 %v2245_v53, %v6483_v48 }
 0xd7d   : > { %2430 = vmatpush1.bf16.msra.mxu0 %v5792_v61  ;;  %v5826_v61 = vld [vmem:[#allocation8 + $0x8] sm:$0xff]  }
 0xd7e   : > { %v2247_v59 = vadd.f32 %v2243_v38, %v6487_v50  ;;  %2431 = vmatprep.subr.bf16.mxu0 %v5797_v63  ;;  %v5827_v63 = vld [vmem:[#allocation8 + $0x40] sm:$0xff]  }
 0xd80   : > { %2258 = vadd.xlane.f32.xlu1 %v2249_v39  ;;  %2254 = vadd.xlane.f32.xlu0 %v2247_v59 }
 0xd81   : > { %2432 = vmatpush1.bf16.msra.mxu0 %v5795_v0  ;;  %v5828_v0 = vld [vmem:[#allocation8] sm:$0xff]  }
 0xd82   : > { %2433 = vmatprep.subr.bf16.mxu0 %v5800_v12  ;;  %v2335_v12 = vld [vmem:[%s7187_s11] sm:$0x3] }
 0xd84   : > { %2256 = vadd.xlane.f32.xlu0 %v2248_v60 }
 0xd85   : > { %2434 = vmatpush1.bf16.msra.mxu0 %v5798_v13 }
 0xd86   : > { %2435 = vmatprep.subr.bf16.mxu0 %v5803_v31  ;;  %v2340_v31 = vrot.slane %v2335_v12, %v6512_v2 }
 0xd89   : > { %2436 = vmatpush1.bf16.msra.mxu0 %v5801_v24  ;;  %v2344_v24 = vrot.slane %v2335_v12, %v6505_v57 }
 0xd8a   : > { %2437 = vmatprep.subr.bf16.mxu0 %v5806_v14 }
 0xd8d   : > { %2438 = vmatpush1.bf16.msra.mxu0 %v5804_v15 }
 0xd8e   : > { %2439 = vmatprep.subr.bf16.mxu0 %v5809_v16 }
 0xd91   : > { %2440 = vmatpush1.bf16.msra.mxu0 %v5807_v17 }
 0xd92   : > { %2441 = vmatprep.subr.bf16.mxu0 %v5812_v18 }
 0xd95   : > { %2442 = vmatpush1.bf16.msra.mxu0 %v5810_v19 }
 0xe05   : > { %v2253_v33 = vpop.xlane.xlu1 %2252 }
 0xe06   : > { %v2261_v35 = vmul.f32 0.0078125, %v2253_v33  ;;  %v5030_v33 = vld [vmem:[%s7185_s9] ss:$0 sm:$0xff] }
 0xe08   : > { %v6740_v1 = vsub.f32 %v2246_v27, %v2261_v35 }
 0xe09   : > { %v2259_v49 = vpop.xlane.xlu1 %2258  ;;  %v2255_v3 = vpop.xlane.xlu0 %2254 }
 0xe0a   : > { %v2264_v4 = vmul.f32 0.0078125, %v2259_v49  ;;  %v2262_v5 = vmul.f32 0.0078125, %v2255_v3  ;;  %v2269_v48 = vmul.f32 %v6740_v1, %v6740_v1 }
 0xe0c   : > { %v6744_v50 = vsub.f32 %v2247_v59, %v2262_v5  ;;  %2273 = vadd.xlane.f32.xlu0 %v2269_v48  ;;  %v6746_v7 = vsub.f32 %v2249_v39, %v2264_v4  ;;  %v5029_v59 = vld [vmem:[%s7184_s8] ss:$0 sm:$0xff] }
 0xe0d   : > { %v2257_v51 = vpop.xlane.xlu0 %2256 }
 0xe0e   : > { %v2263_v9 = vmul.f32 0.0078125, %v2257_v51  ;;  %v2270_v10 = vmul.f32 %v6744_v50, %v6744_v50  ;;  %v2272_v41 = vmul.f32 %v6746_v7, %v6746_v7 }
 0xe10   : > { %v6750_v11 = vsub.f32 %v2248_v60, %v2263_v9  ;;  %2275 = vadd.xlane.f32.xlu1 %v2270_v10 }
 0xe12   : > { %v2271_v43 = vmul.f32 %v6750_v11, %v6750_v11 }
 0xe14   : > { %2279 = vadd.xlane.f32.xlu1 %v2272_v41  ;;  %2277 = vadd.xlane.f32.xlu0 %v2271_v43 }
 0xe95   : > { %v2274_v20 = vpop.xlane.xlu0 %2273 }
 0xe96   : > { %v2281_v46 = vmul.f32 0.0078125, %v2274_v20 }
 0xe98   : > { %v2285_v21 = vadd.f32 1e-05, %v2281_v46 }
 0xe99   : > { %v2276_v36 = vpop.xlane.xlu1 %2275 }
 0xe9a   : > { %5973 = vrsqrt.f32 %v2285_v21  ;;  %v2282_v47 = vmul.f32 0.0078125, %v2276_v36 }
 0xe9c   : > { %v2286_v52 = vadd.f32 1e-05, %v2282_v47 }
 0xe9d   : > { %v2280_v25 = vpop.xlane.xlu1 %2279  ;;  %v2278_v37 = vpop.xlane.xlu0 %2277 }
 0xe9e   : > { %5975 = vrsqrt.f32 %v2286_v52  ;;  %v2284_v53 = vmul.f32 0.0078125, %v2280_v25  ;;  %v2283_v55 = vmul.f32 0.0078125, %v2278_v37 }
 0xea0   : > { %v2288_v27 = vadd.f32 1e-05, %v2284_v53  ;;  %v2287_v38 = vadd.f32 1e-05, %v2283_v55 }
 0xea2   : > { %5977 = vrsqrt.f32 %v2288_v27 }
 0xea3   : > { %5979 = vrsqrt.f32 %v2287_v38 }
 0xea7   : > { %v5974_v58 = vpop.eup %5973 }
 0xea8   : > { %v2293_v39 = vmul.f32 %v5974_v58, %v6740_v1  ;;  %v5047_v58 = vld [vmem:[%s7189_s13] ss:$0 sm:$0xff] }
 0xeaa   : > { %v2303_v62 = vmul.f32 %v5029_v59, %v2293_v39 }
 0xeab   : > { %v5976_v60 = vpop.eup %5975 }
 0xeac   : > { %v2294_v45 = vmul.f32 %v5976_v60, %v6744_v50  ;;  %v6764_v4 = vadd.f32 %v5030_v33, %v2303_v62 }
 0xeae   : > { %v2304_v35 = vmul.f32 %v5029_v59, %v2294_v45 }
 0xeaf   : > { %v5978_v49 = vpop.eup %5977 }
 0xeb0   : > { %v5980_v3 = vpop.eup %5979  ;;  %v6766_v5 = vadd.f32 %v5030_v33, %v2304_v35  ;;  %v2296_v1 = vmul.f32 %v5978_v49, %v6746_v7  ;;  %v5823_v7 = vld [vmem:[#allocation8 + $0x50] sm:$0xff]  }
 0xeb1   : > { %v2295_v48 = vmul.f32 %v5980_v3, %v6750_v11  ;;  %v5824_v11 = vld [vmem:[#allocation8 + $0x10] sm:$0xff]   ;;  %5248 = vmatprep.subr.bf16.mxu1 %v5823_v7 }
 0xeb2   : > { %v2317_v51 = vpack.c.bf16 %v6766_v5, %v6764_v4  ;;  %v2306_v50 = vmul.f32 %v5029_v59, %v2296_v1  ;;  %5249 = vmatpush3.bf16.msra.mxu1 %v5824_v11 }
 0xeb3   : > { %v2305_v9 = vmul.f32 %v5029_v59, %v2295_v48  ;;  %5250 = vmatprep.subr.bf16.mxu1 %v5825_v44 }
 0xeb4   : > { %2460 = vmatmul.mubr.bf16.vlgmr.msra.gmra.mxu0 %v2317_v51  ;;  %v6775_v41 = vadd.f32 %v5030_v33, %v2306_v50 }
 0xeb5   : > { %2469 = vmatprep.mubr.bf16.mxu0 %v6257_v32  ;;  %v6773_v10 = vadd.f32 %v5030_v33, %v2305_v9 }
 0xeb6   : > { %5251 = vmatpush3.bf16.msra.mxu1 %v5826_v61 }
 0xeb7   : > { %v2318_v43 = vpack.c.bf16 %v6775_v41, %v6773_v10  ;;  %5252 = vmatprep.subr.bf16.mxu1 %v5827_v63  ;;  %v5831_v63 = vld [vmem:[#allocation2 + $0x16c] ss:$12 sps:$4 sm:$0xff]  }
 0xeb8   : > { %2927 = vmatprep.subr.bf16.mxu0 %v5831_v63 }
 0xeba   : > { %5253 = vmatpush3.bf16.msra.mxu1 %v5828_v0 }
 0xebc   : > { %2470 = vmatmul.mubr.bf16.gmra.mxu0 %v2318_v43 }
 0xebd   : > { %2959 = vmatprep.mubr.bf16.mxu0 %v6257_v32 }
 0xf74   : > { %v2461_v13 = vpop.f32.mrf.mxu0 }
 0xf75   : > { %v2462_v18 = vadd.f32 %v2461_v13, %v2340_v31 }
 0xf76   : > { %v2463_v14 = vpop.f32.mrf.mxu0 }
 0xf77   : > { %v2464_v16 = vadd.f32 %v2463_v14, %v2344_v24  ;;  %v2480_v23 = vmax.f32 %v2462_v18, 0.0 }
 0xf78   : > { %v2465_v15 = vpop.f32.mrf.mxu0 }
 0xf79   : > { %v2466_v17 = vadd.f32 %v2465_v15, %v2340_v31  ;;  %v2481_v22 = vmax.f32 %v2464_v16, 0.0 }
 0xf7a   : > { %v2467_v19 = vpop.f32.mrf.mxu0 }
 0xf7b   : > { %v2468_v26 = vadd.f32 %v2467_v19, %v2344_v24  ;;  %v2482_v28 = vmax.f32 %v2466_v17, 0.0 }
 0xf7c   : > { %v2471_v8 = vpop.f32.mrf.mxu0 }
 0xf7d   : > { %v2483_v29 = vmax.f32 %v2468_v26, 0.0  ;;  %v2488_v40 = vpack.c.bf16 %v2482_v28, %v2480_v23  ;;  %v2472_v21 = vadd.f32 %v2471_v8, %v2340_v31  ;;  %v5834_v8 = vld [vmem:[#allocation2 + $0x154] ss:$12 sps:$4 sm:$0xff]   ;;  %v5838_v23 = vld [vmem:[#allocation2 + $0x170] ss:$12 sps:$4 sm:$0xff]  }
 0xf7e   : > { %v2473_v34 = vpop.f32.mrf.mxu0  ;;  %5506 = vmatprep.subr.bf16.mxu1 %v5838_v23 }
 0xf7f   : > { %v2489_v30 = vpack.c.bf16 %v2483_v29, %v2481_v22  ;;  %v2474_v20 = vadd.f32 %v2473_v34, %v2344_v24  ;;  %v2484_v53 = vmax.f32 %v2472_v21, 0.0  ;;  %v5832_v22 = vld [vmem:[#allocation2 + $0x150] ss:$12 sps:$4 sm:$0xff]   ;;  %v5835_v34 = vld [vmem:[#allocation2 + $0x138] ss:$12 sps:$4 sm:$0xff]  }
 0xf80   : > { %v2475_v42 = vpop.f32.mrf.mxu0  ;;  %v5837_v29 = vld [vmem:[#allocation2 + $0x13c] ss:$12 sps:$4 sm:$0xff]  }
 0xf81   : > { %v2476_v46 = vadd.f32 %v2475_v42, %v2340_v31  ;;  %2659 = vmatprep.mubr.bf16.mxu1 %v2489_v30  ;;  %v2485_v25 = vmax.f32 %v2474_v20, 0.0  ;;  %v5841_v30 = vld [vmem:[#allocation2 + $0x124] ss:$12 sps:$4 sm:$0xff]   ;;  %v5839_v42 = vld [vmem:[#allocation2 + $0x120] ss:$12 sps:$4 sm:$0xff]  }
 0xf82   : > { %v2477_v36 = vpop.f32.mrf.mxu0  ;;  %2660 = vmatmul.mubr.bf16.vlgmr.msra.gmra.mxu1 %v2488_v40  ;;  %v5842_v40 = vld [vmem:[#allocation2 + $0x158] ss:$12 sps:$4 sm:$0xff]   ;;  %v5843_v21 = vld [vmem:[#allocation2 + $0x108] ss:$12 sps:$4 sm:$0xff]  }
 0xf83   : > { %v2478_v47 = vadd.f32 %v2477_v36, %v2344_v24  ;;  %v2486_v52 = vmax.f32 %v2476_v46, 0.0  ;;  %5507 = vmatpush3.bf16.msra.mxu1 %v5838_v23  ;;  %v5845_v20 = vld [vmem:[#allocation2 + $0x10c] ss:$12 sps:$4 sm:$0xff]   ;;  %v5849_v36 = vld [vmem:[#allocation2 + $0xf4] ss:$12 sps:$4 sm:$0xff]  }
 0xf84   : > { %5508 = vmatprep.subr.bf16.mxu1 %v5842_v40  ;;  %v5846_v46 = vld [vmem:[#allocation2 + $0x140] ss:$12 sps:$4 sm:$0xff]  }
 0xf85   : > { %v2487_v37 = vmax.f32 %v2478_v47, 0.0  ;;  %v2490_v27 = vpack.c.bf16 %v2486_v52, %v2484_v53  ;;  %v5850_v47 = vld [vmem:[#allocation2 + $0x128] ss:$12 sps:$4 sm:$0xff]   ;;  %v5847_v52 = vld [vmem:[#allocation2 + $0xf0] ss:$12 sps:$4 sm:$0xff]  }
 0xf86   : > { %v5854_v53 = vld [vmem:[#allocation2 + $0x110] ss:$12 sps:$4 sm:$0xff]  }
 0xf87   : > { %v2491_v55 = vpack.c.bf16 %v2487_v37, %v2485_v25  ;;  %5509 = vmatpush3.bf16.msra.mxu1 %v5842_v40  ;;  %v5851_v25 = vld [vmem:[#allocation2 + $0xd8] ss:$12 sps:$4 sm:$0xff]   ;;  %v5853_v37 = vld [vmem:[#allocation2 + $0xdc] ss:$12 sps:$4 sm:$0xff]  }
 0xf88   : > { %5510 = vmatprep.subr.bf16.mxu1 %v5846_v46 }
 0xf89   : > { %2667 = vmatprep.mubr.bf16.mxu1 %v2491_v55  ;;  %v5857_v55 = vld [vmem:[#allocation2 + $0xc4] ss:$12 sps:$4 sm:$0xff]  }
 0xf8a   : > { %2668 = vmatmul.mubr.bf16.gmra.mxu1 %v2490_v27  ;;  %v5858_v27 = vld [vmem:[#allocation2 + $0xf8] ss:$12 sps:$4 sm:$0xff]  }
 0xf8b   : > { %5511 = vmatpush3.bf16.msra.mxu1 %v5846_v46 }
 0xf8c   : > { %5512 = vmatprep.subr.bf16.mxu1 %v5850_v47 }
 0xf8f   : > { %5513 = vmatpush3.bf16.msra.mxu1 %v5850_v47 }
 0xf90   : > { %5514 = vmatprep.subr.bf16.mxu1 %v5854_v53 }
 0xf93   : > { %5515 = vmatpush3.bf16.msra.mxu1 %v5854_v53 }
 0xf94   : > { %5516 = vmatprep.subr.bf16.mxu1 %v5858_v27 }
 0xf97   : > { %5517 = vmatpush3.bf16.msra.mxu1 %v5858_v27 }
0x1042   : > { %v5254_v38 = vpop.f32.mrf.mxu1 }
0x1044   : > { %v5255_v39 = vpop.f32.mrf.mxu1 }
0x1045   : > { %v5256_v59 = vadd.f32 %v5255_v39, %v5254_v38  ;;  %v5855_v38 = vld [vmem:[#allocation2 + $0xc0] ss:$12 sps:$4 sm:$0xff]   ;;  %v5860_v39 = vld [vmem:[#allocation2 + $0xc8] ss:$12 sps:$4 sm:$0xff]  }
0x1046   : > { %v5257_v60 = vpop.f32.mrf.mxu1 }
0x1047   : > { %v2662_v45 = vadd.f32 %v5256_v59, %v5047_v58 }
0x1048   : > { %v5258_v62 = vpop.f32.mrf.mxu1 }
0x1049   : > { %v5259_v33 = vadd.f32 %v5258_v62, %v5257_v60  ;;  %v2676_v35 = vadd.f32 %v2662_v45, %v6764_v4  ;;  %v5829_v4 = vld [vmem:[#allocation2 + $0x168] ss:$12 sps:$4 sm:$0xff]  }
0x104a   : > { %v5260_v49 = vpop.f32.mrf.mxu1  ;;  %2928 = vmatpush1.bf16.msra.mxu0 %v5829_v4  ;;  %v5065_v4 = vld [vmem:[%s7191_s15] ss:$0 sm:$0xff] }
0x104b   : > { %v2665_v3 = vadd.f32 %v5259_v33, %v5047_v58  ;;  %2682 = vadd.xlane.f32.xlu0 %v2676_v35  ;;  %2929 = vmatprep.subr.bf16.mxu0 %v5834_v8 }
0x104c   : > { %v5261_v1 = vpop.f32.mrf.mxu1 }
0x104d   : > { %v5262_v48 = vadd.f32 %v5261_v1, %v5260_v49  ;;  %v2677_v51 = vadd.f32 %v2665_v3, %v6766_v5 }
0x104e   : > { %v5263_v50 = vpop.f32.mrf.mxu1  ;;  %2930 = vmatpush1.bf16.msra.mxu0 %v5832_v22 }
0x104f   : > { %v2670_v9 = vadd.f32 %v5262_v48, %v5047_v58  ;;  %2684 = vadd.xlane.f32.xlu1 %v2677_v51  ;;  %2931 = vmatprep.subr.bf16.mxu0 %v5837_v29 }
0x1050   : > { %v5264_v43 = vpop.f32.mrf.mxu1 }
0x1051   : > { %v5265_v7 = vadd.f32 %v5264_v43, %v5263_v50  ;;  %v2678_v11 = vadd.f32 %v2670_v9, %v6773_v10 }
0x1052   : > { %2932 = vmatpush1.bf16.msra.mxu0 %v5835_v34 }
0x1053   : > { %v2673_v44 = vadd.f32 %v5265_v7, %v5047_v58  ;;  %2686 = vadd.xlane.f32.xlu0 %v2678_v11  ;;  %2933 = vmatprep.subr.bf16.mxu0 %v5841_v30  ;;  %v5859_v58 = vld [vmem:[#allocation2 + $0xe0] ss:$12 sps:$4 sm:$0xff]  }
0x1054   : > { %5518 = vmatprep.subr.bf16.mxu1 %v5859_v58  ;;  %v5064_v7 = vld [vmem:[%s7190_s14] ss:$0 sm:$0xff] }
0x1055   : > { %v2679_v61 = vadd.f32 %v2673_v44, %v6775_v41  ;;  %5519 = vmatpush3.bf16.msra.mxu1 %v5859_v58 }
0x1056   : > { %2934 = vmatpush1.bf16.msra.mxu0 %v5839_v42  ;;  %5520 = vmatprep.subr.bf16.mxu1 %v5860_v39 }
0x1057   : > { %2688 = vadd.xlane.f32.xlu1 %v2679_v61  ;;  %2935 = vmatprep.subr.bf16.mxu0 %v5845_v20 }
0x1059   : > { %5521 = vmatpush3.bf16.msra.mxu1 %v5860_v39 }
0x105a   : > { %2936 = vmatpush1.bf16.msra.mxu0 %v5843_v21  ;;  %5526 = vmatprep.subr.bf16.mxu1 %v6258_v54 }
0x105b   : > { %2937 = vmatprep.subr.bf16.mxu0 %v5849_v36 }
0x105e   : > { %2938 = vmatpush1.bf16.msra.mxu0 %v5847_v52 }
0x105f   : > { %2939 = vmatprep.subr.bf16.mxu0 %v5853_v37 }
0x1062   : > { %2940 = vmatpush1.bf16.msra.mxu0 %v5851_v25 }
0x1063   : > { %2941 = vmatprep.subr.bf16.mxu0 %v5857_v55 }
0x1066   : > { %2942 = vmatpush1.bf16.msra.mxu0 %v5855_v38 }
0x1067   : > { %5532 = vmatprep.subr.bf16.mxu0 %v6258_v54 }
0x10d4   : > { %v2683_v0 = vpop.xlane.xlu0 %2682 }
0x10d5   : > { %v2690_v12 = vmul.f32 0.0078125, %v2683_v0 }
0x10d7   : > { %v6792_v13 = vsub.f32 %v2676_v35, %v2690_v12 }
0x10d8   : > { %v2685_v5 = vpop.xlane.xlu1 %2684 }
0x10d9   : > { %v2691_v24 = vmul.f32 0.0078125, %v2685_v5  ;;  %v2698_v31 = vmul.f32 %v6792_v13, %v6792_v13 }
0x10db   : > { %v6796_v14 = vsub.f32 %v2677_v51, %v2691_v24  ;;  %2702 = vadd.xlane.f32.xlu0 %v2698_v31 }
0x10dc   : > { %v2687_v10 = vpop.xlane.xlu0 %2686 }
0x10dd   : > { %v2692_v15 = vmul.f32 0.0078125, %v2687_v10  ;;  %v2699_v41 = vmul.f32 %v6796_v14, %v6796_v14 }
0x10df   : > { %v6800_v16 = vsub.f32 %v2678_v11, %v2692_v15  ;;  %2704 = vadd.xlane.f32.xlu1 %v2699_v41 }
0x10e0   : > { %v2689_v17 = vpop.xlane.xlu1 %2688 }
0x10e1   : > { %v2693_v18 = vmul.f32 0.0078125, %v2689_v17  ;;  %v2700_v19 = vmul.f32 %v6800_v16, %v6800_v16 }
0x10e3   : > { %v6804_v26 = vsub.f32 %v2679_v61, %v2693_v18  ;;  %2706 = vadd.xlane.f32.xlu0 %v2700_v19  ;;  %v5066_v19 = vld [vmem:[%s7181_s5 + $0x3] sm:$0x7] }
0x10e4   : > { %v2787_v42 = vrot.slane %v5066_v19, %v6512_v2  ;;  %v2795_v25 = vrot.slane %v5066_v19, %v716_v6 }
0x10e5   : > { %v2701_v28 = vmul.f32 %v6804_v26, %v6804_v26 }
0x10e7   : > { %2708 = vadd.xlane.f32.xlu1 %v2701_v28  ;;  %v2791_v28 = vrot.slane %v5066_v19, %v6505_v57 }
0x1164   : > { %v2703_v59 = vpop.xlane.xlu0 %2702 }
0x1165   : > { %v2710_v60 = vmul.f32 0.0078125, %v2703_v59 }
0x1167   : > { %v2714_v45 = vadd.f32 1e-05, %v2710_v60 }
0x1168   : > { %v2705_v62 = vpop.xlane.xlu1 %2704 }
0x1169   : > { %5981 = vrsqrt.f32 %v2714_v45  ;;  %v2711_v33 = vmul.f32 0.0078125, %v2705_v62 }
0x116b   : > { %v2715_v35 = vadd.f32 1e-05, %v2711_v33 }
0x116c   : > { %v2707_v49 = vpop.xlane.xlu0 %2706 }
0x116d   : > { %5983 = vrsqrt.f32 %v2715_v35  ;;  %v2712_v3 = vmul.f32 0.0078125, %v2707_v49 }
0x116f   : > { %v2716_v1 = vadd.f32 1e-05, %v2712_v3 }
0x1170   : > { %v2709_v48 = vpop.xlane.xlu1 %2708 }
0x1171   : > { %5985 = vrsqrt.f32 %v2716_v1  ;;  %v2713_v51 = vmul.f32 0.0078125, %v2709_v48 }
0x1173   : > { %v2717_v50 = vadd.f32 1e-05, %v2713_v51 }
0x1175   : > { %5987 = vrsqrt.f32 %v2717_v50 }
0x1176   : > { %v5982_v9 = vpop.eup %5981 }
0x1177   : > { %v2722_v43 = vmul.f32 %v5982_v9, %v6792_v13 }
0x1179   : > { %v2732_v61 = vmul.f32 %v5064_v7, %v2722_v43 }
0x117a   : > { %v5984_v11 = vpop.eup %5983 }
0x117b   : > { %v2723_v44 = vmul.f32 %v5984_v11, %v6796_v14  ;;  %v6818_v12 = vadd.f32 %v5065_v4, %v2732_v61 }
0x117d   : > { %v2733_v63 = vmul.f32 %v5064_v7, %v2723_v44 }
0x117e   : > { %v5986_v0 = vpop.eup %5985 }
0x117f   : > { %v6820_v5 = vadd.f32 %v5065_v4, %v2733_v63  ;;  %v2724_v13 = vmul.f32 %v5986_v0, %v6800_v16 }
0x1181   : > { %v2746_v24 = vpack.c.bf16 %v6820_v5, %v6818_v12  ;;  %v2734_v10 = vmul.f32 %v5064_v7, %v2724_v13 }
0x1182   : > { %v5988_v31 = vpop.eup %5987 }
0x1183   : > { %2960 = vmatmul.mubr.bf16.vlgmr.msra.gmra.mxu0 %v2746_v24  ;;  %5522 = vmatprep.mubr.bf16.mxu1 %v2746_v24  ;;  %v2725_v14 = vmul.f32 %v5988_v31, %v6804_v26  ;;  %v6827_v41 = vadd.f32 %v5065_v4, %v2734_v10 }
0x1184   : > { %2969 = vmatprep.mubr.bf16.mxu0 %v6257_v32 }
0x1185   : > { %v2735_v15 = vmul.f32 %v5064_v7, %v2725_v14 }
0x1187   : > { %v6829_v17 = vadd.f32 %v5065_v4, %v2735_v15 }
0x1189   : > { %v2747_v18 = vpack.c.bf16 %v6829_v17, %v6827_v41 }
0x118b   : > { %2970 = vmatmul.mubr.bf16.gmra.mxu0 %v2747_v18  ;;  %5523 = vmatmul.mubr.bf16.vlgmr.msra.gmra.mxu1 %v2747_v18 }
0x118c   : > { %5528 = vmatprep.mubr.msk.bf16.mxu1 %vm6259_vm2, %v6258_v54  ;;  %5534 = vmatprep.mubr.msk.bf16.mxu0 %vm6259_vm2, %v6258_v54 }
0x1243   : > { %v2961_v16 = vpop.f32.mrf.mxu0 }
0x1244   : > { %v2962_v37 = vadd.f32 %v2961_v16, %v2787_v42 }
0x1245   : > { %v2963_v26 = vpop.f32.mrf.mxu0 }
0x1246   : > { %v2964_v29 = vadd.f32 %v2963_v26, %v2791_v28 }
0x1247   : > { %v2965_v8 = vpop.f32.mrf.mxu0 }
0x1248   : > { %v2966_v52 = vadd.f32 %v2965_v8, %v2787_v42 }
0x1249   : > { %v2967_v22 = vpop.f32.mrf.mxu0 }
0x124a   : > { %v2968_v23 = vadd.f32 %v2967_v22, %v2791_v28  ;;  %v6849_v59 = vpack.c.bf16 %v2966_v52, %v2962_v37 }
0x124b   : > { %v2971_v34 = vpop.f32.mrf.mxu0  ;;  %v5524_v30 = vpop.f32.mrf.mxu1 }
0x124c   : > { %v6841_v40 = vpack.c.bf16 %v2968_v23, %v2964_v29  ;;  %v2972_v33 = vadd.f32 %v2971_v34, %v2787_v42  ;;  %v3023_v35 = vadd.f32 %v5524_v30, %v2795_v25 }
0x124d   : > { %v2973_v20 = vpop.f32.mrf.mxu0  ;;  %v3014_v46 = vpop.f32.mrf.mxu1 }
0x124e   : > { %v3056_v21 = vsel %vm973_vm3, %v6841_v40, 0  ;;  %v2974_v27 = vadd.f32 %v2973_v20, %v2791_v28  ;;  %v3015_v38 = vadd.f32 %v3014_v46, %v2795_v25 }
0x124f   : > { %v2975_v36 = vpop.f32.mrf.mxu0  ;;  %v5525_v47 = vpop.f32.mrf.mxu1  ;;  %5527 = vmatpush3.bf16.xpose.msra.mxu1 %v3056_v21 }
0x1250   : > { %5538 = vmatprep.subr.bf16.mxu1 %v6258_v54  ;;  %v2976_v6 = vadd.f32 %v2975_v36, %v2787_v42  ;;  %v3026_v62 = vadd.f32 %v5525_v47, %v2795_v25 }
0x1251   : > { %v2977_v53 = vpop.f32.mrf.mxu0  ;;  %v3017_v55 = vpop.f32.mrf.mxu1 }
0x1252   : > { %v2978_v58 = vadd.f32 %v2977_v53, %v2791_v28  ;;  %v3018_v39 = vadd.f32 %v3017_v55, %v2795_v25  ;;  %v6864_v49 = vpack.c.bf16 %v2976_v6, %v2972_v33  ;;  %v6866_v3 = vpack.c.bf16 %v3026_v62, %v3023_v35 }
0x1254   : > { %v6851_v60 = vpack.c.bf16 %v2978_v58, %v2974_v27  ;;  %v6853_v45 = vpack.c.bf16 %v3018_v39, %v3015_v38 }
0x1256   : > { %5529 = vmatmul.mubr.msk.bf16.vlgmr.msra.gmra.mxu1 %vm973_vm3, %v6849_v59  ;;  %v3103_v56 = vsel %vm973_vm3, %v6851_v60, 0 }
0x1257   : > { %5533 = vmatpush3.bf16.xpose.msra.mxu0 %v3103_v56  ;;  %5539 = vmatpush3.bf16.msra.mxu1 %v6853_v45 }
0x1258   : > { %5544 = vmatprep.subr.bf16.mxu0 %v6258_v54  ;;  %5540 = vmatprep.mubr.msk.bf16.mxu1 %vm6259_vm2, %v6258_v54 }
0x1259   : > { %5550 = vmatprep.subr.bf16.mxu1 %v6258_v54 }
0x125e   : > { %5535 = vmatmul.mubr.msk.bf16.vlgmr.msra.gmra.mxu0 %vm973_vm3, %v6864_v49 }
0x125f   : > { %5545 = vmatpush3.bf16.msra.mxu0 %v6866_v3  ;;  %5546 = vmatprep.mubr.msk.bf16.mxu0 %vm6259_vm2, %v6258_v54 }
0x1260   : > { %5556 = vmatprep.subr.bf16.mxu0 %v6258_v54 }
0x1316   : > { %v3092_v1 = vpop.f32.mrf.mxu1 }
0x1317   : > { %v3146_v48 = vmul.f32 0.17677669, %v3092_v1 }
0x1318   : > { %v5530_v51 = vpop.f32.mrf.mxu1 }
0x1319   : > { %v3150_v50 = vsel %vm1072_vm4, %v3146_v48, -inf }
0x131a   : > { %3151 = vmax.xlane.f32.xlu0 %v3150_v50  ;;  %v3095_v9 = vpop.f32.mrf.mxu1 }
0x131b   : > { %v3147_v43 = vmul.f32 0.17677669, %v3095_v9 }
0x131c   : > { %v5531_v7 = vpop.f32.mrf.mxu1 }
0x131d   : > { %v3153_v11 = vsel %vm1072_vm4, %v3147_v43, -inf }
0x131e   : > { %3154 = vmax.xlane.f32.xlu1 %v3153_v11  ;;  %v3139_v44 = vpop.f32.mrf.mxu0 }
0x131f   : > { %v3148_v61 = vmul.f32 0.17677669, %v3139_v44 }
0x1320   : > { %v5536_v4 = vpop.f32.mrf.mxu0 }
0x1321   : > { %v3156_v63 = vsel %vm1072_vm4, %v3148_v61, -inf }
0x1322   : > { %3157 = vmax.xlane.f32.xlu0 %v3156_v63  ;;  %v3142_v0 = vpop.f32.mrf.mxu0 }
0x1323   : > { %v3149_v13 = vmul.f32 0.17677669, %v3142_v0 }
0x1324   : > { %v5537_v24 = vpop.f32.mrf.mxu0 }
0x1325   : > { %v3159_v31 = vsel %vm1072_vm4, %v3149_v13, -inf }
0x1326   : > { %3160 = vmax.xlane.f32.xlu1 %v3159_v31 }
0x13a3   : > { %v3152_v14 = vpop.xlane.xlu0 %3151 }
0x13a4   : > { %v3162_v10 = vsub.f32 %v3146_v48, %v3152_v14 }
0x13a6   : > { %v3166_v15 = vmul.f32 1.442695, %v3162_v10 }
0x13a7   : > { %v3155_v18 = vpop.xlane.xlu1 %3154 }
0x13a8   : > { %5989 = vpow2.f32 %v3166_v15  ;;  %v3163_v16 = vsub.f32 %v3147_v43, %v3155_v18 }
0x13aa   : > { %v3168_v19 = vmul.f32 1.442695, %v3163_v16 }
0x13ab   : > { %v3158_v26 = vpop.xlane.xlu0 %3157 }
0x13ac   : > { %5991 = vpow2.f32 %v3168_v19  ;;  %v3164_v28 = vsub.f32 %v3148_v61, %v3158_v26 }
0x13ae   : > { %v3170_v8 = vmul.f32 1.442695, %v3164_v28 }
0x13af   : > { %v3161_v20 = vpop.xlane.xlu1 %3160 }
0x13b0   : > { %5993 = vpow2.f32 %v3170_v8  ;;  %v3165_v46 = vsub.f32 %v3149_v13, %v3161_v20 }
0x13b2   : > { %v3172_v21 = vmul.f32 1.442695, %v3165_v46 }
0x13b4   : > { %5995 = vpow2.f32 %v3172_v21 }
0x13b5   : > { %v5990_v22 = vpop.eup %5989 }
0x13b6   : > { %v3174_v29 = vsel %vm1072_vm4, %v5990_v22, 0.0 }
0x13b7   : > { %3175 = vadd.xlane.f32.xlu0 %v3174_v29 }
0x13b9   : > { %v5992_v23 = vpop.eup %5991 }
0x13ba   : > { %v3177_v34 = vsel %vm1072_vm4, %v5992_v23, 0.0 }
0x13bb   : > { %3178 = vadd.xlane.f32.xlu1 %v3177_v34 }
0x13bd   : > { %v5994_v30 = vpop.eup %5993 }
0x13be   : > { %v3180_v42 = vsel %vm1072_vm4, %v5994_v30, 0.0 }
0x13bf   : > { %3181 = vadd.xlane.f32.xlu0 %v3180_v42 }
0x13c1   : > { %v5996_v36 = vpop.eup %5995 }
0x13c2   : > { %v3183_v47 = vsel %vm1072_vm4, %v5996_v36, 0.0 }
0x13cc   : > { %3343 = vrot.lane.b32.xlu1 %v6851_v60, %s6260_s28 }
0x13d5   : > { %3290 = vrot.lane.b32.xlu0 %v6841_v40, %s6260_s28 }
0x13f0   : > { %3184 = vadd.xlane.f32.xlu1 %v3183_v47 }
0x1401   : > { %3287 = vrot.lane.b32.xlu1 %v6849_v59, %s6260_s28 }
0x1405   : > { %3340 = vrot.lane.b32.xlu1 %v6864_v49, %s6260_s28 }
0x1440   : > { %v3176_v52 = vpop.xlane.xlu0 %3175 }
0x1441   : > { %5997 = vrcp.f32 %v3176_v52 }
0x1444   : > { %v3179_v25 = vpop.xlane.xlu1 %3178 }
0x1445   : > { %5999 = vrcp.f32 %v3179_v25 }
0x1448   : > { %v3182_v37 = vpop.xlane.xlu0 %3181  ;;  %v3344_v6 = vpop.permute.xlu1 %3343 }
0x1449   : > { %6001 = vrcp.f32 %v3182_v37  ;;  %v3349_v9 = vsel %vm973_vm3, %v3344_v6, 0 }
0x144c   : > { %v3291_v58 = vpop.permute.xlu0 %3290 }
0x144d   : > { %v3296_v56 = vsel %vm973_vm3, %v3291_v58, 0 }
0x144e   : > { %v5998_v53 = vpop.eup %5997 }
0x144f   : > { %v3190_v27 = vmul.f32 %v5998_v53, %v5990_v22 }
0x1452   : > { %v6000_v55 = vpop.eup %5999 }
0x1453   : > { %v3191_v38 = vmul.f32 %v6000_v55, %v5992_v23 }
0x1455   : > { %v3194_v39 = vpack.c.bf16 %v3191_v38, %v3190_v27 }
0x1456   : > { %v6002_v35 = vpop.eup %6001 }
0x1457   : > { %5541 = vmatmul.mubr.msk.bf16.vlgmr.msra.gmra.mxu1 %vm1072_vm4, %v3194_v39  ;;  %v3192_v48 = vmul.f32 %v6002_v35, %v5994_v30 }
0x1458   : > { %5551 = vmatpush3.bf16.xpose.msra.mxu1 %v3296_v56  ;;  %5552 = vmatprep.mubr.msk.bf16.mxu1 %vm6259_vm2, %v6258_v54 }
0x1459   : > { %5562 = vmatprep.subr.bf16.mxu1 %v6258_v54 }
0x1479   : > { %v3185_v62 = vpop.xlane.xlu1 %3184 }
0x147a   : > { %6003 = vrcp.f32 %v3185_v62 }
0x147d   : > { %v3288_v33 = vpop.permute.xlu1 %3287 }
0x147e   : > { %5553 = vmatmul.mubr.msk.bf16.vlgmr.msra.gmra.mxu1 %vm973_vm3, %v3288_v33 }
0x147f   : > { %5564 = vmatprep.mubr.msk.bf16.mxu1 %vm6259_vm2, %v6258_v54 }
0x1481   : > { %v3341_v43 = vpop.permute.xlu1 %3340 }
0x1487   : > { %v6004_v1 = vpop.eup %6003 }
0x1488   : > { %v3193_v51 = vmul.f32 %v6004_v1, %v5996_v36 }
0x148a   : > { %v3195_v50 = vpack.c.bf16 %v3193_v51, %v3192_v48 }
0x148c   : > { %5547 = vmatmul.mubr.msk.bf16.vlgmr.msra.gmra.mxu0 %vm1072_vm4, %v3195_v50 }
0x148d   : > { %5557 = vmatpush3.bf16.xpose.msra.mxu0 %v3349_v9  ;;  %5558 = vmatprep.mubr.msk.bf16.mxu0 %vm6259_vm2, %v6258_v54 }
0x148e   : > { %5568 = vmatprep.subr.bf16.mxu0 %v6258_v54 }
0x1494   : > { %5559 = vmatmul.mubr.msk.bf16.vlgmr.msra.gmra.mxu0 %vm973_vm3, %v3341_v43 }
0x1495   : > { %5570 = vmatprep.mubr.msk.bf16.mxu0 %vm6259_vm2, %v6258_v54 }
0x1517   : > { %v6906_v7 = vpop.f32.mrf.mxu1 }
0x1519   : > { %v5542_v11 = vpop.f32.mrf.mxu1 }
0x151b   : > { %v6908_v44 = vpop.f32.mrf.mxu1 }
0x151c   : > { %v3284_v61 = vpack.c.bf16 %v6908_v44, %v6906_v7  ;;  %v5863_v44 = vld [vmem:[#allocation5 + $0x58] sm:$0xff]  }
0x151d   : > { %v5543_v4 = vpop.f32.mrf.mxu1 }
0x153e   : > { %v3332_v63 = vpop.f32.mrf.mxu1 }
0x153f   : > { %v3392_v0 = vmul.f32 0.17677669, %v3332_v63 }
0x1540   : > { %v5554_v13 = vpop.f32.mrf.mxu1 }
0x1541   : > { %v3396_v24 = vsel %vm1072_vm4, %v3392_v0, -inf }
0x1542   : > { %3397 = vmax.xlane.f32.xlu0 %v3396_v24  ;;  %v3335_v31 = vpop.f32.mrf.mxu1 }
0x1543   : > { %v3393_v14 = vmul.f32 0.17677669, %v3335_v31  ;;  %v5861_v31 = vld [vmem:[#allocation5 + $0x48] sm:$0xff]  }
0x1544   : > { %v5555_v10 = vpop.f32.mrf.mxu1 }
0x1545   : > { %v3399_v15 = vsel %vm1072_vm4, %v3393_v14, -inf }
0x1546   : > { %3400 = vmax.xlane.f32.xlu1 %v3399_v15 }
0x154c   : > { %v6914_v18 = vpop.f32.mrf.mxu0 }
0x154e   : > { %v5548_v16 = vpop.f32.mrf.mxu0 }
0x1550   : > { %v6916_v19 = vpop.f32.mrf.mxu0 }
0x1551   : > { %v3285_v26 = vpack.c.bf16 %v6916_v19, %v6914_v18 }
0x1552   : > { %v5549_v28 = vpop.f32.mrf.mxu0 }
0x1554   : > { %v3385_v8 = vpop.f32.mrf.mxu0 }
0x1555   : > { %v3394_v22 = vmul.f32 0.17677669, %v3385_v8 }
0x1556   : > { %v5560_v29 = vpop.f32.mrf.mxu0 }
0x1557   : > { %v3402_v23 = vsel %vm1072_vm4, %v3394_v22, -inf }
0x1558   : > { %3403 = vmax.xlane.f32.xlu0 %v3402_v23  ;;  %v3388_v34 = vpop.f32.mrf.mxu0 }
0x1559   : > { %v3395_v30 = vmul.f32 0.17677669, %v3388_v34 }
0x155a   : > { %v5561_v42 = vpop.f32.mrf.mxu0 }
0x155b   : > { %v3405_v20 = vsel %vm1072_vm4, %v3395_v30, -inf }
0x155c   : > { %3406 = vmax.xlane.f32.xlu0 %v3405_v20 }
0x15cb   : > { %v3398_v46 = vpop.xlane.xlu0 %3397 }
0x15cc   : > { %v3408_v21 = vsub.f32 %v3392_v0, %v3398_v46 }
0x15ce   : > { %v3412_v36 = vmul.f32 1.442695, %v3408_v21 }
0x15cf   : > { %v3401_v47 = vpop.xlane.xlu1 %3400 }
0x15d0   : > { %6005 = vpow2.f32 %v3412_v36  ;;  %v3409_v52 = vsub.f32 %v3393_v14, %v3401_v47 }
0x15d2   : > { %v3414_v25 = vmul.f32 1.442695, %v3409_v52 }
0x15d4   : > { %6007 = vpow2.f32 %v3414_v25 }
0x15dd   : > { %v6006_v37 = vpop.eup %6005 }
0x15de   : > { %v3420_v53 = vsel %vm1072_vm4, %v6006_v37, 0.0 }
0x15df   : > { %3421 = vadd.xlane.f32.xlu0 %v3420_v53 }
0x15e1   : > { %v6008_v55 = vpop.eup %6007  ;;  %v3404_v27 = vpop.xlane.xlu0 %3403 }
0x15e2   : > { %v3410_v38 = vsub.f32 %v3394_v22, %v3404_v27  ;;  %v3423_v58 = vsel %vm1072_vm4, %v6008_v55, 0.0  ;;  %v5862_v22 = vld [vmem:[#allocation5 + $0x40] sm:$0xff]  }
0x15e3   : > { %3424 = vadd.xlane.f32.xlu1 %v3423_v58 }
0x15e4   : > { %v3416_v39 = vmul.f32 1.442695, %v3410_v38 }
0x15e5   : > { %v3407_v56 = vpop.xlane.xlu0 %3406 }
0x15e6   : > { %6009 = vpow2.f32 %v3416_v39  ;;  %v3411_v6 = vsub.f32 %v3395_v30, %v3407_v56 }
0x15e8   : > { %v3418_v62 = vmul.f32 1.442695, %v3411_v6 }
0x15ea   : > { %6011 = vpow2.f32 %v3418_v62 }
0x15f3   : > { %v6010_v33 = vpop.eup %6009 }
0x15f4   : > { %v3426_v35 = vsel %vm1072_vm4, %v6010_v33, 0.0 }
0x15f5   : > { %3427 = vadd.xlane.f32.xlu0 %v3426_v35 }
0x15f7   : > { %v6012_v1 = vpop.eup %6011 }
0x15f8   : > { %v3429_v48 = vsel %vm1072_vm4, %v6012_v1, 0.0 }
0x15f9   : > { %3430 = vadd.xlane.f32.xlu1 %v3429_v48 }
0x160a   : > { %3491 = vrot.lane.b32.xlu1 %v6866_v3, %s6260_s28 }
0x160b   : > { %3443 = vrot.lane.b32.xlu0 %v6853_v45, %s6260_s28  ;;  %s4965_s28 = sshll.u32 %s574_s30, 5 }
0x160c   : > { %s576_s20 = scalar_lea.vmem [#allocation10], %s4965_s28 }
0x160d   : > { %s4850_s18 = sshll.u32 %s576_s20, 4  ;;  %s7132_s18 = int_to_ptr.vmem [resolvable:$true] %s4850_s18 }
0x160e   : > { %3676 = vrot.lane.b32.xlu1 %v6841_v40, %s6261_s17  ;;  %s6173_s28 = scalar_lea.vmem %s7132_s18, 512 }
0x160f   : > { %3674 = vrot.lane.b32.xlu0 %v6849_v59, %s6261_s17  ;;  %p6174_p9 = scmp.ne.s32.totalorder %s7132_s18, %s6173_s28 }
0x1611   : > { %p6175_p12 = pnand %p6174_p9, %p6389_p5 }
0x1612   : > { %3727 = vrot.lane.b32.xlu1 %v6851_v60, %s6261_s17 }
0x1613   : > { %p6176_p13 = pneg %p6175_p12 }
0x1616   : > { %3725 = vrot.lane.b32.xlu1 %v6864_v49, %s6261_s17 }
0x1668   : > { %v3422_v50 = vpop.xlane.xlu0 %3421 }
0x166c   : > { %v3425_v51 = vpop.xlane.xlu1 %3424 }
0x166d   : > { %6013 = vrcp.f32 %v3425_v51 }
0x166e   : > { %6015 = vrcp.f32 %v3422_v50 }
0x167a   : > { %v6014_v9 = vpop.eup %6013 }
0x167b   : > { %v6016_v11 = vpop.eup %6015  ;;  %v3437_v4 = vmul.f32 %v6014_v9, %v6008_v55 }
0x167c   : > { %v3436_v13 = vmul.f32 %v6016_v11, %v6006_v37 }
0x167e   : > { %v3428_v43 = vpop.xlane.xlu0 %3427  ;;  %v3440_v24 = vpack.c.bf16 %v3437_v4, %v3436_v13 }
0x167f   : > { %6017 = vrcp.f32 %v3428_v43 }
0x1682   : > { %v3431_v63 = vpop.xlane.xlu1 %3430  ;;  %v3444_v0 = vpop.permute.xlu0 %3443 }
0x1683   : > { %6019 = vrcp.f32 %v3431_v63  ;;  %5563 = vmatpush3.bf16.msra.mxu1 %v3444_v0 }
0x1684   : > { %5574 = vmatprep.subr.bf16.mxu1 %v5863_v44 }
0x1686   : > { %v3492_v14 = vpop.permute.xlu1 %3491  ;;  %5565 = vmatmul.mubr.msk.bf16.vlgmr.msra.gmra.mxu1 %vm1072_vm4, %v3440_v24  ;;  %v3675_v55 = vpop.permute.xlu0 %3674 }
0x1687   : > { %5569 = vmatpush3.bf16.msra.mxu0 %v3492_v14  ;;  %5575 = vmatpush3.bf16.msra.mxu1 %v5863_v44 }
0x1688   : > { %5582 = vmatprep.subr.bf16.mxu0 %v5861_v31 }
0x168a   : > { %v3677_v29 = vpop.permute.xlu1 %3676 }
0x168b   : > { %v3682_v52 = vsel %vm973_vm3, %v3677_v29, 0 }
0x168c   : > { %v6018_v10 = vpop.eup %6017 }
0x168d   : > { %v3438_v16 = vmul.f32 %v6018_v10, %v6010_v33 }
0x168e   : > { %v3728_v23 = vpop.permute.xlu1 %3727 }
0x168f   : > { %v3733_v34 = vsel %vm973_vm3, %v3728_v23, 0 }
0x1690   : > { %v6020_v15 = vpop.eup %6019 }
0x1691   : > { %v3439_v28 = vmul.f32 %v6020_v15, %v6012_v1 }
0x1692   : > { %v3726_v7 = vpop.permute.xlu1 %3725 }
0x1693   : > { %v3441_v8 = vpack.c.bf16 %v3439_v28, %v3438_v16 }
0x1695   : > { %5571 = vmatmul.mubr.msk.bf16.vlgmr.msra.gmra.mxu0 %vm1072_vm4, %v3441_v8 }
0x1696   : > { %5583 = vmatpush3.bf16.msra.mxu0 %v5861_v31  ;;  %5586 = vmatprep.mubr.msk.bf16.mxu0 %vm973_vm3, %v3284_v61  ;;  %v5864_v61 = vld [vmem:[#allocation5 + $0x50] sm:$0xff]  }
0x1697   : > { %5584 = vmatprep.subr.bf16.mxu0 %v5862_v22  ;;  %5576 = vmatprep.subr.bf16.mxu1 %v5864_v61 }
0x1698   : > { %5577 = vmatpush3.bf16.msra.mxu1 %v5864_v61 }
0x1699   : > { %5590 = vmatprep.subr.bf16.mxu1 %v6258_v54 }
0x169a   : > { %5585 = vmatpush3.bf16.msra.mxu0 %v5862_v22 }
0x169b   : > { %5596 = vmatprep.subr.bf16.mxu0 %v6258_v54 }
0x169d   : > { %5587 = vmatmul.mubr.msk.bf16.vlgmr.msra.gmra.mxu0 %vm973_vm3, %v3285_v26 }
0x169e   : > { %5597 = vmatpush3.bf16.xpose.msra.mxu0 %v3733_v34  ;;  %5598 = vmatprep.mubr.msk.bf16.mxu0 %vm6259_vm2, %v6258_v54 }
0x169f   : > { %5608 = vmatprep.subr.bf16.mxu0 %v6258_v54 }
0x16a5   : > { %5599 = vmatmul.mubr.msk.bf16.vlgmr.msra.gmra.mxu0 %vm973_vm3, %v3726_v7 }
0x16a6   : > { %5610 = vmatprep.mubr.msk.bf16.mxu0 %vm6259_vm2, %v6258_v54 }
0x1746   : > { %v3483_v18 = vpop.f32.mrf.mxu1 }
0x1748   : > { %v5566_v19 = vpop.f32.mrf.mxu1 }
0x174a   : > { %v3486_v26 = vpop.f32.mrf.mxu1 }
0x174b   : > { %v3538_v30 = vpack.c.bf16 %v3486_v26, %v3483_v18 }
0x174c   : > { %v5567_v42 = vpop.f32.mrf.mxu1 }
0x174d   : > { %5578 = vmatprep.mubr.msk.bf16.mxu1 %vm973_vm3, %v3538_v30 }
0x1755   : > { %v3531_v20 = vpop.f32.mrf.mxu0 }
0x1757   : > { %v5572_v46 = vpop.f32.mrf.mxu0 }
0x1759   : > { %v3534_v21 = vpop.f32.mrf.mxu0 }
0x175a   : > { %v3539_v36 = vpack.c.bf16 %v3534_v21, %v3531_v20 }
0x175b   : > { %v5573_v47 = vpop.f32.mrf.mxu0 }
0x175c   : > { %5579 = vmatmul.mubr.msk.bf16.vlgmr.msra.gmra.mxu1 %vm973_vm3, %v3539_v36 }
0x175d   : > { %5591 = vmatpush3.bf16.xpose.msra.mxu1 %v3682_v52  ;;  %v6960_v25 = vpop.f32.mrf.mxu0  ;;  %5592 = vmatprep.mubr.msk.bf16.mxu1 %vm6259_vm2, %v6258_v54 }
0x175e   : > { %5602 = vmatprep.subr.bf16.mxu1 %v6258_v54 }
0x175f   : > { %v6965_v37 = vpop.f32.mrf.mxu0 }
0x1761   : > { %v6967_v53 = vpop.f32.mrf.mxu0 }
0x1763   : > { %v6969_v27 = vpop.f32.mrf.mxu0 }
0x1764   : > { %5593 = vmatmul.mubr.msk.bf16.vlgmr.msra.gmra.mxu1 %vm973_vm3, %v3675_v55 }
0x1765   : > { %v3769_v38 = vpop.f32.mrf.mxu0  ;;  %5604 = vmatprep.mubr.msk.bf16.mxu1 %vm6259_vm2, %v6258_v54 }
0x1766   : > { %v3778_v50 = vmul.f32 0.17677669, %v3769_v38 }
0x1767   : > { %v5600_v58 = vpop.f32.mrf.mxu0 }
0x1768   : > { %v3786_v13 = vsel %vm1072_vm4, %v3778_v50, -inf }
0x1769   : > { %v3772_v39 = vpop.f32.mrf.mxu0 }
0x176a   : > { %v3779_v63 = vmul.f32 0.17677669, %v3772_v39 }
0x176b   : > { %v5601_v56 = vpop.f32.mrf.mxu0 }
0x176c   : > { %v3789_v24 = vsel %vm1072_vm4, %v3779_v63, -inf }
0x181c   : > { %v6974_v6 = vpop.f32.mrf.mxu1 }
0x181e   : > { %v6976_v62 = vpop.f32.mrf.mxu1 }
0x1820   : > { %v6978_v33 = vpop.f32.mrf.mxu1 }
0x1822   : > { %v6980_v35 = vpop.f32.mrf.mxu1 }
0x1824   : > { %v3718_v1 = vpop.f32.mrf.mxu1 }
0x1825   : > { %v3776_v48 = vmul.f32 0.17677669, %v3718_v1 }
0x1826   : > { %v5594_v51 = vpop.f32.mrf.mxu1 }
0x1827   : > { %v3780_v9 = vsel %vm1072_vm4, %v3776_v48, -inf }
0x1828   : > { %3781 = vmax.xlane.f32.xlu0 %v3780_v9  ;;  %v3721_v43 = vpop.f32.mrf.mxu1 }
0x1829   : > { %v3777_v11 = vmul.f32 0.17677669, %v3721_v43  ;;  %v5865_v43 = vld [vmem:[#allocation5 + $0x68] sm:$0xff]  }
0x182a   : > { %v5595_v4 = vpop.f32.mrf.mxu1 }
0x182b   : > { %v3783_v0 = vsel %vm1072_vm4, %v3777_v11, -inf }
0x182c   : > { %3784 = vmax.xlane.f32.xlu1 %v3783_v0  ;;  %3787 = vmax.xlane.f32.xlu0 %v3786_v13 }
0x1830   : > { %3790 = vmax.xlane.f32.xlu0 %v3789_v24 }
0x18b1   : > { %v3782_v31 = vpop.xlane.xlu0 %3781 }
0x18b2   : > { %v3792_v14 = vsub.f32 %v3776_v48, %v3782_v31 }
0x18b4   : > { %v3796_v22 = vmul.f32 1.442695, %v3792_v14 }
0x18b5   : > { %v3785_v10 = vpop.xlane.xlu1 %3784  ;;  %v3788_v15 = vpop.xlane.xlu0 %3787 }
0x18b6   : > { %v3794_v16 = vsub.f32 %v3778_v50, %v3788_v15  ;;  %v3793_v28 = vsub.f32 %v3777_v11, %v3785_v10  ;;  %v5866_v11 = vld [vmem:[#allocation5 + $0x60] sm:$0xff]  }
0x18b8   : > { %v3800_v8 = vmul.f32 1.442695, %v3794_v16  ;;  %v3798_v34 = vmul.f32 1.442695, %v3793_v28 }
0x18b9   : > { %v3791_v29 = vpop.xlane.xlu0 %3790 }
0x18ba   : > { %v3795_v23 = vsub.f32 %v3779_v63, %v3791_v29  ;;  %6021 = vpow2.f32 %v3800_v8 }
0x18bb   : > { %6023 = vpow2.f32 %v3796_v22 }
0x18bc   : > { %v3802_v7 = vmul.f32 1.442695, %v3795_v23 }
0x18be   : > { %6025 = vpow2.f32 %v3802_v7 }
0x18bf   : > { %6027 = vpow2.f32 %v3798_v34 }
0x18c7   : > { %v6022_v44 = vpop.eup %6021 }
0x18c8   : > { %v3810_v61 = vsel %vm1072_vm4, %v6022_v44, 0.0  ;;  %v6024_v18 = vpop.eup %6023 }
0x18c9   : > { %3811 = vadd.xlane.f32.xlu0 %v3810_v61  ;;  %v3804_v42 = vsel %vm1072_vm4, %v6024_v18, 0.0 }
0x18cb   : > { %v6026_v19 = vpop.eup %6025 }
0x18cc   : > { %v3813_v26 = vsel %vm1072_vm4, %v6026_v19, 0.0  ;;  %v6028_v30 = vpop.eup %6027 }
0x18cd   : > { %3814 = vadd.xlane.f32.xlu1 %v3813_v26  ;;  %3805 = vadd.xlane.f32.xlu0 %v3804_v42  ;;  %v3807_v20 = vsel %vm1072_vm4, %v6028_v30, 0.0 }
0x18d1   : > { %3808 = vadd.xlane.f32.xlu1 %v3807_v20 }
0x18e2   : > { %3873 = vrot.lane.b32.xlu1 %v6866_v3, %s6261_s17 }
0x18e3   : > { %3826 = vrot.lane.b32.xlu0 %v6853_v45, %s6261_s17  ;;  %s6177_s17 = sshll.u32 %s6263_s25, 4  ;;  %s6178_s17 = int_to_ptr.vmem [resolvable:$false] %s6177_s17 }
0x18e4   : > { %p6180_p4 = scmp.lt.s32.totalorder %s7132_s18, %s6178_s17 }
0x18e6   : > { %3995 = vrot.lane.b32.xlu1 %v6841_v40, %s6262_s16 }
0x18e7   : > { %3993 = vrot.lane.b32.xlu0 %v6849_v59, %s6262_s16 }
0x18ea   : > { %4046 = vrot.lane.b32.xlu1 %v6851_v60, %s6262_s16 }
0x18ee   : > { %4044 = vrot.lane.b32.xlu1 %v6864_v49, %s6262_s16 }
0x1952   : > { %v3812_v46 = vpop.xlane.xlu0 %3811 }
0x1953   : > { %6029 = vrcp.f32 %v3812_v46 }
0x1956   : > { %v3815_v21 = vpop.xlane.xlu1 %3814  ;;  %v3806_v36 = vpop.xlane.xlu0 %3805 }
0x1957   : > { %6031 = vrcp.f32 %v3815_v21 }
0x1958   : > { %6033 = vrcp.f32 %v3806_v36 }
0x195a   : > { %v3809_v47 = vpop.xlane.xlu1 %3808  ;;  %v3827_v52 = vpop.permute.xlu0 %3826 }
0x195b   : > { %6035 = vrcp.f32 %v3809_v47  ;;  %5603 = vmatpush3.bf16.msra.mxu1 %v3827_v52  ;;  %v3668_v47 = vadd.f32 %v6960_v25, %v6974_v6 }
0x195c   : > { %5614 = vmatprep.subr.bf16.mxu1 %v5865_v43 }
0x195e   : > { %v3874_v40 = vpop.permute.xlu1 %3873  ;;  %v3994_v9 = vpop.permute.xlu0 %3993 }
0x195f   : > { %5609 = vmatpush3.bf16.msra.mxu0 %v3874_v40 }
0x1960   : > { %5622 = vmatprep.subr.bf16.mxu0 %v6258_v54  ;;  %v6030_v59 = vpop.eup %6029 }
0x1961   : > { %v3822_v60 = vmul.f32 %v6030_v59, %v6022_v44  ;;  %v3660_v59 = vadd.f32 %v6965_v37, %v6976_v62 }
0x1962   : > { %v3996_v49 = vpop.permute.xlu1 %3995 }
0x1963   : > { %v4001_v1 = vsel %vm973_vm3, %v3996_v49, 0  ;;  %v3663_v49 = vadd.f32 %v6969_v27, %v6980_v35 }
0x1964   : > { %v6032_v55 = vpop.eup %6031 }
0x1965   : > { %v3823_v38 = vmul.f32 %v6032_v55, %v6026_v19  ;;  %v6034_v58 = vpop.eup %6033 }
0x1966   : > { %v3820_v48 = vmul.f32 %v6034_v58, %v6024_v18  ;;  %v4047_v15 = vpop.permute.xlu1 %4046 }
0x1967   : > { %v3825_v39 = vpack.c.bf16 %v3823_v38, %v3822_v60  ;;  %v4052_v34 = vsel %vm973_vm3, %v4047_v15, 0  ;;  %v3671_v60 = vadd.f32 %v6967_v53, %v6978_v33 }
0x1968   : > { %v6036_v56 = vpop.eup %6035 }
0x1969   : > { %5611 = vmatmul.mubr.msk.bf16.vlgmr.msra.gmra.mxu0 %vm1072_vm4, %v3825_v39  ;;  %v3821_v51 = vmul.f32 %v6036_v56, %v6028_v30 }
0x196a   : > { %5623 = vmatpush3.bf16.xpose.msra.mxu0 %v4001_v1  ;;  %5624 = vmatprep.mubr.msk.bf16.mxu0 %vm6259_vm2, %v6258_v54  ;;  %v4045_v19 = vpop.permute.xlu1 %4044 }
0x196b   : > { %v3824_v50 = vpack.c.bf16 %v3821_v51, %v3820_v48  ;;  %5634 = vmatprep.subr.bf16.mxu0 %v6258_v54 }
0x196d   : > { %5605 = vmatmul.mubr.msk.bf16.vlgmr.msra.gmra.mxu1 %vm1072_vm4, %v3824_v50 }
0x196e   : > { %5615 = vmatpush3.bf16.msra.mxu1 %v5865_v43 }
0x196f   : > { %5616 = vmatprep.subr.bf16.mxu1 %v5866_v11 }
0x1971   : > { %5625 = vmatmul.mubr.msk.bf16.vlgmr.msra.gmra.mxu0 %vm973_vm3, %v3994_v9 }
0x1972   : > { %5636 = vmatprep.mubr.msk.bf16.mxu0 %vm6259_vm2, %v6258_v54  ;;  %5617 = vmatpush3.bf16.msra.mxu1 %v5866_v11 }
0x1973   : > { %5628 = vmatprep.subr.bf16.mxu1 %v6258_v54 }
0x1a29   : > { %v3913_v4 = vpop.f32.mrf.mxu0 }
0x1a2b   : > { %v5612_v63 = vpop.f32.mrf.mxu0 }
0x1a2d   : > { %v3866_v0 = vpop.f32.mrf.mxu1  ;;  %v3916_v13 = vpop.f32.mrf.mxu0 }
0x1a2e   : > { %v3921_v8 = vpack.c.bf16 %v3916_v13, %v3913_v4 }
0x1a2f   : > { %v5606_v24 = vpop.f32.mrf.mxu1  ;;  %v5613_v31 = vpop.f32.mrf.mxu0 }
0x1a31   : > { %v3869_v14 = vpop.f32.mrf.mxu1  ;;  %v4037_v10 = vpop.f32.mrf.mxu0 }
0x1a32   : > { %v3920_v16 = vpack.c.bf16 %v3869_v14, %v3866_v0  ;;  %v4095_v28 = vmul.f32 0.17677669, %v4037_v10 }
0x1a33   : > { %v5607_v22 = vpop.f32.mrf.mxu1  ;;  %v5626_v29 = vpop.f32.mrf.mxu0 }
0x1a34   : > { %5618 = vmatprep.mubr.msk.bf16.mxu1 %vm973_vm3, %v3920_v16  ;;  %v4099_v23 = vsel %vm1072_vm4, %v4095_v28, -inf }
0x1a35   : > { %5619 = vmatmul.mubr.msk.bf16.vlgmr.msra.gmra.mxu1 %vm973_vm3, %v3921_v8  ;;  %4100 = vmax.xlane.f32.xlu0 %v4099_v23  ;;  %v4040_v7 = vpop.f32.mrf.mxu0 }
0x1a36   : > { %5629 = vmatpush3.bf16.xpose.msra.mxu1 %v4052_v34  ;;  %v4096_v44 = vmul.f32 0.17677669, %v4040_v7  ;;  %5630 = vmatprep.mubr.msk.bf16.mxu1 %vm6259_vm2, %v6258_v54 }
0x1a37   : > { %v5627_v61 = vpop.f32.mrf.mxu0  ;;  %5640 = vmatprep.subr.bf16.mxu1 %v6258_v54 }
0x1a38   : > { %v4102_v18 = vsel %vm1072_vm4, %v4096_v44, -inf }
0x1a39   : > { %4103 = vmax.xlane.f32.xlu1 %v4102_v18 }
0x1a3d   : > { %5631 = vmatmul.mubr.msk.bf16.vlgmr.msra.gmra.mxu1 %vm973_vm3, %v4045_v19  ;;  %v5867_v19 = vld [vmem:[#allocation5 + $0x78] sm:$0xff]  }
0x1a3e   : > { %5642 = vmatprep.mubr.msk.bf16.mxu1 %vm6259_vm2, %v6258_v54 }
0x1abe   : > { %v4101_v21 = vpop.xlane.xlu0 %4100 }
0x1abf   : > { %v4111_v36 = vsub.f32 %v4095_v28, %v4101_v21 }
0x1ac1   : > { %v4115_v52 = vmul.f32 1.442695, %v4111_v36 }
0x1ac2   : > { %v4104_v26 = vpop.xlane.xlu1 %4103 }
0x1ac3   : > { %v4112_v30 = vsub.f32 %v4096_v44, %v4104_v26  ;;  %v5868_v26 = vld [vmem:[#allocation5 + $0x70] sm:$0xff]  }
0x1ac5   : > { %v4117_v42 = vmul.f32 1.442695, %v4112_v30 }
0x1ac7   : > { %6037 = vpow2.f32 %v4117_v42 }
0x1ac8   : > { %6039 = vpow2.f32 %v4115_v52 }
0x1ad4   : > { %v6038_v20 = vpop.eup %6037 }
0x1ad5   : > { %v4126_v46 = vsel %vm1072_vm4, %v6038_v20, 0.0  ;;  %v6040_v50 = vpop.eup %6039 }
0x1ad6   : > { %4127 = vadd.xlane.f32.xlu1 %v4126_v46  ;;  %v4123_v27 = vsel %vm1072_vm4, %v6040_v50, 0.0 }
0x1af5   : > { %v5620_v40 = vpop.f32.mrf.mxu1 }
0x1af6   : > { %v7029_v55 = vadd.f32 %v5620_v40, %v3668_v47 }
0x1af7   : > { %v3974_v54 = vpop.f32.mrf.mxu1 }
0x1af8   : > { %v7033_v38 = vadd.f32 %v3974_v54, %v3660_v59 }
0x1af9   : > { %v5621_v58 = vpop.f32.mrf.mxu1 }
0x1afa   : > { %v7037_v39 = vadd.f32 %v5621_v58, %v3671_v60 }
0x1afb   : > { %v3977_v25 = vpop.f32.mrf.mxu1 }
0x1afc   : > { %v7039_v6 = vadd.f32 %v3977_v25, %v3663_v49  ;;  %v5124_v49 = vld [vmem:[%s7183_s7 + $0x1] ss:$0 sm:$0xff] }
0x1afd   : > { %v4088_v56 = vpop.f32.mrf.mxu1 }
0x1afe   : > { %v4097_v37 = vmul.f32 0.17677669, %v4088_v56 }
0x1aff   : > { %v5632_v62 = vpop.f32.mrf.mxu1 }
0x1b00   : > { %v4105_v1 = vsel %vm1072_vm4, %v4097_v37, -inf }
0x1b01   : > { %v4091_v48 = vpop.f32.mrf.mxu1  ;;  %4106 = vmax.xlane.f32.xlu0 %v4105_v1 }
0x1b02   : > { %v4098_v53 = vmul.f32 0.17677669, %v4091_v48 }
0x1b03   : > { %v5633_v33 = vpop.f32.mrf.mxu1 }
0x1b04   : > { %v4108_v51 = vsel %vm1072_vm4, %v4098_v53, -inf }
0x1b05   : > { %4109 = vmax.xlane.f32.xlu0 %v4108_v51 }
0x1b09   : > { %4124 = vadd.xlane.f32.xlu0 %v4123_v27 }
0x1b5f   : > { %v4128_v10 = vpop.xlane.xlu1 %4127 }
0x1b8a   : > { %v4107_v35 = vpop.xlane.xlu0 %4106 }
0x1b8b   : > { %v4113_v9 = vsub.f32 %v4097_v37, %v4107_v35 }
0x1b8d   : > { %v4119_v43 = vmul.f32 1.442695, %v4113_v9  ;;  %v5871_v9 = vld [vmem:[#allocation7 + $0xf4] ss:$8 sps:$4 sm:$0xff]  }
0x1b8e   : > { %v4110_v11 = vpop.xlane.xlu0 %4109 }
0x1b8f   : > { %6041 = vpow2.f32 %v4119_v43  ;;  %v4114_v4 = vsub.f32 %v4098_v53, %v4110_v11 }
0x1b91   : > { %v4121_v63 = vmul.f32 1.442695, %v4114_v4 }
0x1b92   : > { %v4125_v14 = vpop.xlane.xlu0 %4124 }
0x1b93   : > { %6043 = vpow2.f32 %v4121_v63 }
0x1b94   : > { %6045 = vrcp.f32 %v4125_v14 }
0x1b95   : > { %6047 = vrcp.f32 %v4128_v10 }
0x1b9c   : > { %v6042_v0 = vpop.eup %6041 }
0x1b9d   : > { %v4129_v13 = vsel %vm1072_vm4, %v6042_v0, 0.0 }
0x1b9e   : > { %4130 = vadd.xlane.f32.xlu0 %v4129_v13 }
0x1ba0   : > { %v6044_v24 = vpop.eup %6043 }
0x1ba1   : > { %v4132_v31 = vsel %vm1072_vm4, %v6044_v24, 0.0  ;;  %v6046_v15 = vpop.eup %6045 }
0x1ba2   : > { %4133 = vadd.xlane.f32.xlu1 %v4132_v31  ;;  %v6048_v28 = vpop.eup %6047  ;;  %v4139_v8 = vmul.f32 %v6046_v15, %v6040_v50  ;;  %v5874_v15 = vld [vmem:[#allocation7 + $0xe4] ss:$8 sps:$4 sm:$0xff]  }
0x1ba3   : > { %v4140_v23 = vmul.f32 %v6048_v28, %v6038_v20  ;;  %v5877_v28 = vld [vmem:[#allocation7 + $0xd4] ss:$8 sps:$4 sm:$0xff]  }
0x1ba5   : > { %v4143_v34 = vpack.c.bf16 %v4140_v23, %v4139_v8  ;;  %v5875_v8 = vld [vmem:[#allocation7 + $0xd0] ss:$8 sps:$4 sm:$0xff]  }
0x1ba6   : > { %v5881_v23 = vld [vmem:[#allocation7 + $0xb0] ss:$8 sps:$4 sm:$0xff]  }
0x1bb3   : > { %4192 = vrot.lane.b32.xlu1 %v6866_v3, %s6262_s16 }
0x1bb4   : > { %4145 = vrot.lane.b32.xlu0 %v6853_v45, %s6262_s16  ;;  %s6179_s16 = scalar_lea.vmem %s6178_s17, 1024 }
0x1bb5   : > { %p6181_p7 = scmp.lt.s32.totalorder %s6179_s16, %s6173_s28 }
0x1bb7   : > { %p6182_p8 = por %p6181_p7, %p6180_p4 }
0x1bb9   : > { %p6183_p11 = pnand %p6182_p8, %p6176_p13 }
0x1c27   : > { %v4131_v16 = vpop.xlane.xlu0 %4130 }
0x1c28   : > { %6049 = vrcp.f32 %v4131_v16  ;;  %v5872_v16 = vld [vmem:[#allocation7 + $0xe0] ss:$8 sps:$4 sm:$0xff]  }
0x1c2b   : > { %v4146_v22 = vpop.permute.xlu0 %4145  ;;  %v4134_v29 = vpop.xlane.xlu1 %4133 }
0x1c2c   : > { %6051 = vrcp.f32 %v4134_v29  ;;  %5635 = vmatpush3.bf16.msra.mxu0 %v4146_v22  ;;  %v5880_v22 = vld [vmem:[#allocation7 + $0xc4] ss:$8 sps:$4 sm:$0xff]   ;;  %v5878_v29 = vld [vmem:[#allocation7 + $0xc0] ss:$8 sps:$4 sm:$0xff]  }
0x1c2d   : > { %5646 = vmatprep.subr.bf16.mxu0 %v5867_v19 }
0x1c2f   : > { %5637 = vmatmul.mubr.msk.bf16.vlgmr.msra.gmra.mxu0 %vm1072_vm4, %v4143_v34  ;;  %v4193_v3 = vpop.permute.xlu1 %4192  ;;  %v5883_v34 = vld [vmem:[#allocation7 + $0xb4] ss:$8 sps:$4 sm:$0xff]  }
0x1c30   : > { %5641 = vmatpush3.bf16.msra.mxu1 %v4193_v3  ;;  %5647 = vmatpush3.bf16.msra.mxu0 %v5867_v19  ;;  %v5886_v3 = vld [vmem:[#allocation7 + $0xa4] ss:$8 sps:$4 sm:$0xff]   ;;  %v5893_v19 = vld [vmem:[#allocation8 + $0xf8] sm:$0xff]  }
0x1c31   : > { %5648 = vmatprep.subr.bf16.mxu0 %v5868_v26  ;;  %4508 = vmatprep.subr.bf16.mxu1 %v5871_v9 }
0x1c34   : > { %5649 = vmatpush3.bf16.msra.mxu0 %v5868_v26  ;;  %v5894_v26 = vld [vmem:[#allocation8 + $0xb8] sm:$0xff]  }
0x1c35   : > { %v6050_v45 = vpop.eup %6049  ;;  %5324 = vmatprep.subr.bf16.mxu0 %v5893_v19 }
0x1c36   : > { %v4141_v44 = vmul.f32 %v6050_v45, %v6042_v0  ;;  %v5884_v45 = vld [vmem:[#allocation7 + $0xa0] ss:$8 sps:$4 sm:$0xff]  }
0x1c39   : > { %v6052_v7 = vpop.eup %6051 }
0x1c3a   : > { %v4142_v61 = vmul.f32 %v6052_v7, %v6044_v24  ;;  %v5889_v7 = vld [vmem:[#allocation7 + $0x94] ss:$8 sps:$4 sm:$0xff]  }
0x1c3c   : > { %v4144_v18 = vpack.c.bf16 %v4142_v61, %v4141_v44  ;;  %v5887_v44 = vld [vmem:[#allocation7 + $0x90] ss:$8 sps:$4 sm:$0xff]   ;;  %v5892_v61 = vld [vmem:[#allocation7 + $0x84] ss:$8 sps:$4 sm:$0xff]  }
0x1c3e   : > { %5643 = vmatmul.mubr.msk.bf16.vlgmr.msra.gmra.mxu1 %vm1072_vm4, %v4144_v18  ;;  %v5890_v18 = vld [vmem:[#allocation7 + $0x80] ss:$8 sps:$4 sm:$0xff]  }
0x1c3f   : > { %4540 = vmatprep.mubr.bf16.mxu1 %v6257_v32 }
0x1cef   : > { %v4185_v30 = vpop.f32.mrf.mxu0 }
0x1cf1   : > { %v5638_v42 = vpop.f32.mrf.mxu0 }
0x1cf2   : > { %v5896_v42 = vld [vmem:[#allocation8 + $0xb0] sm:$0xff]  }
0x1cf3   : > { %v4188_v20 = vpop.f32.mrf.mxu0 }
0x1cf4   : > { %v4239_v46 = vpack.c.bf16 %v4188_v20, %v4185_v30  ;;  %v5895_v30 = vld [vmem:[#allocation8 + $0xf0] sm:$0xff]   ;;  %v5897_v20 = vld [vmem:[#allocation8 + $0xe8] sm:$0xff]  }
0x1cf5   : > { %v5639_v21 = vpop.f32.mrf.mxu0 }
0x1cf6   : > { %5650 = vmatprep.mubr.msk.bf16.mxu0 %vm973_vm3, %v4239_v46  ;;  %v5898_v46 = vld [vmem:[#allocation8 + $0xa8] sm:$0xff]   ;;  %v5899_v21 = vld [vmem:[#allocation8 + $0xe0] sm:$0xff]  }
0x1cfe   : > { %v4232_v36 = vpop.f32.mrf.mxu1 }
0x1d00   : > { %v5644_v47 = vpop.f32.mrf.mxu1 }
0x1d01   : > { %v5901_v47 = vld [vmem:[#allocation8 + $0xd8] sm:$0xff]  }
0x1d02   : > { %v4235_v52 = vpop.f32.mrf.mxu1 }
0x1d03   : > { %v4240_v40 = vpack.c.bf16 %v4235_v52, %v4232_v36  ;;  %v5900_v36 = vld [vmem:[#allocation8 + $0xa0] sm:$0xff]   ;;  %v5902_v52 = vld [vmem:[#allocation8 + $0x98] sm:$0xff]  }
0x1d04   : > { %v5645_v59 = vpop.f32.mrf.mxu1 }
0x1d05   : > { %5651 = vmatmul.mubr.msk.bf16.vlgmr.msra.gmra.mxu0 %vm973_vm3, %v4240_v40 }
0x1d06   : > { %5325 = vmatpush3.bf16.msra.mxu0 %v5894_v26 }
0x1d07   : > { %5326 = vmatprep.subr.bf16.mxu0 %v5895_v30 }
0x1d0a   : > { %5327 = vmatpush3.bf16.msra.mxu0 %v5896_v42 }
0x1d0b   : > { %5328 = vmatprep.subr.bf16.mxu0 %v5897_v20 }
0x1d0e   : > { %5329 = vmatpush3.bf16.msra.mxu0 %v5898_v46 }
0x1d0f   : > { %5330 = vmatprep.subr.bf16.mxu0 %v5899_v21 }
0x1d12   : > { %5331 = vmatpush3.bf16.msra.mxu0 %v5900_v36 }
0x1d13   : > { %5332 = vmatprep.subr.bf16.mxu0 %v5901_v47 }
0x1d16   : > { %5333 = vmatpush3.bf16.msra.mxu0 %v5902_v52 }
0x1dc5   : > { %v5652_v54 = vpop.f32.mrf.mxu0 }
0x1dc6   : > { %v4310_v1 = vadd.f32 %v5652_v54, %v7029_v55 }
0x1dc7   : > { %v4293_v60 = vpop.f32.mrf.mxu0 }
0x1dc8   : > { %v4308_v58 = vadd.f32 %v4293_v60, %v7033_v38  ;;  %v4322_v50 = vadd.f32 %v5124_v49, %v4310_v1 }
0x1dc9   : > { %v5653_v25 = vpop.f32.mrf.mxu0 }
0x1dca   : > { %v4320_v56 = vadd.f32 %v5124_v49, %v4308_v58  ;;  %v4311_v37 = vadd.f32 %v5653_v25, %v7037_v39  ;;  %v4326_v35 = vadd.f32 %v4322_v50, %v6827_v41  ;;  %v5869_v39 = vld [vmem:[#allocation7 + $0xf0] ss:$8 sps:$4 sm:$0xff]  }
0x1dcb   : > { %v4296_v62 = vpop.f32.mrf.mxu0  ;;  %4509 = vmatpush1.bf16.msra.mxu1 %v5869_v39 }
0x1dcc   : > { %v4323_v48 = vadd.f32 %v5124_v49, %v4311_v37  ;;  %v4309_v53 = vadd.f32 %v4296_v62, %v7039_v6  ;;  %v4324_v33 = vadd.f32 %v4320_v56, %v6818_v12  ;;  %4510 = vmatprep.subr.bf16.mxu1 %v5874_v15  ;;  %v5908_v15 = vld [vmem:[#allocation8 + $0x80] sm:$0xff]  }
0x1dce   : > { %v4321_v51 = vadd.f32 %v5124_v49, %v4309_v53  ;;  %4332 = vadd.xlane.f32.xlu1 %v4324_v33  ;;  %v4327_v27 = vadd.f32 %v4323_v48, %v6829_v17 }
0x1dcf   : > { %4511 = vmatpush1.bf16.msra.mxu1 %v5872_v16 }
0x1dd0   : > { %v4325_v38 = vadd.f32 %v4321_v51, %v6820_v5  ;;  %4512 = vmatprep.subr.bf16.mxu1 %v5877_v28  ;;  %v5127_v51 = vld [vmem:[%s7184_s8 + $0x1] ss:$0 sm:$0xff] }
0x1dd2   : > { %4334 = vadd.xlane.f32.xlu0 %v4325_v38  ;;  %4338 = vadd.xlane.f32.xlu1 %v4327_v27 }
0x1dd3   : > { %4513 = vmatpush1.bf16.msra.mxu1 %v5875_v8 }
0x1dd4   : > { %4514 = vmatprep.subr.bf16.mxu1 %v5880_v22 }
0x1dd6   : > { %4336 = vadd.xlane.f32.xlu0 %v4326_v35 }
0x1dd7   : > { %4515 = vmatpush1.bf16.msra.mxu1 %v5878_v29 }
0x1dd8   : > { %4516 = vmatprep.subr.bf16.mxu1 %v5883_v34 }
0x1ddb   : > { %4517 = vmatpush1.bf16.msra.mxu1 %v5881_v23 }
0x1ddc   : > { %4518 = vmatprep.subr.bf16.mxu1 %v5886_v3 }
0x1ddf   : > { %4519 = vmatpush1.bf16.msra.mxu1 %v5884_v45 }
0x1de0   : > { %4520 = vmatprep.subr.bf16.mxu1 %v5889_v7 }
0x1de3   : > { %4521 = vmatpush1.bf16.msra.mxu1 %v5887_v44 }
0x1de4   : > { %4522 = vmatprep.subr.bf16.mxu1 %v5892_v61 }
0x1de7   : > { %4523 = vmatpush1.bf16.msra.mxu1 %v5890_v18 }
0x1e57   : > { %v4333_v55 = vpop.xlane.xlu1 %4332 }
0x1e58   : > { %v4340_v6 = vmul.f32 0.0078125, %v4333_v55 }
0x1e5a   : > { %v7066_v43 = vsub.f32 %v4324_v33, %v4340_v6 }
0x1e5b   : > { %v4335_v12 = vpop.xlane.xlu0 %4334  ;;  %v4339_v11 = vpop.xlane.xlu1 %4338 }
0x1e5c   : > { %v4341_v4 = vmul.f32 0.0078125, %v4335_v12  ;;  %v4343_v63 = vmul.f32 0.0078125, %v4339_v11  ;;  %v4348_v5 = vmul.f32 %v7066_v43, %v7066_v43 }
0x1e5e   : > { %v7070_v17 = vsub.f32 %v4325_v38, %v4341_v4  ;;  %4352 = vadd.xlane.f32.xlu0 %v4348_v5  ;;  %v7072_v0 = vsub.f32 %v4327_v27, %v4343_v63 }
0x1e5f   : > { %v4337_v41 = vpop.xlane.xlu0 %4336 }
0x1e60   : > { %v4342_v13 = vmul.f32 0.0078125, %v4337_v41  ;;  %v4349_v24 = vmul.f32 %v7070_v17, %v7070_v17  ;;  %v4351_v10 = vmul.f32 %v7072_v0, %v7072_v0 }
0x1e62   : > { %v7076_v31 = vsub.f32 %v4326_v35, %v4342_v13  ;;  %4354 = vadd.xlane.f32.xlu1 %v4349_v24  ;;  %v5128_v35 = vld [vmem:[%s7185_s9 + $0x1] ss:$0 sm:$0xff]  ;;  %v5903_v24 = vld [vmem:[#allocation8 + $0xd0] sm:$0xff]  }
0x1e63   : > { %5334 = vmatprep.subr.bf16.mxu0 %v5903_v24 }
0x1e64   : > { %v4350_v14 = vmul.f32 %v7076_v31, %v7076_v31 }
0x1e66   : > { %4356 = vadd.xlane.f32.xlu0 %v4350_v14  ;;  %4358 = vadd.xlane.f32.xlu1 %v4351_v10  ;;  %v5906_v14 = vld [vmem:[#allocation8 + $0x88] sm:$0xff]   ;;  %v5907_v10 = vld [vmem:[#allocation8 + $0xc0] sm:$0xff]  }
0x1ee7   : > { %v4353_v40 = vpop.xlane.xlu0 %4352 }
0x1ee8   : > { %v4360_v59 = vmul.f32 0.0078125, %v4353_v40 }
0x1eea   : > { %v4364_v54 = vadd.f32 1e-05, %v4360_v59 }
0x1eeb   : > { %v4355_v60 = vpop.xlane.xlu1 %4354 }
0x1eec   : > { %6053 = vrsqrt.f32 %v4364_v54  ;;  %v4361_v58 = vmul.f32 0.0078125, %v4355_v60 }
0x1eee   : > { %v4365_v49 = vadd.f32 1e-05, %v4361_v58 }
0x1eef   : > { %v4357_v25 = vpop.xlane.xlu0 %4356  ;;  %v4359_v56 = vpop.xlane.xlu1 %4358 }
0x1ef0   : > { %6055 = vrsqrt.f32 %v4365_v49  ;;  %v4362_v37 = vmul.f32 0.0078125, %v4357_v25  ;;  %v4363_v62 = vmul.f32 0.0078125, %v4359_v56  ;;  %v5147_v25 = vld [vmem:[%s7189_s13 + $0x1] ss:$0 sm:$0xff] }
0x1ef2   : > { %v4366_v1 = vadd.f32 1e-05, %v4362_v37  ;;  %v4367_v48 = vadd.f32 1e-05, %v4363_v62 }
0x1ef4   : > { %6057 = vrsqrt.f32 %v4366_v1 }
0x1ef5   : > { %6059 = vrsqrt.f32 %v4367_v48 }
0x1ef9   : > { %v6054_v53 = vpop.eup %6053 }
0x1efa   : > { %v4372_v33 = vmul.f32 %v6054_v53, %v7066_v43 }
0x1efc   : > { %v4382_v27 = vmul.f32 %v5127_v51, %v4372_v33 }
0x1efd   : > { %v6056_v50 = vpop.eup %6055 }
0x1efe   : > { %v4373_v38 = vmul.f32 %v6056_v50, %v7070_v17  ;;  %v7090_v6 = vadd.f32 %v5128_v35, %v4382_v27 }
0x1f00   : > { %v4383_v39 = vmul.f32 %v5127_v51, %v4373_v38 }
0x1f01   : > { %v6058_v9 = vpop.eup %6057 }
0x1f02   : > { %v6060_v55 = vpop.eup %6059  ;;  %v7092_v12 = vadd.f32 %v5128_v35, %v4383_v39  ;;  %v4374_v43 = vmul.f32 %v6058_v9, %v7076_v31  ;;  %v5904_v31 = vld [vmem:[#allocation8 + $0x90] sm:$0xff]  }
0x1f03   : > { %v4375_v11 = vmul.f32 %v6060_v55, %v7072_v0  ;;  %5335 = vmatpush3.bf16.msra.mxu0 %v5904_v31  ;;  %v5905_v0 = vld [vmem:[#allocation8 + $0xc8] sm:$0xff]  }
0x1f04   : > { %v4396_v4 = vpack.c.bf16 %v7092_v12, %v7090_v6  ;;  %v4384_v63 = vmul.f32 %v5127_v51, %v4374_v43  ;;  %5336 = vmatprep.subr.bf16.mxu0 %v5905_v0 }
0x1f05   : > { %v4385_v5 = vmul.f32 %v5127_v51, %v4375_v11 }
0x1f06   : > { %4541 = vmatmul.mubr.bf16.vlgmr.msra.gmra.mxu1 %v4396_v4  ;;  %v7099_v17 = vadd.f32 %v5128_v35, %v4384_v63 }
0x1f07   : > { %4550 = vmatprep.mubr.bf16.mxu1 %v6257_v32  ;;  %v7101_v41 = vadd.f32 %v5128_v35, %v4385_v5  ;;  %5337 = vmatpush3.bf16.msra.mxu0 %v5906_v14  ;;  %v5129_v32 = vld [vmem:[%s7187_s11 + $0x2] sm:$0x3] }
0x1f08   : > { %5338 = vmatprep.subr.bf16.mxu0 %v5907_v10  ;;  %v4425_v28 = vrot.slane %v5129_v32, %v6505_v57  ;;  %v4421_v8 = vrot.slane %v5129_v32, %v6512_v2 }
0x1f09   : > { %v4397_v13 = vpack.c.bf16 %v7101_v41, %v7099_v17 }
0x1f0b   : > { %5339 = vmatpush3.bf16.msra.mxu0 %v5908_v15 }
0x1f0e   : > { %4551 = vmatmul.mubr.bf16.gmra.mxu1 %v4397_v13 }
0x1fc6   : > { %v4542_v16 = vpop.f32.mrf.mxu1 }
0x1fc7   : > { %v4543_v3 = vadd.f32 %v4542_v16, %v4421_v8 }
0x1fc8   : > { %v4544_v22 = vpop.f32.mrf.mxu1 }
0x1fc9   : > { %v4545_v23 = vadd.f32 %v4544_v22, %v4425_v28  ;;  %v4561_v26 = vmax.f32 %v4543_v3, 0.0 }
0x1fca   : > { %v4546_v29 = vpop.f32.mrf.mxu1 }
0x1fcb   : > { %v4547_v34 = vadd.f32 %v4546_v29, %v4421_v8  ;;  %v4562_v18 = vmax.f32 %v4545_v23, 0.0 }
0x1fcc   : > { %v4548_v45 = vpop.f32.mrf.mxu1 }
0x1fcd   : > { %v4549_v7 = vadd.f32 %v4548_v45, %v4425_v28  ;;  %v4563_v44 = vmax.f32 %v4547_v34, 0.0 }
0x1fce   : > { %v4552_v61 = vpop.f32.mrf.mxu1 }
0x1fcf   : > { %v4564_v19 = vmax.f32 %v4549_v7, 0.0  ;;  %v4569_v20 = vpack.c.bf16 %v4563_v44, %v4561_v26  ;;  %v4553_v2 = vadd.f32 %v4552_v61, %v4421_v8 }
0x1fd0   : > { %v4554_v30 = vpop.f32.mrf.mxu1 }
0x1fd1   : > { %v4570_v42 = vpack.c.bf16 %v4564_v19, %v4562_v18  ;;  %v4555_v21 = vadd.f32 %v4554_v30, %v4425_v28  ;;  %v4565_v54 = vmax.f32 %v4553_v2, 0.0 }
0x1fd2   : > { %v4556_v46 = vpop.f32.mrf.mxu1 }
0x1fd3   : > { %v4557_v57 = vadd.f32 %v4556_v46, %v4421_v8  ;;  %4742 = vmatprep.mubr.bf16.mxu0 %v4570_v42  ;;  %v4566_v40 = vmax.f32 %v4555_v21, 0.0  ;;  %v5166_v42 = vld [vmem:[%s7190_s14 + $0x1] ss:$0 sm:$0xff] }
0x1fd4   : > { %v4558_v36 = vpop.f32.mrf.mxu1  ;;  %4743 = vmatmul.mubr.bf16.vlgmr.msra.gmra.mxu0 %v4569_v20  ;;  %v5167_v46 = vld [vmem:[%s7191_s15 + $0x1] ss:$0 sm:$0xff] }
0x1fd5   : > { %v4559_v47 = vadd.f32 %v4558_v36, %v4425_v28  ;;  %v4567_v52 = vmax.f32 %v4557_v57, 0.0 }
0x1fd7   : > { %v4568_v59 = vmax.f32 %v4559_v47, 0.0  ;;  %v4571_v58 = vpack.c.bf16 %v4567_v52, %v4565_v54 }
0x1fd9   : > { %v4572_v60 = vpack.c.bf16 %v4568_v59, %v4566_v40 }
0x1fdb   : > { %4750 = vmatprep.mubr.bf16.mxu0 %v4572_v60 }
0x1fdc   : > { %4751 = vmatmul.mubr.bf16.gmra.mxu0 %v4571_v58 }
0x2094   : > { %v5340_v49 = vpop.f32.mrf.mxu0 }
0x2096   : > { %v5341_v56 = vpop.f32.mrf.mxu0 }
0x2097   : > { %v5342_v37 = vadd.f32 %v5341_v56, %v5340_v49 }
0x2098   : > { %v5343_v62 = vpop.f32.mrf.mxu0 }
0x2099   : > { %v4745_v1 = vadd.f32 %v5342_v37, %v5147_v25 }
0x209a   : > { %v5344_v48 = vpop.f32.mrf.mxu0 }
0x209b   : > { %v5345_v53 = vadd.f32 %v5344_v48, %v5343_v62  ;;  %v4759_v33 = vadd.f32 %v4745_v1, %v7090_v6 }
0x209c   : > { %v5346_v51 = vpop.f32.mrf.mxu0 }
0x209d   : > { %v4748_v50 = vadd.f32 %v5345_v53, %v5147_v25  ;;  %4767 = vadd.xlane.f32.xlu0 %v4759_v33 }
0x209e   : > { %v5347_v38 = vpop.f32.mrf.mxu0 }
0x209f   : > { %v5348_v27 = vadd.f32 %v5347_v38, %v5346_v51  ;;  %v4760_v35 = vadd.f32 %v4748_v50, %v7092_v12 }
0x20a0   : > { %v5349_v39 = vpop.f32.mrf.mxu0 }
0x20a1   : > { %v4753_v9 = vadd.f32 %v5348_v27, %v5147_v25  ;;  %4769 = vadd.xlane.f32.xlu1 %v4760_v35 }
0x20a2   : > { %v5350_v55 = vpop.f32.mrf.mxu0 }
0x20a3   : > { %v5351_v43 = vadd.f32 %v5350_v55, %v5349_v39  ;;  %v4761_v11 = vadd.f32 %v4753_v9, %v7099_v17 }
0x20a5   : > { %v4756_v4 = vadd.f32 %v5351_v43, %v5147_v25  ;;  %4771 = vadd.xlane.f32.xlu0 %v4761_v11 }
0x20a7   : > { %v4762_v63 = vadd.f32 %v4756_v4, %v7101_v41 }
0x20a9   : > { %4773 = vadd.xlane.f32.xlu1 %v4762_v63 }
0x2126   : > { %v4768_v6 = vpop.xlane.xlu0 %4767 }
0x2127   : > { %v4775_v5 = vmul.f32 0.0078125, %v4768_v6 }
0x2129   : > { %v4779_v13 = vsub.f32 %v4759_v33, %v4775_v5 }
0x212a   : > { %v4770_v24 = vpop.xlane.xlu1 %4769 }
0x212b   : > { %v4776_v31 = vmul.f32 0.0078125, %v4770_v24  ;;  %v4783_v0 = vmul.f32 %v4779_v13, %v4779_v13 }
0x212d   : > { %v4780_v14 = vsub.f32 %v4760_v35, %v4776_v31  ;;  %4787 = vadd.xlane.f32.xlu0 %v4783_v0 }
0x212e   : > { %v4772_v12 = vpop.xlane.xlu0 %4771 }
0x212f   : > { %v4777_v10 = vmul.f32 0.0078125, %v4772_v12  ;;  %v4784_v15 = vmul.f32 %v4780_v14, %v4780_v14 }
0x2131   : > { %v4781_v32 = vsub.f32 %v4761_v11, %v4777_v10  ;;  %4789 = vadd.xlane.f32.xlu1 %v4784_v15 }
0x2132   : > { %v4774_v16 = vpop.xlane.xlu1 %4773 }
0x2133   : > { %v4778_v17 = vmul.f32 0.0078125, %v4774_v16  ;;  %v4785_v28 = vmul.f32 %v4781_v32, %v4781_v32 }
0x2135   : > { %v4782_v8 = vsub.f32 %v4762_v63, %v4778_v17  ;;  %4791 = vadd.xlane.f32.xlu0 %v4785_v28 }
0x2137   : > { %v4786_v41 = vmul.f32 %v4782_v8, %v4782_v8 }
0x2139   : > { %4793 = vadd.xlane.f32.xlu1 %v4786_v41 }
0x21b6   : > { %v4788_v22 = vpop.xlane.xlu0 %4787 }
0x21b7   : > { %v4795_v29 = vmul.f32 0.0078125, %v4788_v22 }
0x21b9   : > { %v4799_v23 = vadd.f32 1e-05, %v4795_v29 }
0x21ba   : > { %v4790_v34 = vpop.xlane.xlu1 %4789 }
0x21bb   : > { %6061 = vrsqrt.f32 %v4799_v23  ;;  %v4796_v3 = vmul.f32 0.0078125, %v4790_v34 }
0x21bd   : > { %v4800_v45 = vadd.f32 1e-05, %v4796_v3 }
0x21be   : > { %v4792_v7 = vpop.xlane.xlu0 %4791 }
0x21bf   : > { %6063 = vrsqrt.f32 %v4800_v45  ;;  %v4797_v44 = vmul.f32 0.0078125, %v4792_v7 }
0x21c1   : > { %v4801_v61 = vadd.f32 1e-05, %v4797_v44 }
0x21c2   : > { %v4794_v18 = vpop.xlane.xlu1 %4793 }
0x21c3   : > { %6065 = vrsqrt.f32 %v4801_v61  ;;  %v4798_v19 = vmul.f32 0.0078125, %v4794_v18 }
0x21c5   : > { %v4802_v26 = vadd.f32 1e-05, %v4798_v19 }
0x21c7   : > { %6067 = vrsqrt.f32 %v4802_v26 }
0x21c8   : > { %v6062_v30 = vpop.eup %6061 }
0x21c9   : > { %v4807_v20 = vmul.f32 %v6062_v30, %v4779_v13 }
0x21cb   : > { %v4817_v21 = vmul.f32 %v5166_v42, %v4807_v20 }
0x21cc   : > { %v6064_v57 = vpop.eup %6063 }
0x21cd   : > { %v4827_v2 = vadd.f32 %v5167_v46, %v4817_v21  ;;  %v4808_v36 = vmul.f32 %v6064_v57, %v4780_v14 }
0x21cf   : > { %4831 = vst [vmem:[%s576_s20] sm:$0xff] %v4827_v2  ;;  %v4818_v47 = vmul.f32 %v5166_v42, %v4808_v36 }
0x21d0   : > { %v6066_v52 = vpop.eup %6065 }
0x21d1   : > { %v4828_v40 = vadd.f32 %v5167_v46, %v4818_v47  ;;  %v4809_v59 = vmul.f32 %v6066_v52, %v4781_v32 }
0x21d3   : > { %4832 = vst [vmem:[%s576_s20 + $0x8] sm:$0xff] %v4828_v40  ;;  %v4819_v54 = vmul.f32 %v5166_v42, %v4809_v59 }
0x21d4   : > { %v6068_v60 = vpop.eup %6067 }
0x21d5   : > { %v4829_v58 = vadd.f32 %v5167_v46, %v4819_v54  ;;  %v4810_v49 = vmul.f32 %v6068_v60, %v4782_v8 }
0x21d7   : > { %4833 = vst [vmem:[%s576_s20 + $0x10] sm:$0xff] %v4829_v58  ;;  %v4820_v25 = vmul.f32 %v5166_v42, %v4810_v49 }
0x21d9   : > { %v4830_v56 = vadd.f32 %v5167_v46, %v4820_v25 }
0x21db   : > { %4834 = vst [vmem:[%s576_s20 + $0x18] sm:$0xff] %v4830_v56 }
0x21dc   : > { %6186 = shalt.err (!%p6183_p11)
}
0x21dd   : > { %s6187_s30 = scalar_lea.hbm %s7130_s27, 512  ;;  %s6191_s26 = scalar_lea.hbm %s7216_s29, 1024 }
0x21de   : > { %p6188_p0 = scmp.ne.s32.totalorder %s7130_s27, %s6187_s30  ;;  %p6192_p3 = scmp.lt.s32.totalorder %s7130_s27, %s7216_s29 }
0x21df   : > { %p6193_p10 = scmp.lt.s32.totalorder %s6191_s26, %s6187_s30 }
0x21e0   : > { %p6189_p1 = pnand %p6188_p0, %p6389_p5 }
0x21e1   : > { %p6194_p9 = por %p6193_p10, %p6192_p3 }
0x21e2   : > { %p6190_p2 = pneg %p6189_p1 }
0x21e4   : > { %p6195_p12 = pnand %p6194_p9, %p6190_p2 }
0x21e6   : > { %6198 = shalt.err (!%p6195_p12)
}
0x21e7   : > { %s6264_s28 = smov 128   ;;  %s6265_s25 = smov 8  }
0x21e8   : > { %5671 = dma.vmem_to_hbm [thread:$0]  (%p6389_p5), %s7132_s18, 512, %s7130_s27, %s7136_s19, %s6264_s28, %s6264_s28, %s6265_s25  }
0x21e9 PF: > { %s7217_s17 = sld [smem:[#allocation17_spill]] }
0x21ea   : > { %s7218_s16 = sld [smem:[#allocation15_spill]] }
0x21ef   : > { %p5698_p13 = scmp.ge.s32.totalorder %s7217_s17, 2 }
0x21f0   : > { %s4865_s23 = sand.u32 1, %s7218_s16  }
0x21f1   : > { %p5687_p4 = pnand %p5698_p13, %p6393_p6  ;;  %s4866_s30 = scalar_lea.sflag [#allocation4], %s4865_s23 }
0x21f3   : > { %p5688_p7 = pneg %p5687_p4 }
0x21f5   : > { %6228 = dma.done.wait (%p5688_p7), %s4866_s30, 512  }
0x21f6   : > { %6230 = vsyncadd (%p5688_p7), %s4866_s30, 4294966784  ;;  %s7220_s24 = sld [smem:[#allocation18_spill]]  ;;  %s7223_s21 = smov %s6237_s22 }
0x21f7   : > { %s7221_s26 = sld [smem:[#allocation16_spill]] }
0x21f8   : > { %s7222_s23 = sld [smem:[#allocation19_spill]] }
0x21fc   : > { %p29_p8 = scmp.ge.s32.totalorder %s7220_s24, 4  }
0x21fd   : > { %s7224_s22 = smov %s7221_s26 }
0x21fe   :  { %31 = sbr.rel (!%p29_p8) target bundleno = 9 (0x9), region = 148 }
0x2203   :  { %4871 = vsyncpa [#allocation3], 1 }
0x2204   :  { %4873 = vsyncpa [#allocation3 + $0x1], 1 }
0x2205   :  { %4874 = vsyncpa [#allocation6], 1 }
0x2206   :  { %4875 = vsyncpa [#allocation9], 1 }
0x2207   :  { %4876 = vsyncpa [#allocation4], 1 }
0x2208   :  { %4878 = vsyncpa [#allocation4 + $0x1], 1 }

</bundles_post_ra>
